<compile_context>
chip_gen: v6e
topology: v6e:2x2x1
jax: 0.10.0
libtpu: 0.0.40
codegen_flags: <defaults>
</compile_context>

<pallas_src>
from functools import partial

import jax
import jax.numpy as jnp
from jax.experimental import pallas as pl
from jax.experimental.pallas import tpu as pltpu


def attn_max_kernel(x_ref, wq_ref, wk_ref, wv_ref, bq_ref, bv_ref,
                    wo_ref, bo_ref, o_ref, *, n_heads, head_dim):
    """Multi-head self-attention + seq-max for a tile of Bt batch elements.

    x_ref : (Bt, L, D) f32          embedding tile
    wq/wk/wv_ref : (D, D) bf16      full projection weights (wq pre-scaled)
    bq_ref : (1, D) f32             pre-scaled Q bias
    bv_ref : (1, D) f32             V bias  (K bias cancels in softmax)
    wo_ref : (D, d_out) bf16        output projection
    bo_ref : (1, d_out) f32
    o_ref  : (Bt, d_out) f32        pooled (max over seq) output rows
    """
    Bt, L, D = x_ref.shape
    d_out = o_ref.shape[-1]
    bf = jnp.bfloat16

    x = x_ref[...].astype(bf).reshape(Bt * L, D)                 # (Bt*L, D)

    # Full-width projections: bf16 operands, f32 accumulation on the MXU.
    q = (jnp.dot(x, wq_ref[...], preferred_element_type=jnp.float32)
         + bq_ref[...]).reshape(Bt, L, D)
    k = jnp.dot(x, wk_ref[...],
                preferred_element_type=jnp.float32).reshape(Bt, L, D)
    v = (jnp.dot(x, wv_ref[...], preferred_element_type=jnp.float32)
         + bv_ref[...]).reshape(Bt, L, D)

    ctx_heads = []
    for h in range(n_heads):                                     # H is small: static unroll
        sl = slice(h * head_dim, (h + 1) * head_dim)
        qh = q[:, :, sl].astype(bf)                              # (Bt, L, hd)
        kh = k[:, :, sl].astype(bf)
        vh = v[:, :, sl].astype(bf)

        # scores, batched over the Bt tile: (Bt, L, L); scale already in wq/bq.
        s = jax.lax.dot_general(
            qh, kh, dimension_numbers=(((2,), (2,)), ((0,), (0,))),
            preferred_element_type=jnp.float32)

        # numerically stable softmax along the key axis (f32 on VPU/EUP)
        m = jnp.max(s, axis=-1, keepdims=True)
        e = jnp.exp(s - m)
        denom = jnp.sum(e, axis=-1, keepdims=True)
        p = e * pl.reciprocal(denom, approx=True)                # EUP slot

        ctx_heads.append(jax.lax.dot_general(
            p.astype(bf), vh, dimension_numbers=(((2,), (1,)), ((0,), (0,))),
            preferred_element_type=jnp.float32))                 # (Bt, L, hd)

    # Head concat stays inside one 128-lane tile (D=64); single output matmul.
    ctx = jnp.concatenate(ctx_heads, axis=-1).reshape(Bt * L, D).astype(bf)
    out = (jnp.dot(ctx, wo_ref[...], preferred_element_type=jnp.float32)
           + bo_ref[...]).reshape(Bt, L, d_out)

    # torch.max(x, dim=1)[0]: max over the sequence axis; lane/sublane-dense store.
    o_ref[...] = jnp.max(out, axis=1)                            # (Bt, d_out)


def self_att_encoder_with_max(embedding, params, *, n_heads, block_batch=8):
    """embedding: (B, L, D) f32.  params: (wq, bq, wk, bk, wv, bv, wo, bo),
    weights in math layout (in_dim, out_dim)."""
    wq, bq, wk, bk, wv, bv, wo, bo = params
    B, L, D = embedding.shape
    H = n_heads
    assert D % H == 0, (D, H)
    hd = D // H
    d_out = wo.shape[-1]
    bf = jnp.bfloat16

    # Fold 1/sqrt(hd) into the Q projection; drop bk (cancels in softmax).
    scale = 1.0 / (hd ** 0.5)
    wq_s = (wq * scale).astype(bf)
    bq_s = (bq * scale).reshape(1, D).astype(jnp.float32)
    wk_b = wk.astype(bf)
    wv_b = wv.astype(bf)
    bv_2 = bv.reshape(1, D).astype(jnp.float32)
    wo_b = wo.astype(bf)
    bo_2 = bo.reshape(1, d_out).astype(jnp.float32)
    del bk  # per-query constant on the scores; exact no-op under softmax

    Bt = max(1, min(block_batch, B))
    n_blocks = pl.cdiv(B, Bt)
    B_pad = n_blocks * Bt
    x = embedding.astype(jnp.float32)
    if B_pad != B:
        x = jnp.pad(x, ((0, B_pad - B), (0, 0), (0, 0)))

    kern = partial(attn_max_kernel, n_heads=H, head_dim=hd)

    def full_spec(shape):
        n = len(shape)
        return pl.BlockSpec(shape, lambda b: (0,) * n)

    pooled = pl.pallas_call(
        kern,
        out_shape=jax.ShapeDtypeStruct((B_pad, d_out), jnp.float32),
        grid=(n_blocks,),
        in_specs=[
            pl.BlockSpec((Bt, L, D), lambda b: (b, 0, 0)),       # embedding tile
            full_spec((D, D)),                                   # wq (pre-scaled)
            full_spec((D, D)),                                   # wk
            full_spec((D, D)),                                   # wv
            full_spec((1, D)),                                   # bq (pre-scaled)
            full_spec((1, D)),                                   # bv
            full_spec((D, d_out)),                               # wo
            full_spec((1, d_out)),                               # bo
        ],
        out_specs=pl.BlockSpec((Bt, d_out), lambda b: (b, 0)),
        compiler_params=pltpu.CompilerParams(
            dimension_semantics=("parallel",)),                  # megacore splits batch
    )(x, wq_s, wk_b, wv_b, bq_s, bv_2, wo_b, bo_2)

    return pooled[:B]


def reference_forward(embedding, params, *, n_heads):
    """Pure-JAX reference with matching bf16-operand / f32-accumulate arithmetic
    (scale applied on scores, bk included, exact divide)."""
    wq, bq, wk, bk, wv, bv, wo, bo = params
    B, L, D = embedding.shape
    H = n_heads
    hd = D // H
    bf = jnp.bfloat16
    scale = 1.0 / (hd ** 0.5)
    xb = embedding.astype(bf)

    def proj(w, b):
        y = jnp.einsum("bld,de->ble", xb, w.astype(bf),
                       preferred_element_type=jnp.float32)
        return y + b[None, None, :].astype(jnp.float32)

    q = proj(wq, bq).reshape(B, L, H, hd)
    k = proj(wk, bk).reshape(B, L, H, hd)
    v = proj(wv, bv).reshape(B, L, H, hd)

    s = jnp.einsum("blhd,bmhd->bhlm", q.astype(bf), k.astype(bf),
                   preferred_element_type=jnp.float32) * scale
    m = jnp.max(s, axis=-1, keepdims=True)
    e = jnp.exp(s - m)
    p = e / jnp.sum(e, axis=-1, keepdims=True)

    ctx = jnp.einsum("bhlm,bmhd->blhd", p.astype(bf), v.astype(bf),
                     preferred_element_type=jnp.float32).reshape(B, L, D)
    out = jnp.einsum("bld,de->ble", ctx.astype(bf), wo.astype(bf),
                     preferred_element_type=jnp.float32) + bo[None, None, :]
    return jnp.max(out, axis=1)                                  # torch.max(x, dim=1)[0]


if __name__ == "__main__":
    # config: max_length=16, input_dim=64, n_attn_heads=4, encoder_output_dim=128
    B, L = 16, 16            # B=16 with Bt=8 -> grid=(2,): both v7x TCs active
    d_model, n_heads, d_output = 64, 4, 128

    key = jax.random.PRNGKey(0)
    ks = jax.random.split(key, 9)
    embedding = jax.random.normal(ks[0], (B, L, d_model), jnp.float32)

    def linear(kw, kb, fan_in, fan_out):
        w = 0.1 * jax.random.normal(kw, (fan_in, fan_out), jnp.float32)
        b = 0.1 * jax.random.normal(kb, (fan_out,), jnp.float32)
        return w, b

    wq, bq = linear(ks[1], ks[2], d_model, d_model)
    wk, bk = linear(ks[3], ks[4], d_model, d_model)
    wv, bv = linear(ks[5], ks[6], d_model, d_model)
    wo, bo = linear(ks[7], ks[8], d_model, d_output)
    params = (wq, bq, wk, bk, wv, bv, wo, bo)

    out = self_att_encoder_with_max(embedding, params, n_heads=n_heads,
                                    block_batch=8)
    out = jax.block_until_ready(out)

    ref = reference_forward(embedding, params, n_heads=n_heads)
    assert out.shape == ref.shape == (B, d_output), (out.shape, ref.shape)
    max_err = float(jnp.max(jnp.abs(out - ref)))
    # slack covers pl.reciprocal(approx=True) vs exact divide in the reference
    assert jnp.allclose(out, ref, atol=5e-3, rtol=5e-3), max_err
    print("KERNEL_OK")
</pallas_src>

<mosaic_0001>
module attributes {stable_mosaic.version = 11 : i64} {
  func.func @attn_max_kernel(%arg0: i32, %arg1: memref<8x16x64xf32, #tpu.memory_space<vmem>>, %arg2: memref<64x64xbf16, #tpu.memory_space<vmem>>, %arg3: memref<64x64xbf16, #tpu.memory_space<vmem>>, %arg4: memref<64x64xbf16, #tpu.memory_space<vmem>>, %arg5: memref<1x64xf32, #tpu.memory_space<vmem>>, %arg6: memref<1x64xf32, #tpu.memory_space<vmem>>, %arg7: memref<64x128xbf16, #tpu.memory_space<vmem>>, %arg8: memref<1x128xf32, #tpu.memory_space<vmem>>, %arg9: memref<8x128xf32, #tpu.memory_space<vmem>>) attributes {dimension_semantics = [#tpu.dimension_semantics<parallel>], iteration_bounds = array<i64: 2>, scalar_prefetch = 0 : i64, scratch_operands = 0 : i64, tpu.core_type = #tpu.core_type<tc>, window_params = [{transform_indices = @transform_0, window_bounds = array<i64: 8, 16, 64>}, {pipeline_mode = #tpu.pipeline_mode<synchronous>, transform_indices = @transform_1, window_bounds = array<i64: 64, 64>}, {pipeline_mode = #tpu.pipeline_mode<synchronous>, transform_indices = @transform_2, window_bounds = array<i64: 64, 64>}, {pipeline_mode = #tpu.pipeline_mode<synchronous>, transform_indices = @transform_3, window_bounds = array<i64: 64, 64>}, {pipeline_mode = #tpu.pipeline_mode<synchronous>, transform_indices = @transform_4, window_bounds = array<i64: 1, 64>}, {pipeline_mode = #tpu.pipeline_mode<synchronous>, transform_indices = @transform_5, window_bounds = array<i64: 1, 64>}, {pipeline_mode = #tpu.pipeline_mode<synchronous>, transform_indices = @transform_6, window_bounds = array<i64: 64, 128>}, {pipeline_mode = #tpu.pipeline_mode<synchronous>, transform_indices = @transform_7, window_bounds = array<i64: 1, 128>}, {transform_indices = @transform_8, window_bounds = array<i64: 8, 128>}]} {
    %c0 = arith.constant 0 : index
    %c0_0 = arith.constant 0 : index
    %c0_1 = arith.constant 0 : index
    %0 = vector.load %arg1[%c0, %c0_0, %c0_1] : memref<8x16x64xf32, #tpu.memory_space<vmem>>, vector<8x16x64xf32>
    %1 = arith.truncf %0 : vector<8x16x64xf32> to vector<8x16x64xbf16>
    %2 = vector.shape_cast %1 : vector<8x16x64xbf16> to vector<128x64xbf16>
    %c0_2 = arith.constant 0 : index
    %c0_3 = arith.constant 0 : index
    %3 = vector.load %arg2[%c0_2, %c0_3] : memref<64x64xbf16, #tpu.memory_space<vmem>>, vector<64x64xbf16>
    %cst = arith.constant dense<0.000000e+00> : vector<128x64xf32>
    %4 = tpu.matmul %2, %3, %cst {dimension_numbers = #tpu.dot_dimension_numbers<[1], [0], [0], [1], [0, 0, 1, 1], [], []>} : vector<128x64xbf16>, vector<64x64xbf16>, vector<128x64xf32> -> vector<128x64xf32>
    %c0_4 = arith.constant 0 : index
    %c0_5 = arith.constant 0 : index
    %5 = vector.load %arg5[%c0_4, %c0_5] : memref<1x64xf32, #tpu.memory_space<vmem>>, vector<1x64xf32>
    %6 = vector.broadcast %5 : vector<1x64xf32> to vector<128x64xf32>
    %7 = arith.addf %4, %6 : vector<128x64xf32>
    %8 = vector.shape_cast %7 : vector<128x64xf32> to vector<8x16x64xf32>
    %c0_6 = arith.constant 0 : index
    %c0_7 = arith.constant 0 : index
    %9 = vector.load %arg3[%c0_6, %c0_7] : memref<64x64xbf16, #tpu.memory_space<vmem>>, vector<64x64xbf16>
    %cst_8 = arith.constant dense<0.000000e+00> : vector<128x64xf32>
    %10 = tpu.matmul %2, %9, %cst_8 {dimension_numbers = #tpu.dot_dimension_numbers<[1], [0], [0], [1], [0, 0, 1, 1], [], []>} : vector<128x64xbf16>, vector<64x64xbf16>, vector<128x64xf32> -> vector<128x64xf32>
    %11 = vector.shape_cast %10 : vector<128x64xf32> to vector<8x16x64xf32>
    %c0_9 = arith.constant 0 : index
    %c0_10 = arith.constant 0 : index
    %12 = vector.load %arg4[%c0_9, %c0_10] : memref<64x64xbf16, #tpu.memory_space<vmem>>, vector<64x64xbf16>
    %cst_11 = arith.constant dense<0.000000e+00> : vector<128x64xf32>
    %13 = tpu.matmul %2, %12, %cst_11 {dimension_numbers = #tpu.dot_dimension_numbers<[1], [0], [0], [1], [0, 0, 1, 1], [], []>} : vector<128x64xbf16>, vector<64x64xbf16>, vector<128x64xf32> -> vector<128x64xf32>
    %c0_12 = arith.constant 0 : index
    %c0_13 = arith.constant 0 : index
    %14 = vector.load %arg6[%c0_12, %c0_13] : memref<1x64xf32, #tpu.memory_space<vmem>>, vector<1x64xf32>
    %15 = vector.broadcast %14 : vector<1x64xf32> to vector<128x64xf32>
    %16 = arith.addf %13, %15 : vector<128x64xf32>
    %17 = vector.shape_cast %16 : vector<128x64xf32> to vector<8x16x64xf32>
    %18 = vector.extract_strided_slice %8 {offsets = [0, 0, 0], sizes = [8, 16, 16], strides = [1, 1, 1]} : vector<8x16x64xf32> to vector<8x16x16xf32>
    %19 = arith.truncf %18 : vector<8x16x16xf32> to vector<8x16x16xbf16>
    %20 = vector.extract_strided_slice %11 {offsets = [0, 0, 0], sizes = [8, 16, 16], strides = [1, 1, 1]} : vector<8x16x64xf32> to vector<8x16x16xf32>
    %21 = arith.truncf %20 : vector<8x16x16xf32> to vector<8x16x16xbf16>
    %22 = vector.extract_strided_slice %17 {offsets = [0, 0, 0], sizes = [8, 16, 16], strides = [1, 1, 1]} : vector<8x16x64xf32> to vector<8x16x16xf32>
    %23 = arith.truncf %22 : vector<8x16x16xf32> to vector<8x16x16xbf16>
    %cst_14 = arith.constant dense<0.000000e+00> : vector<8x16x16xf32>
    %24 = tpu.matmul %19, %21, %cst_14 {dimension_numbers = #tpu.dot_dimension_numbers<[2], [2], [1], [1], [0, 0, 0, 1, 1, 1], [0], [0]>} : vector<8x16x16xbf16>, vector<8x16x16xbf16>, vector<8x16x16xf32> -> vector<8x16x16xf32>
    %cst_15 = arith.constant dense<0xFF800000> : vector<8x16xf32>
    %25 = vector.multi_reduction <maximumf>, %24, %cst_15 [2] : vector<8x16x16xf32> to vector<8x16xf32>
    %26 = vector.shape_cast %25 : vector<8x16xf32> to vector<8x16x1xf32>
    %27 = vector.broadcast %26 : vector<8x16x1xf32> to vector<8x16x16xf32>
    %28 = arith.subf %24, %27 : vector<8x16x16xf32>
    %29 = math.exp %28 : vector<8x16x16xf32>
    %cst_16 = arith.constant dense<0.000000e+00> : vector<8x16xf32>
    %30 = vector.multi_reduction <add>, %29, %cst_16 [2] : vector<8x16x16xf32> to vector<8x16xf32>
    %31 = vector.shape_cast %30 : vector<8x16xf32> to vector<8x16x1xf32>
    %32 = tpu.reciprocal %31 {approx = true} : vector<8x16x1xf32> -> vector<8x16x1xf32>
    %33 = vector.broadcast %32 : vector<8x16x1xf32> to vector<8x16x16xf32>
    %34 = arith.mulf %29, %33 : vector<8x16x16xf32>
    %35 = arith.truncf %34 : vector<8x16x16xf32> to vector<8x16x16xbf16>
    %cst_17 = arith.constant dense<0.000000e+00> : vector<8x16x16xf32>
    %36 = tpu.matmul %35, %23, %cst_17 {dimension_numbers = #tpu.dot_dimension_numbers<[2], [1], [1], [2], [0, 0, 0, 1, 1, 2], [0], [0]>} : vector<8x16x16xbf16>, vector<8x16x16xbf16>, vector<8x16x16xf32> -> vector<8x16x16xf32>
    %37 = vector.extract_strided_slice %8 {offsets = [0, 0, 16], sizes = [8, 16, 16], strides = [1, 1, 1]} : vector<8x16x64xf32> to vector<8x16x16xf32>
    %38 = arith.truncf %37 : vector<8x16x16xf32> to vector<8x16x16xbf16>
    %39 = vector.extract_strided_slice %11 {offsets = [0, 0, 16], sizes = [8, 16, 16], strides = [1, 1, 1]} : vector<8x16x64xf32> to vector<8x16x16xf32>
    %40 = arith.truncf %39 : vector<8x16x16xf32> to vector<8x16x16xbf16>
    %41 = vector.extract_strided_slice %17 {offsets = [0, 0, 16], sizes = [8, 16, 16], strides = [1, 1, 1]} : vector<8x16x64xf32> to vector<8x16x16xf32>
    %42 = arith.truncf %41 : vector<8x16x16xf32> to vector<8x16x16xbf16>
    %cst_18 = arith.constant dense<0.000000e+00> : vector<8x16x16xf32>
    %43 = tpu.matmul %38, %40, %cst_18 {dimension_numbers = #tpu.dot_dimension_numbers<[2], [2], [1], [1], [0, 0, 0, 1, 1, 1], [0], [0]>} : vector<8x16x16xbf16>, vector<8x16x16xbf16>, vector<8x16x16xf32> -> vector<8x16x16xf32>
    %cst_19 = arith.constant dense<0xFF800000> : vector<8x16xf32>
    %44 = vector.multi_reduction <maximumf>, %43, %cst_19 [2] : vector<8x16x16xf32> to vector<8x16xf32>
    %45 = vector.shape_cast %44 : vector<8x16xf32> to vector<8x16x1xf32>
    %46 = vector.broadcast %45 : vector<8x16x1xf32> to vector<8x16x16xf32>
    %47 = arith.subf %43, %46 : vector<8x16x16xf32>
    %48 = math.exp %47 : vector<8x16x16xf32>
    %cst_20 = arith.constant dense<0.000000e+00> : vector<8x16xf32>
    %49 = vector.multi_reduction <add>, %48, %cst_20 [2] : vector<8x16x16xf32> to vector<8x16xf32>
    %50 = vector.shape_cast %49 : vector<8x16xf32> to vector<8x16x1xf32>
    %51 = tpu.reciprocal %50 {approx = true} : vector<8x16x1xf32> -> vector<8x16x1xf32>
    %52 = vector.broadcast %51 : vector<8x16x1xf32> to vector<8x16x16xf32>
    %53 = arith.mulf %48, %52 : vector<8x16x16xf32>
    %54 = arith.truncf %53 : vector<8x16x16xf32> to vector<8x16x16xbf16>
    %cst_21 = arith.constant dense<0.000000e+00> : vector<8x16x16xf32>
    %55 = tpu.matmul %54, %42, %cst_21 {dimension_numbers = #tpu.dot_dimension_numbers<[2], [1], [1], [2], [0, 0, 0, 1, 1, 2], [0], [0]>} : vector<8x16x16xbf16>, vector<8x16x16xbf16>, vector<8x16x16xf32> -> vector<8x16x16xf32>
    %56 = vector.extract_strided_slice %8 {offsets = [0, 0, 32], sizes = [8, 16, 16], strides = [1, 1, 1]} : vector<8x16x64xf32> to vector<8x16x16xf32>
    %57 = arith.truncf %56 : vector<8x16x16xf32> to vector<8x16x16xbf16>
    %58 = vector.extract_strided_slice %11 {offsets = [0, 0, 32], sizes = [8, 16, 16], strides = [1, 1, 1]} : vector<8x16x64xf32> to vector<8x16x16xf32>
    %59 = arith.truncf %58 : vector<8x16x16xf32> to vector<8x16x16xbf16>
    %60 = vector.extract_strided_slice %17 {offsets = [0, 0, 32], sizes = [8, 16, 16], strides = [1, 1, 1]} : vector<8x16x64xf32> to vector<8x16x16xf32>
    %61 = arith.truncf %60 : vector<8x16x16xf32> to vector<8x16x16xbf16>
    %cst_22 = arith.constant dense<0.000000e+00> : vector<8x16x16xf32>
    %62 = tpu.matmul %57, %59, %cst_22 {dimension_numbers = #tpu.dot_dimension_numbers<[2], [2], [1], [1], [0, 0, 0, 1, 1, 1], [0], [0]>} : vector<8x16x16xbf16>, vector<8x16x16xbf16>, vector<8x16x16xf32> -> vector<8x16x16xf32>
    %cst_23 = arith.constant dense<0xFF800000> : vector<8x16xf32>
    %63 = vector.multi_reduction <maximumf>, %62, %cst_23 [2] : vector<8x16x16xf32> to vector<8x16xf32>
    %64 = vector.shape_cast %63 : vector<8x16xf32> to vector<8x16x1xf32>
    %65 = vector.broadcast %64 : vector<8x16x1xf32> to vector<8x16x16xf32>
    %66 = arith.subf %62, %65 : vector<8x16x16xf32>
    %67 = math.exp %66 : vector<8x16x16xf32>
    %cst_24 = arith.constant dense<0.000000e+00> : vector<8x16xf32>
    %68 = vector.multi_reduction <add>, %67, %cst_24 [2] : vector<8x16x16xf32> to vector<8x16xf32>
    %69 = vector.shape_cast %68 : vector<8x16xf32> to vector<8x16x1xf32>
    %70 = tpu.reciprocal %69 {approx = true} : vector<8x16x1xf32> -> vector<8x16x1xf32>
    %71 = vector.broadcast %70 : vector<8x16x1xf32> to vector<8x16x16xf32>
    %72 = arith.mulf %67, %71 : vector<8x16x16xf32>
    %73 = arith.truncf %72 : vector<8x16x16xf32> to vector<8x16x16xbf16>
    %cst_25 = arith.constant dense<0.000000e+00> : vector<8x16x16xf32>
    %74 = tpu.matmul %73, %61, %cst_25 {dimension_numbers = #tpu.dot_dimension_numbers<[2], [1], [1], [2], [0, 0, 0, 1, 1, 2], [0], [0]>} : vector<8x16x16xbf16>, vector<8x16x16xbf16>, vector<8x16x16xf32> -> vector<8x16x16xf32>
    %75 = vector.extract_strided_slice %8 {offsets = [0, 0, 48], sizes = [8, 16, 16], strides = [1, 1, 1]} : vector<8x16x64xf32> to vector<8x16x16xf32>
    %76 = arith.truncf %75 : vector<8x16x16xf32> to vector<8x16x16xbf16>
    %77 = vector.extract_strided_slice %11 {offsets = [0, 0, 48], sizes = [8, 16, 16], strides = [1, 1, 1]} : vector<8x16x64xf32> to vector<8x16x16xf32>
    %78 = arith.truncf %77 : vector<8x16x16xf32> to vector<8x16x16xbf16>
    %79 = vector.extract_strided_slice %17 {offsets = [0, 0, 48], sizes = [8, 16, 16], strides = [1, 1, 1]} : vector<8x16x64xf32> to vector<8x16x16xf32>
    %80 = arith.truncf %79 : vector<8x16x16xf32> to vector<8x16x16xbf16>
    %cst_26 = arith.constant dense<0.000000e+00> : vector<8x16x16xf32>
    %81 = tpu.matmul %76, %78, %cst_26 {dimension_numbers = #tpu.dot_dimension_numbers<[2], [2], [1], [1], [0, 0, 0, 1, 1, 1], [0], [0]>} : vector<8x16x16xbf16>, vector<8x16x16xbf16>, vector<8x16x16xf32> -> vector<8x16x16xf32>
    %cst_27 = arith.constant dense<0xFF800000> : vector<8x16xf32>
    %82 = vector.multi_reduction <maximumf>, %81, %cst_27 [2] : vector<8x16x16xf32> to vector<8x16xf32>
    %83 = vector.shape_cast %82 : vector<8x16xf32> to vector<8x16x1xf32>
    %84 = vector.broadcast %83 : vector<8x16x1xf32> to vector<8x16x16xf32>
    %85 = arith.subf %81, %84 : vector<8x16x16xf32>
    %86 = math.exp %85 : vector<8x16x16xf32>
    %cst_28 = arith.constant dense<0.000000e+00> : vector<8x16xf32>
    %87 = vector.multi_reduction <add>, %86, %cst_28 [2] : vector<8x16x16xf32> to vector<8x16xf32>
    %88 = vector.shape_cast %87 : vector<8x16xf32> to vector<8x16x1xf32>
    %89 = tpu.reciprocal %88 {approx = true} : vector<8x16x1xf32> -> vector<8x16x1xf32>
    %90 = vector.broadcast %89 : vector<8x16x1xf32> to vector<8x16x16xf32>
    %91 = arith.mulf %86, %90 : vector<8x16x16xf32>
    %92 = arith.truncf %91 : vector<8x16x16xf32> to vector<8x16x16xbf16>
    %cst_29 = arith.constant dense<0.000000e+00> : vector<8x16x16xf32>
    %93 = tpu.matmul %92, %80, %cst_29 {dimension_numbers = #tpu.dot_dimension_numbers<[2], [1], [1], [2], [0, 0, 0, 1, 1, 2], [0], [0]>} : vector<8x16x16xbf16>, vector<8x16x16xbf16>, vector<8x16x16xf32> -> vector<8x16x16xf32>
    %94 = tpu.concatenate %36, %55, %74, %93 in 2 : vector<8x16x16xf32>, vector<8x16x16xf32>, vector<8x16x16xf32>, vector<8x16x16xf32> -> vector<8x16x64xf32>
    %95 = vector.shape_cast %94 : vector<8x16x64xf32> to vector<128x64xf32>
    %96 = arith.truncf %95 : vector<128x64xf32> to vector<128x64xbf16>
    %c0_30 = arith.constant 0 : index
    %c0_31 = arith.constant 0 : index
    %97 = vector.load %arg7[%c0_30, %c0_31] : memref<64x128xbf16, #tpu.memory_space<vmem>>, vector<64x128xbf16>
    %cst_32 = arith.constant dense<0.000000e+00> : vector<128x128xf32>
    %98 = tpu.matmul %96, %97, %cst_32 {dimension_numbers = #tpu.dot_dimension_numbers<[1], [0], [0], [1], [0, 0, 1, 1], [], []>} : vector<128x64xbf16>, vector<64x128xbf16>, vector<128x128xf32> -> vector<128x128xf32>
    %c0_33 = arith.constant 0 : index
    %c0_34 = arith.constant 0 : index
    %99 = vector.load %arg8[%c0_33, %c0_34] : memref<1x128xf32, #tpu.memory_space<vmem>>, vector<1x128xf32>
    %100 = vector.broadcast %99 : vector<1x128xf32> to vector<128x128xf32>
    %101 = arith.addf %98, %100 : vector<128x128xf32>
    %102 = vector.shape_cast %101 : vector<128x128xf32> to vector<8x16x128xf32>
    %cst_35 = arith.constant dense<0xFF800000> : vector<8x128xf32>
    %103 = vector.multi_reduction <maximumf>, %102, %cst_35 [1] : vector<8x16x128xf32> to vector<8x128xf32>
    %c0_36 = arith.constant 0 : index
    %c0_37 = arith.constant 0 : index
    %104 = vector.load %arg9[%c0_36, %c0_37] : memref<8x128xf32, #tpu.memory_space<vmem>>, vector<8x128xf32>
    tpu.vector_store %arg9[%c0_36, %c0_37], %103 {strides = array<i32>} : memref<8x128xf32, #tpu.memory_space<vmem>>, vector<8x128xf32>,
    return
  }
  func.func @transform_0(%arg0: i32) -> (i32, i32, i32) {
    %c0_i32 = arith.constant 0 : i32
    %c0_i32_0 = arith.constant 0 : i32
    %c0_i32_1 = arith.constant 0 : i32
    return %arg0, %c0_i32, %c0_i32_0 : i32, i32, i32
  }
  func.func @transform_1(%arg0: i32) -> (i32, i32) {
    %c0_i32 = arith.constant 0 : i32
    %c0_i32_0 = arith.constant 0 : i32
    %c0_i32_1 = arith.constant 0 : i32
    return %c0_i32, %c0_i32_0 : i32, i32
  }
  func.func @transform_2(%arg0: i32) -> (i32, i32) {
    %c0_i32 = arith.constant 0 : i32
    %c0_i32_0 = arith.constant 0 : i32
    %c0_i32_1 = arith.constant 0 : i32
    return %c0_i32, %c0_i32_0 : i32, i32
  }
  func.func @transform_3(%arg0: i32) -> (i32, i32) {
    %c0_i32 = arith.constant 0 : i32
    %c0_i32_0 = arith.constant 0 : i32
    %c0_i32_1 = arith.constant 0 : i32
    return %c0_i32, %c0_i32_0 : i32, i32
  }
  func.func @transform_4(%arg0: i32) -> (i32, i32) {
    %c0_i32 = arith.constant 0 : i32
    %c0_i32_0 = arith.constant 0 : i32
    %c0_i32_1 = arith.constant 0 : i32
    return %c0_i32, %c0_i32_0 : i32, i32
  }
  func.func @transform_5(%arg0: i32) -> (i32, i32) {
    %c0_i32 = arith.constant 0 : i32
    %c0_i32_0 = arith.constant 0 : i32
    %c0_i32_1 = arith.constant 0 : i32
    return %c0_i32, %c0_i32_0 : i32, i32
  }
  func.func @transform_6(%arg0: i32) -> (i32, i32) {
    %c0_i32 = arith.constant 0 : i32
    %c0_i32_0 = arith.constant 0 : i32
    %c0_i32_1 = arith.constant 0 : i32
    return %c0_i32, %c0_i32_0 : i32, i32
  }
  func.func @transform_7(%arg0: i32) -> (i32, i32) {
    %c0_i32 = arith.constant 0 : i32
    %c0_i32_0 = arith.constant 0 : i32
    %c0_i32_1 = arith.constant 0 : i32
    return %c0_i32, %c0_i32_0 : i32, i32
  }
  func.func @transform_8(%arg0: i32) -> (i32, i32) {
    %c0_i32 = arith.constant 0 : i32
    %c0_i32_0 = arith.constant 0 : i32
    return %arg0, %c0_i32 : i32, i32
  }
}

</mosaic_0001>

<bundles_post_ra>
// kernel: tpu_custom_call.1
= control target key start
LH: loop header
LB: loop body
LE: loop exit
PB: predicated region body
PF: predicated region fallthrough
CT: control target
= control target key end

     0   :  { %s8637_s0 = inlined_call_operand.hbm [shape: f32[16,16,64], index: 0, kind: input, shape index: {}]   ;;  %s8638_s1 = inlined_call_operand.hbm [shape: bf16[64,64], index: 1, kind: input, shape index: {}]   ;;  %s8639_s2 = inlined_call_operand.hbm [shape: bf16[64,64], index: 2, kind: input, shape index: {}]   ;;  %s8640_s3 = inlined_call_operand.hbm [shape: bf16[64,64], index: 3, kind: input, shape index: {}]   ;;  %s8641_s4 = inlined_call_operand.vmem [shape: f32[1,64], index: 4, kind: input, shape index: {}]   ;;  %s8642_s5 = inlined_call_operand.vmem [shape: f32[1,64], index: 5, kind: input, shape index: {}]   ;;  %s8643_s6 = inlined_call_operand.hbm [shape: bf16[64,128], index: 6, kind: input, shape index: {}]   ;;  %s8644_s7 = inlined_call_operand.vmem [shape: f32[1,128], index: 7, kind: input, shape index: {}]   ;;  %s8645_s8 = inlined_call_operand.hbm [shape: f32[16,128], index: 8, kind: output, shape index: {}]  }
   0x1   :  { %8659 = sst [smem:[#allocation39_spill]] %s8638_s1 }
   0x2   :  { %8660 = sst [smem:[#allocation40_spill]] %s8639_s2 }
   0x3   :  { %13 = vsyncpa [#allocation3], 0 }
   0x4   :  { %15 = vsyncpa [#allocation3 + $0x1], 0 }
   0x5   :  { %16 = vsyncpa [#allocation6], 0 }
   0x6   :  { %17 = vsyncpa [#allocation9], 0 }
   0x7   :  { %18 = vsyncpa [#allocation4], 0 }
   0x8   :  { %20 = vsyncpa [#allocation4 + $0x1], 0  ;;  %s6875_s27 = smov 0   ;;  %s6877_s28 = smov 0  }
   0x9   :  { %s6879_s29 = smov 0   ;;  %s6881_s30 = smov 0  }
   0xa LB: > { %s6896_s9 = sadd.s32 4294967295, %s6810_s30   ;;  %s5312_s10 = sadd.s32 4294967294, %s6810_s30   ;;  %s6810_s30 = sphi %s6881_s30, %s8739_s30   ;;  %s6806_s29 = sphi %s6879_s29, %s8738_s29   ;;  %s6802_s28 = sphi %s6877_s28, %s8737_s28   ;;  %s6798_s27 = sphi %s6875_s27, %s8736_s27  }
   0xb   : > { %p46_p0 = scmp.ne.s32.totalorder %s6802_s28, %s6798_s27  ;;  %p8646_p1 = scmp.eq.s32.totalorder %s6896_s9, 0 }
   0xc   : > { %p217_p2 = scmp.eq.s32.totalorder %s6896_s9, 1  ;;  %p223_p3 = scmp.eq.s32.totalorder %s5312_s10, 1 }
   0xd   : > { %p6905_p4 = por %p8646_p1, %p46_p0  ;;  %p5313_p5 = scmp.ge.s32.totalorder %s6810_s30, 1 }
   0xe   : > { %p6910_p6 = por %p223_p3, %p46_p0  ;;  %p230_p7 = scmp.lt.s32.totalorder %s6810_s30, 3 }
   0xf   : > { %s8661_s11 = scalar_select %p6905_p4, 1, 0 }
  0x10   : > { %s8662_s12 = scalar_select %p6910_p6, 1, 0 }
  0x11   : > { %p6915_p8 = pnand %p5313_p5, %p230_p7  ;;  %s6812_s14 = smov [#allocation5]  }
  0x12   : > { %s242_s15 = sshll.u32 %s6812_s14, 4  ;;  %s6813_s17 = smov [#allocation8]   ;;  %s243_s15 = int_to_ptr.vmem [resolvable:$true] %s242_s15 }
  0x13   : > { %s8663_s13 = scalar_select %p6915_p8, 1, 0 }
  0x14   : > { %p6135_p9 = pneg %p6915_p8  ;;  %s268_s18 = sshll.u32 %s6813_s17, 4  ;;  %s269_s18 = int_to_ptr.vmem [resolvable:$true] %s268_s18 }
  0x15   : > { %s6814_s19 = smov [#allocation7]   ;;  %s6617_s21 = scalar_lea.vmem %s243_s15, 512 }
  0x16   : > { %p6924_p11 = pnand %p6135_p9, %p8646_p1  ;;  %s255_s20 = sshll.u32 %s6814_s19, 4  ;;  %s256_s20 = int_to_ptr.vmem [resolvable:$true] %s255_s20 }
  0x17   : > { %p6618_p13 = scmp.ne.s32.totalorder %s243_s15, %s6617_s21  ;;  %p6625_p5 = scmp.lt.s32.totalorder %s243_s15, %s243_s15 }
  0x18   : > { %p6608_p12 = pneg %p6924_p11  ;;  %p6626_p7 = scmp.lt.s32.totalorder %s6617_s21, %s6617_s21 }
  0x1a   : > { %p6620_p0 = pnand %p6618_p13, %p6608_p12  ;;  %p6627_p9 = por %p6626_p7, %p6625_p5 }
  0x1c   : > { %p6621_p3 = pneg %p6620_p0 }
  0x1e   : > { %p6628_p10 = pnand %p6627_p9, %p6621_p3 }
  0x20   : > { %6631 = shalt.err (!%p6628_p10)
}
  0x21   : > { %s6815_s22 = smov 64   ;;  %s6816_s23 = smov 4  }
  0x22   : > { %s8665_s1 = sld [smem:[#allocation39_spill]]  ;;  %s6643_s26 = scalar_lea.vmem %s269_s18, 512 }
  0x23   : > { %p6644_p13 = scmp.ne.s32.totalorder %s269_s18, %s6643_s26  ;;  %p6651_p3 = scmp.lt.s32.totalorder %s269_s18, %s269_s18 }
  0x24   : > { %p6652_p10 = scmp.lt.s32.totalorder %s6643_s26, %s6643_s26 }
  0x25   : > { %p6646_p0 = pnand %p6644_p13, %p6608_p12 }
  0x26   : > { %p6653_p7 = por %p6652_p10, %p6651_p3 }
  0x27   : > { %p6647_p5 = pneg %p6646_p0 }
  0x28   : > { %6138 = dma.hbm_to_vmem [thread:$0]  (!%p6924_p11), %s8665_s1, 512, %s243_s15, [#allocation6], %s6815_s22, %s6815_s22, %s6816_s23  }
  0x29   : > { %p6654_p9 = pnand %p6653_p7, %p6647_p5 }
  0x2b   : > { %6657 = shalt.err (!%p6654_p9)
}
  0x2c   : > { %6144 = dma.hbm_to_vmem [thread:$0]  (!%p6924_p11), %s8640_s3, 512, %s269_s18, [#allocation9], %s6815_s22, %s6815_s22, %s6816_s23  }
  0x2d   : > { %s6669_s15 = scalar_lea.vmem %s256_s20, 512  ;;  %p6677_p3 = scmp.lt.s32.totalorder %s256_s20, %s256_s20 }
  0x2e   : > { %p6670_p1 = scmp.ne.s32.totalorder %s256_s20, %s6669_s15  ;;  %p6678_p5 = scmp.lt.s32.totalorder %s6669_s15, %s6669_s15 }
  0x30   : > { %p6672_p13 = pnand %p6670_p1, %p6608_p12  ;;  %p6679_p10 = por %p6678_p5, %p6677_p3 }
  0x32   : > { %p6673_p0 = pneg %p6672_p13 }
  0x34   : > { %p6680_p7 = pnand %p6679_p10, %p6673_p0 }
  0x36   : > { %6683 = shalt.err (!%p6680_p7)
}
  0x37   : > { %s8666_s2 = sld [smem:[#allocation40_spill]]  ;;  %s6817_s18 = smov [#allocation10]  }
  0x38   : > { %s287_s21 = sshll.u32 %s6817_s18, 4  ;;  %s288_s21 = int_to_ptr.vmem [resolvable:$true] %s287_s21 }
  0x39   : > { %s6695_s24 = scalar_lea.vmem %s288_s21, 512  ;;  %p6703_p0 = scmp.lt.s32.totalorder %s288_s21, %s288_s21 }
  0x3a   : > { %p6696_p1 = scmp.ne.s32.totalorder %s288_s21, %s6695_s24  ;;  %p6704_p3 = scmp.lt.s32.totalorder %s6695_s24, %s6695_s24 }
  0x3c   : > { %p6698_p9 = pnand %p6696_p1, %p6608_p12  ;;  %p6705_p5 = por %p6704_p3, %p6703_p0 }
  0x3d   : > { %6141 = dma.hbm_to_vmem [thread:$0]  (!%p6924_p11), %s8666_s2, 512, %s256_s20, [#allocation6], %s6815_s22, %s6815_s22, %s6816_s23  }
  0x3e   : > { %p6699_p13 = pneg %p6698_p9 }
  0x40   : > { %p6706_p10 = pnand %p6705_p5, %p6699_p13 }
  0x42   : > { %6709 = shalt.err (!%p6706_p10)
}
  0x43   : > { %6147 = dma.hbm_to_vmem [thread:$0]  (!%p6924_p11), %s8643_s6, 512, %s288_s21, [#allocation9], %s6815_s22, %s6815_s22, %s6816_s23  }
  0x44   : > { %s6975_s26 = sadd.s32 1, %s6810_s30   ;;  %s33_s16 = sadd.s32 1, %s6806_s29 }
  0x45   : > { %s30_s10 = ssub.s32 %s6810_s30, %s6975_s26  ;;  %p40_p12 = scmp.ne.s32.totalorder %s6806_s29, %s6802_s28 }
  0x46   : > { %p31_p7 = scmp.eq.s32.totalorder %s30_s10, 0  ;;  %p41_p1 = scmp.eq.s32.totalorder %s6810_s30, 0 }
  0x47   : > { %p6985_p9 = por %p217_p2, %p40_p12  ;;  %p6160_p13 = scmp.lt.s32.totalorder %s6810_s30, 2 }
  0x48   : > { %s6991_s15 = scalar_select %p31_p7, %s6806_s29, %s33_s16  }
  0x49   : > { %s8667_s14 = scalar_select %p6985_p9, 1, 0 }
  0x4a   : > { %p42_p0 = por %p41_p1, %p40_p12  ;;  %s304_s17 = sand.u32 1, %s6806_s29  }
  0x4b   : > { %s5319_s19 = sshll.u32 %s304_s17, 7  ;;  %s5450_s22 = sshll.u32 %s6810_s30, 11 }
  0x4c   : > { %s6998_s21 = scalar_lea.hbm %s8637_s0, %s5450_s22  ;;  %s308_s24 = scalar_lea.vmem [#allocation2], %s5319_s19 }
  0x4d   : > { %s316_s20 = sshll.u32 %s308_s24, 4  ;;  %p7002_p2 = pnand %p6160_p13, %p42_p0  ;;  %s7000_s20 = int_to_ptr.vmem [resolvable:$true] %s316_s20 }
  0x4e   : > { %s7006_s16 = scalar_lea.sflag [#allocation3], %s304_s17  ;;  %s6710_s10 = scalar_lea.hbm %s6998_s21, 2048 }
  0x4f   : > { %p6711_p11 = scmp.ne.s32.totalorder %s6998_s21, %s6710_s10  ;;  %p6712_p3 = pneg %p7002_p2 }
  0x50   : > { %s6715_s19 = scalar_lea.hbm %s8637_s0, 4096  ;;  %p6716_p12 = scmp.lt.s32.totalorder %s6998_s21, %s8637_s0 }
  0x51   : > { %p6713_p5 = pnand %p6712_p3, %p6711_p11  ;;  %p6717_p7 = scmp.lt.s32.totalorder %s6715_s19, %s6710_s10 }
  0x53   : > { %p6714_p10 = pneg %p6713_p5  ;;  %p6718_p1 = por %p6717_p7, %p6716_p12 }
  0x55   : > { %p6719_p13 = pnand %p6718_p1, %p6714_p10 }
  0x57   : > { %6722 = shalt.err (!%p6719_p13)
}
  0x58   : > { %s6723_s17 = scalar_lea.vmem %s7000_s20, 2048  ;;  %s6818_s1 = smov [#allocation2]  }
  0x59   : > { %p6724_p0 = scmp.ne.s32.totalorder %s7000_s20, %s6723_s17  ;;  %s6728_s2 = sshll.u32 %s6818_s1, 4  ;;  %s6729_s2 = int_to_ptr.vmem [resolvable:$false] %s6728_s2 }
  0x5a   : > { %s6730_s22 = scalar_lea.vmem %s6729_s2, 4096  ;;  %p6731_p5 = scmp.lt.s32.totalorder %s7000_s20, %s6729_s2 }
  0x5b   : > { %p6726_p6 = pnand %p6724_p0, %p6712_p3  ;;  %p6732_p9 = scmp.lt.s32.totalorder %s6730_s22, %s6723_s17 }
  0x5d   : > { %p6727_p11 = pneg %p6726_p6  ;;  %p6733_p4 = por %p6732_p9, %p6731_p5 }
  0x5f   : > { %p6734_p8 = pnand %p6733_p4, %p6727_p11 }
  0x61   : > { %6737 = shalt.err (!%p6734_p8)
}
  0x62   : > { %s6819_s10 = smov 128   ;;  %s6820_s23 = smov 8  }
  0x63   : > { %6151 = dma.hbm_to_vmem [thread:$0]  (!%p7002_p2), %s6998_s21, 2048, %s7000_s20, %s7006_s16, %s6819_s10, %s6819_s10, %s6820_s23  }
  0x64   : > { %p8669_p3 = scmp.ne.s32.totalorder %s8663_s13, 0 }
  0x66   : > { %328 = sbr.rel (%p8669_p3) target bundleno = 3324 (0xcfc), region = 52 }
  0x6b   : > { %s7030_s1 = sand.u32 1, %s6802_s28   ;;  %p8670_p4 = scmp.ne.s32.totalorder %s8661_s11, 0 }
  0x6c   : > { %s5324_s2 = sshll.u32 %s7030_s1, 7  ;;  %s331_s19 = scalar_lea.sflag [#allocation3], %s7030_s1 }
  0x6d   : > { %s7034_s18 = scalar_lea.vmem [#allocation2], %s5324_s2 }
  0x6e   : > { %6781 = dma.done.wait (%p8670_p4), %s331_s19, 2048  }
  0x6f   : > { %6783 = vsyncadd (%p8670_p4), %s331_s19, 4294965248  ;;  %p8671_p6 = scmp.eq.s32.totalorder %s6896_s9, 0 }
  0x71   : > { %6785 = dma.done.wait (%p8671_p6), [#allocation6], 1024   ;;  %p8672_p8 = pmov %p8671_p6 }
  0x72   : > { %p8673_p9 = pmov %p8671_p6 }
  0x73   : > { %6787 = vsyncadd (%p8672_p8), [#allocation6], 4294966272 }
  0x74   : > { %6789 = dma.done.wait (%p8673_p9), [#allocation9], 1024   ;;  %p8674_p2 = pmov %p8671_p6 }
  0x75   : > { %v6334_v0 = vld [vmem:[#allocation5 + $0x18] sm:$0xff]   ;;  %v6335_v1 = vld [vmem:[#allocation5 + $0x10] sm:$0xff]   ;;  %v6336_v2 = vld [vmem:[#allocation5 + $0x8] sm:$0xff]   ;;  %vm448_vm0 = vcmask 523264   ;;  %v8650_v36 = vmov 0.0   ;;  %vm6822_vm1 = vmmov 0  }
  0x76   : > { %6791 = vsyncadd (%p8674_p2), [#allocation9], 4294966272  ;;  %6107 = vmatprep.subr.bf16.mxu1 %v6334_v0  ;;  %5627 = vmatprep.subr.bf16.mxu0 %v6334_v0  ;;  %v393_v3 = vld [vmem:[%s7034_s18 + $0x40] sm:$0xff]  ;;  %v394_v4 = vld [vmem:[%s7034_s18 + $0x48] sm:$0xff]  ;;  %vm859_vm2 = vcmask 130048   ;;  %s6823_s25 = smov 112  }
  0x77   : > { %6111 = vmatpush3.bf16.msra.mxu1 %v6334_v0  ;;  %5628 = vmatpush3.bf16.msra.mxu0 %v6334_v0  ;;  %v7050_v5 = vpack.c.bf16 %v394_v4, %v393_v3  ;;  %v6337_v6 = vld [vmem:[#allocation5] sm:$0xff]   ;;  %v395_v8 = vld [vmem:[%s7034_s18 + $0x50] sm:$0xff]  ;;  %v396_v9 = vld [vmem:[%s7034_s18 + $0x58] sm:$0xff]  ;;  %s6824_s16 = smov 96   ;;  %s6825_s24 = smov 80   ;;  %vm4908_vm3 = vcmask 261120  }
  0x78   : > { %6108 = vmatprep.subr.bf16.mxu1 %v6335_v1  ;;  %5629 = vmatprep.subr.bf16.mxu0 %v6335_v1  ;;  %v385_v7 = vld [vmem:[%s7034_s18] sm:$0xff]  ;;  %v386_v10 = vld [vmem:[%s7034_s18 + $0x8] sm:$0xff]  ;;  %v6338_v11 = vld [vmem:[#allocation7 + $0x18] sm:$0xff]   ;;  %v406_v17 = vpack.c.bf16 %v396_v9, %v395_v8  ;;  %s6826_s17 = smov 16   ;;  %s6827_s22 = smov 32   ;;  %vm4925_vm4 = vcmask 392192  }
  0x79   : > { %5643 = vmatprep.mubr.msk.bf16.mxu1 %vm448_vm0, %v7050_v5  ;;  %v397_v12 = vld [vmem:[%s7034_s18 + $0x60] sm:$0xff]  ;;  %v398_v13 = vld [vmem:[%s7034_s18 + $0x68] sm:$0xff]  ;;  %v401_v14 = vpack.c.bf16 %v386_v10, %v385_v7  ;;  %v387_v15 = vld [vmem:[%s7034_s18 + $0x10] sm:$0xff]  ;;  %s6828_s10 = smov 48   ;;  %vm5174_vm5 = vcmask 1041409   ;;  %vm5176_vm6 = vcmask 1042434  }
  0x7a   : > { %v388_v16 = vld [vmem:[%s7034_s18 + $0x18] sm:$0xff]  ;;  %v6339_v18 = vld [vmem:[#allocation7 + $0x10] sm:$0xff]   ;;  %v389_v19 = vld [vmem:[%s7034_s18 + $0x20] sm:$0xff]  ;;  %v407_v21 = vpack.c.bf16 %v398_v13, %v397_v12  ;;  %vm5178_vm7 = vcmask 1043459   ;;  %s5329_s19 = sshll.u32 %s7030_s1, 3  ;;  %vm5180_vm8 = vcmask 1044484  }
  0x7b   : > { %6112 = vmatpush3.bf16.msra.mxu1 %v6335_v1  ;;  %5630 = vmatpush3.bf16.msra.mxu0 %v6335_v1  ;;  %v390_v20 = vld [vmem:[%s7034_s18 + $0x28] sm:$0xff]  ;;  %v402_v22 = vpack.c.bf16 %v388_v16, %v387_v15  ;;  %v399_v23 = vld [vmem:[%s7034_s18 + $0x70] sm:$0xff]  ;;  %v400_v24 = vld [vmem:[%s7034_s18 + $0x78] sm:$0xff]  ;;  %vm5182_vm9 = vcmask 1045509   ;;  %vm5184_vm10 = vcmask 1046534   ;;  %s382_s11 = scalar_lea.vmem [#allocation11], %s5329_s19 }
  0x7c   : > { %6109 = vmatprep.subr.bf16.mxu1 %v6336_v2  ;;  %5631 = vmatprep.subr.bf16.mxu0 %v6336_v2  ;;  %v403_v25 = vpack.c.bf16 %v390_v20, %v389_v19  ;;  %v6340_v26 = vld [vmem:[#allocation7 + $0x8] sm:$0xff]   ;;  %v408_v27 = vpack.c.bf16 %v400_v24, %v399_v23  ;;  %v391_v28 = vld [vmem:[%s7034_s18 + $0x30] sm:$0xff]  ;;  %v392_v29 = vld [vmem:[%s7034_s18 + $0x38] sm:$0xff]  ;;  %s5446_s18 = sshll.u32 %s6896_s9, 7  ;;  %s5204_s13 = sshll.u32 %s382_s11, 4  ;;  %vm5186_vm11 = vcmask 1047559   ;;  %s5205_s13 = int_to_ptr.vmem [resolvable:$true] %s5204_s13 }
  0x7d   : > { %5635 = vmatprep.mubr.msk.bf16.mxu0 %vm448_vm0, %v401_v14  ;;  %v6341_v30 = vld [vmem:[#allocation7] sm:$0xff]   ;;  %v404_v31 = vpack.c.bf16 %v392_v29, %v391_v28  ;;  %v6342_v32 = vld [vmem:[#allocation8 + $0x18] sm:$0xff]   ;;  %v6343_v33 = vld [vmem:[#allocation8 + $0x10] sm:$0xff]   ;;  %p8733_p12 = scmp.ne.s32.totalorder %s8667_s14, 0  ;;  %s6829_s9 = smov [#allocation11]  }
  0x7e   : > { %v6344_v34 = vld [vmem:[#allocation8 + $0x8] sm:$0xff]   ;;  %v6345_v35 = vld [vmem:[#allocation8] sm:$0xff]  }
  0x7f   : > { %6113 = vmatpush3.bf16.msra.mxu1 %v6336_v2  ;;  %5632 = vmatpush3.bf16.msra.mxu0 %v6336_v2  ;;  %v7118_v56 = vld [vmem:[%s8641_s4] ss:$0 sm:$0xff] }
  0x80   : > { %6110 = vmatprep.subr.bf16.mxu1 %v6337_v6  ;;  %5633 = vmatprep.subr.bf16.mxu0 %v6337_v6 }
  0x83   : > { %6114 = vmatpush3.bf16.msra.mxu1 %v6337_v6  ;;  %5634 = vmatpush3.bf16.msra.mxu0 %v6337_v6 }
  0x84   : > { %5651 = vmatprep.subr.bf16.mxu1 %v6338_v11  ;;  %5675 = vmatprep.subr.bf16.mxu0 %v6342_v32 }
  0x86   : > { %5644 = vmatmul.mubr.msk.bf16.vlgmr.msra.gmra.mxu1 %vm448_vm0, %v406_v17  ;;  %5636 = vmatmul.mubr.msk.bf16.vlgmr.msra.gmra.mxu0 %vm448_vm0, %v402_v22 }
  0x87   : > { %5652 = vmatpush3.bf16.msra.mxu1 %v6338_v11  ;;  %5647 = vmatprep.mubr.msk.bf16.mxu1 %vm448_vm0, %v407_v21 }
  0x88   : > { %5653 = vmatprep.subr.bf16.mxu1 %v6339_v18  ;;  %5639 = vmatprep.mubr.msk.bf16.mxu0 %vm448_vm0, %v403_v25 }
  0x89   : > { %5676 = vmatpush3.bf16.msra.mxu0 %v6342_v32 }
  0x8a   : > { %5677 = vmatprep.subr.bf16.mxu0 %v6343_v33 }
  0x8b   : > { %5654 = vmatpush3.bf16.msra.mxu1 %v6339_v18 }
  0x8c   : > { %5655 = vmatprep.subr.bf16.mxu1 %v6340_v26 }
  0x8d   : > { %5678 = vmatpush3.bf16.msra.mxu0 %v6343_v33 }
  0x8e   : > { %5648 = vmatmul.mubr.msk.bf16.gmra.mxu1 %vm448_vm0, %v408_v27  ;;  %5640 = vmatmul.mubr.msk.bf16.gmra.mxu0 %vm448_vm0, %v404_v31 }
  0x8f   : > { %5656 = vmatpush3.bf16.msra.mxu1 %v6340_v26  ;;  %5659 = vmatprep.mubr.msk.bf16.mxu1 %vm448_vm0, %v401_v14 }
  0x90   : > { %5657 = vmatprep.subr.bf16.mxu1 %v6341_v30  ;;  %5683 = vmatprep.mubr.msk.bf16.mxu0 %vm448_vm0, %v401_v14 }
  0x91   : > { %5679 = vmatprep.subr.bf16.mxu0 %v6344_v34 }
  0x92   : > { %5680 = vmatpush3.bf16.msra.mxu0 %v6344_v34 }
  0x93   : > { %5658 = vmatpush3.bf16.msra.mxu1 %v6341_v30  ;;  %5681 = vmatprep.subr.bf16.mxu0 %v6345_v35 }
  0x94   : > { %5699 = vmatprep.subr.bf16.mxu1 %v8650_v36 }
  0x96   : > { %5660 = vmatmul.mubr.msk.bf16.vlgmr.msra.gmra.mxu1 %vm448_vm0, %v402_v22  ;;  %5682 = vmatpush3.bf16.msra.mxu0 %v6345_v35 }
  0x97   : > { %5663 = vmatprep.mubr.msk.bf16.mxu1 %vm448_vm0, %v403_v25  ;;  %5723 = vmatprep.subr.bf16.mxu0 %v8650_v36 }
  0x99   : > { %5684 = vmatmul.mubr.msk.bf16.vlgmr.msra.gmra.mxu0 %vm448_vm0, %v402_v22 }
  0x9a   : > { %5687 = vmatprep.mubr.msk.bf16.mxu0 %vm448_vm0, %v403_v25 }
  0x9e   : > { %5664 = vmatmul.mubr.msk.bf16.gmra.mxu1 %vm448_vm0, %v404_v31 }
  0x9f   : > { %5667 = vmatprep.mubr.msk.bf16.mxu1 %vm448_vm0, %v7050_v5 }
  0xa1   : > { %5688 = vmatmul.mubr.msk.bf16.gmra.mxu0 %vm448_vm0, %v404_v31 }
  0xa2   : > { %5691 = vmatprep.mubr.msk.bf16.mxu0 %vm448_vm0, %v7050_v5 }
  0xa6   : > { %5668 = vmatmul.mubr.msk.bf16.gmra.mxu1 %vm448_vm0, %v406_v17 }
  0xa7   : > { %5671 = vmatprep.mubr.msk.bf16.mxu1 %vm448_vm0, %v407_v21 }
  0xa9   : > { %5692 = vmatmul.mubr.msk.bf16.gmra.mxu0 %vm448_vm0, %v406_v17 }
  0xaa   : > { %5695 = vmatprep.mubr.msk.bf16.mxu0 %vm448_vm0, %v407_v21 }
  0xae   : > { %5672 = vmatmul.mubr.msk.bf16.gmra.mxu1 %vm448_vm0, %v408_v27 }
  0xaf   : > { %5701 = vmatprep.mubr.msk.bf16.mxu1 %vm6822_vm1, %v8650_v36 }
  0xb1   : > { %5696 = vmatmul.mubr.msk.bf16.gmra.mxu0 %vm448_vm0, %v408_v27 }
  0xb2   : > { %5725 = vmatprep.mubr.msk.bf16.mxu0 %vm6822_vm1, %v8650_v36 }
 0x146   : > { %v7099_v37 = vpop.f32.mrf.mxu1  ;;  %v5637_v44 = vpop.f32.mrf.mxu0 }
 0x147   : > { %v516_v5 = vadd.f32 %v5637_v44, %v7118_v56  ;;  %v548_v44 = vadd.f32 %v7099_v37, %v7118_v56 }
 0x148   : > { %v539_v38 = vpop.f32.mrf.mxu1  ;;  %v507_v47 = vpop.f32.mrf.mxu0 }
 0x149   : > { %v508_v58 = vadd.f32 %v7118_v56, %v507_v47  ;;  %v540_v22 = vadd.f32 %v7118_v56, %v539_v38 }
 0x14a   : > { %v7101_v39 = vpop.f32.mrf.mxu1  ;;  %v5638_v50 = vpop.f32.mrf.mxu0 }
 0x14b   : > { %v519_v6 = vadd.f32 %v5638_v50, %v7118_v56  ;;  %v5355_v50 = vld [vmem:[%s8642_s5] ss:$0 sm:$0xff] }
 0x14c   : > { %v542_v40 = vpop.f32.mrf.mxu1  ;;  %v510_v54 = vpop.f32.mrf.mxu0 }
 0x14d   : > { %v511_v59 = vadd.f32 %v7118_v56, %v510_v54  ;;  %v7138_v11 = vpack.c.bf16 %v519_v6, %v516_v5  ;;  %v543_v18 = vadd.f32 %v7118_v56, %v542_v40 }
 0x14e   : > { %v7103_v41 = vpop.f32.mrf.mxu1  ;;  %v5641_v61 = vpop.f32.mrf.mxu0 }
 0x14f   : > { %v7125_v0 = vpack.c.bf16 %v511_v59, %v508_v58  ;;  %v7158_v25 = vpack.c.bf16 %v543_v18, %v540_v22  ;;  %v532_v31 = vadd.f32 %v5641_v61, %v7118_v56  ;;  %v564_v37 = vadd.f32 %v7103_v41, %v7118_v56 }
 0x150   : > { %v7105_v42 = vpop.f32.mrf.mxu1  ;;  %v523_v2 = vpop.f32.mrf.mxu0 }
 0x151   : > { %v524_v19 = vadd.f32 %v7118_v56, %v523_v2  ;;  %v556_v33 = vadd.f32 %v7118_v56, %v7105_v42  ;;  %v551_v42 = vadd.f32 %v7101_v39, %v7118_v56 }
 0x152   : > { %v7107_v43 = vpop.f32.mrf.mxu1  ;;  %v5642_v8 = vpop.f32.mrf.mxu0 }
 0x153   : > { %v535_v32 = vadd.f32 %v5642_v8, %v7118_v56  ;;  %v567_v39 = vadd.f32 %v7107_v43, %v7118_v56 }
 0x154   : > { %v7109_v45 = vpop.f32.mrf.mxu1  ;;  %v526_v14 = vpop.f32.mrf.mxu0 }
 0x155   : > { %v527_v20 = vadd.f32 %v7118_v56, %v526_v14  ;;  %v559_v30 = vadd.f32 %v7118_v56, %v7109_v45  ;;  %v7188_v38 = vpack.c.bf16 %v535_v32, %v532_v31 }
 0x156   : > { %v5661_v46 = vpop.f32.mrf.mxu1 }
 0x157   : > { %v7160_v26 = vpack.c.bf16 %v527_v20, %v524_v19  ;;  %v7186_v35 = vpack.c.bf16 %v559_v30, %v556_v33 }
 0x158   : > { %v636_v48 = vpop.f32.mrf.mxu1 }
 0x15a   : > { %v5662_v49 = vpop.f32.mrf.mxu1 }
 0x15b   : > { %v7123_v62 = vpack.c.bf16 %v5662_v49, %v5661_v46  ;;  %v7207_v46 = vpack.c.bf16 %v551_v42, %v548_v44  ;;  %v5685_v49 = vpop.f32.mrf.mxu0 }
 0x15c   : > { %v639_v51 = vpop.f32.mrf.mxu1  ;;  %v781_v43 = vadd.f32 %v5685_v49, %v5355_v50 }
 0x15d   : > { %v7111_v52 = vpack.c.bf16 %v639_v51, %v636_v48  ;;  %v911_v3 = vsel %vm859_vm2, %v7123_v62, 0  ;;  %v7220_v48 = vpack.c.bf16 %v567_v39, %v564_v37  ;;  %v772_v51 = vpop.f32.mrf.mxu0 }
 0x15e   : > { %v5665_v53 = vpop.f32.mrf.mxu1  ;;  %v773_v54 = vadd.f32 %v5355_v50, %v772_v51 }
 0x15f   : > { %v864_v55 = vsel %vm859_vm2, %v7111_v52, 0 }
 0x160   : > { %v652_v57 = vpop.f32.mrf.mxu1  ;;  %5700 = vmatpush3.bf16.xpose.msra.mxu1 %v864_v55 }
 0x161   : > { %5705 = vmatprep.subr.bf16.mxu1 %v8650_v36 }
 0x162   : > { %v5666_v60 = vpop.f32.mrf.mxu1 }
 0x163   : > { %v7156_v23 = vpack.c.bf16 %v5666_v60, %v5665_v53  ;;  %v5686_v53 = vpop.f32.mrf.mxu0 }
 0x164   : > { %v655_v63 = vpop.f32.mrf.mxu1  ;;  %v784_v55 = vadd.f32 %v5686_v53, %v5355_v50 }
 0x165   : > { %v7136_v9 = vpack.c.bf16 %v655_v63, %v652_v57  ;;  %v1005_v28 = vsel %vm859_vm2, %v7156_v23, 0  ;;  %v775_v57 = vpop.f32.mrf.mxu0 }
 0x166   : > { %v5669_v1 = vpop.f32.mrf.mxu1  ;;  %v7229_v41 = vpack.c.bf16 %v784_v55, %v781_v43  ;;  %v776_v56 = vadd.f32 %v5355_v50, %v775_v57 }
 0x167   : > { %5702 = vmatmul.mubr.msk.bf16.vlgmr.msra.gmra.mxu1 %vm859_vm2, %v7125_v0  ;;  %v958_v15 = vsel %vm859_vm2, %v7136_v9, 0  ;;  %v5689_v58 = vpop.f32.mrf.mxu0 }
 0x168   : > { %v668_v4 = vpop.f32.mrf.mxu1  ;;  %5706 = vmatpush3.bf16.xpose.msra.mxu1 %v911_v3  ;;  %5707 = vmatprep.mubr.msk.bf16.mxu1 %vm6822_vm1, %v8650_v36  ;;  %v7231_v59 = vpack.c.bf16 %v776_v56, %v773_v54  ;;  %v797_v60 = vadd.f32 %v5689_v58, %v5355_v50 }
 0x169   : > { %5711 = vmatprep.subr.bf16.mxu1 %v8650_v36  ;;  %v788_v61 = vpop.f32.mrf.mxu0 }
 0x16a   : > { %v5670_v7 = vpop.f32.mrf.mxu1  ;;  %v789_v63 = vadd.f32 %v5355_v50, %v788_v61 }
 0x16b   : > { %v7184_v34 = vpack.c.bf16 %v5670_v7, %v5669_v1  ;;  %v5690_v1 = vpop.f32.mrf.mxu0 }
 0x16c   : > { %v671_v10 = vpop.f32.mrf.mxu1  ;;  %v800_v2 = vadd.f32 %v5690_v1, %v5355_v50 }
 0x16d   : > { %v7140_v12 = vpack.c.bf16 %v671_v10, %v668_v4  ;;  %v1099_v40 = vsel %vm859_vm2, %v7184_v34, 0  ;;  %v791_v3 = vpop.f32.mrf.mxu0 }
 0x16e   : > { %v5673_v13 = vpop.f32.mrf.mxu1  ;;  %v7237_v4 = vpack.c.bf16 %v800_v2, %v797_v60  ;;  %v792_v5 = vadd.f32 %v5355_v50, %v791_v3 }
 0x16f   : > { %5708 = vmatmul.mubr.msk.bf16.vlgmr.msra.gmra.mxu1 %vm859_vm2, %v7138_v11  ;;  %v1052_v16 = vsel %vm859_vm2, %v7140_v12, 0  ;;  %v5693_v6 = vpop.f32.mrf.mxu0 }
 0x170   : > { %v684_v17 = vpop.f32.mrf.mxu1  ;;  %5712 = vmatpush3.bf16.xpose.msra.mxu1 %v958_v15  ;;  %5724 = vmatpush3.bf16.xpose.msra.mxu0 %v1052_v16  ;;  %v7239_v7 = vpack.c.bf16 %v792_v5, %v789_v63  ;;  %v813_v8 = vadd.f32 %v5693_v6, %v5355_v50 }
 0x171   : > { %5713 = vmatprep.mubr.msk.bf16.mxu1 %vm6822_vm1, %v8650_v36  ;;  %5717 = vmatprep.subr.bf16.mxu1 %v8650_v36  ;;  %v804_v10 = vpop.f32.mrf.mxu0 }
 0x172   : > { %v5674_v21 = vpop.f32.mrf.mxu1  ;;  %5735 = vmatprep.subr.bf16.mxu0 %v8650_v36 }
 0x173   : > { %v7205_v45 = vpack.c.bf16 %v5674_v21, %v5673_v13  ;;  %v805_v13 = vadd.f32 %v5355_v50, %v804_v10  ;;  %v5694_v14 = vpop.f32.mrf.mxu0 }
 0x174   : > { %v687_v24 = vpop.f32.mrf.mxu1  ;;  %v816_v15 = vadd.f32 %v5694_v14, %v5355_v50 }
 0x175   : > { %v7162_v27 = vpack.c.bf16 %v687_v24, %v684_v17  ;;  %v1193_v47 = vsel %vm859_vm2, %v7205_v45, 0  ;;  %v807_v16 = vpop.f32.mrf.mxu0 }
 0x176   : > { %v7241_v17 = vpack.c.bf16 %v816_v15, %v813_v8  ;;  %v808_v18 = vadd.f32 %v5355_v50, %v807_v16 }
 0x177   : > { %5714 = vmatmul.mubr.msk.bf16.vlgmr.msra.gmra.mxu1 %vm859_vm2, %v7160_v26  ;;  %5726 = vmatmul.mubr.msk.bf16.vlgmr.msra.gmra.mxu0 %vm859_vm2, %v7158_v25  ;;  %v1146_v29 = vsel %vm859_vm2, %v7162_v27, 0  ;;  %v5697_v19 = vpop.f32.mrf.mxu0 }
 0x178   : > { %5718 = vmatpush3.bf16.xpose.msra.mxu1 %v1005_v28  ;;  %5736 = vmatpush3.bf16.xpose.msra.mxu0 %v1146_v29  ;;  %v7243_v20 = vpack.c.bf16 %v808_v18, %v805_v13  ;;  %v829_v21 = vadd.f32 %v5697_v19, %v5355_v50 }
 0x179   : > { %5719 = vmatprep.mubr.msk.bf16.mxu1 %vm6822_vm1, %v8650_v36  ;;  %5737 = vmatprep.mubr.msk.bf16.mxu0 %vm6822_vm1, %v8650_v36  ;;  %v820_v22 = vpop.f32.mrf.mxu0 }
 0x17a   : > { %5729 = vmatprep.subr.bf16.mxu1 %v8650_v36  ;;  %5747 = vmatprep.subr.bf16.mxu0 %v8650_v36  ;;  %v821_v24 = vadd.f32 %v5355_v50, %v820_v22 }
 0x17b   : > { %v5698_v28 = vpop.f32.mrf.mxu0 }
 0x17c   : > { %v832_v29 = vadd.f32 %v5698_v28, %v5355_v50 }
 0x17d   : > { %v823_v30 = vpop.f32.mrf.mxu0 }
 0x17e   : > { %v7245_v31 = vpack.c.bf16 %v832_v29, %v829_v21  ;;  %v824_v32 = vadd.f32 %v5355_v50, %v823_v30 }
 0x17f   : > { %5720 = vmatmul.mubr.msk.bf16.vlgmr.msra.gmra.mxu1 %vm859_vm2, %v7188_v38  ;;  %5738 = vmatmul.mubr.msk.bf16.vlgmr.msra.gmra.mxu0 %vm859_vm2, %v7186_v35 }
 0x180   : > { %5730 = vmatpush3.bf16.xpose.msra.mxu1 %v1099_v40  ;;  %5731 = vmatprep.mubr.msk.bf16.mxu1 %vm6822_vm1, %v8650_v36  ;;  %v7247_v33 = vpack.c.bf16 %v824_v32, %v821_v24 }
 0x181   : > { %5741 = vmatprep.subr.bf16.mxu1 %v8650_v36  ;;  %5749 = vmatprep.mubr.msk.bf16.mxu0 %vm6822_vm1, %v8650_v36 }
 0x182   : > { %5748 = vmatpush3.bf16.msra.mxu0 %v7231_v59 }
 0x183   : > { %5759 = vmatprep.subr.bf16.mxu0 %v8650_v36 }
 0x187   : > { %5732 = vmatmul.mubr.msk.bf16.vlgmr.msra.gmra.mxu1 %vm859_vm2, %v7207_v46 }
 0x188   : > { %5742 = vmatpush3.bf16.xpose.msra.mxu1 %v1193_v47  ;;  %5743 = vmatprep.mubr.msk.bf16.mxu1 %vm6822_vm1, %v8650_v36 }
 0x189   : > { %5753 = vmatprep.subr.bf16.mxu1 %v8650_v36 }
 0x18f   : > { %5744 = vmatmul.mubr.msk.bf16.vlgmr.msra.gmra.mxu1 %vm859_vm2, %v7220_v48 }
 0x190   : > { %5755 = vmatprep.mubr.msk.bf16.mxu1 %vm6822_vm1, %v8650_v36  ;;  %5754 = vmatpush3.bf16.msra.mxu1 %v7229_v41 }
 0x191   : > { %5765 = vmatprep.subr.bf16.mxu1 %v8650_v36 }
 0x227   : > { %v7249_v40 = vpop.f32.mrf.mxu1 }
 0x228   : > { %v1236_v42 = vsel %vm859_vm2, %v7249_v40, -inf }
 0x229   : > { %1237 = vmax.xlane.f32.xlu0 %v1236_v42  ;;  %v5703_v44 = vpop.f32.mrf.mxu1 }
 0x22b   : > { %v7253_v47 = vpop.f32.mrf.mxu1 }
 0x22c   : > { %v1239_v39 = vsel %vm859_vm2, %v7253_v47, -inf }
 0x22d   : > { %1240 = vmax.xlane.f32.xlu0 %v1239_v39  ;;  %v5704_v37 = vpop.f32.mrf.mxu1 }
 0x22f   : > { %v7257_v49 = vpop.f32.mrf.mxu1 }
 0x230   : > { %v1242_v50 = vsel %vm859_vm2, %v7257_v49, -inf }
 0x231   : > { %1243 = vmax.xlane.f32.xlu1 %v1242_v50  ;;  %v5709_v51 = vpop.f32.mrf.mxu1 }
 0x233   : > { %v7261_v43 = vpop.f32.mrf.mxu1 }
 0x234   : > { %v1245_v53 = vsel %vm859_vm2, %v7261_v43, -inf }
 0x235   : > { %1246 = vmax.xlane.f32.xlu1 %v1245_v53  ;;  %v5710_v54 = vpop.f32.mrf.mxu1 }
 0x237   : > { %v7265_v55 = vpop.f32.mrf.mxu1  ;;  %v7267_v57 = vpop.f32.mrf.mxu0 }
 0x238   : > { %v1248_v56 = vsel %vm859_vm2, %v7265_v55, -inf  ;;  %v1260_v16 = vsel %vm859_vm2, %v7267_v57, -inf }
 0x239   : > { %v5727_v58 = vpop.f32.mrf.mxu0  ;;  %1249 = vmax.xlane.f32.xlu0 %v1248_v56  ;;  %v5715_v60 = vpop.f32.mrf.mxu1 }
 0x23b   : > { %v7271_v61 = vpop.f32.mrf.mxu1  ;;  %v7273_v63 = vpop.f32.mrf.mxu0 }
 0x23c   : > { %v1251_v1 = vsel %vm859_vm2, %v7271_v61, -inf  ;;  %v1263_v24 = vsel %vm859_vm2, %v7273_v63, -inf }
 0x23d   : > { %v5728_v2 = vpop.f32.mrf.mxu0  ;;  %1252 = vmax.xlane.f32.xlu1 %v1251_v1  ;;  %v5716_v3 = vpop.f32.mrf.mxu1 }
 0x23f   : > { %v7277_v5 = vpop.f32.mrf.mxu1  ;;  %v7279_v6 = vpop.f32.mrf.mxu0 }
 0x240   : > { %v1254_v8 = vsel %vm859_vm2, %v7277_v5, -inf  ;;  %v1272_v32 = vsel %vm859_vm2, %v7279_v6, -inf }
 0x241   : > { %v5739_v10 = vpop.f32.mrf.mxu0  ;;  %1255 = vmax.xlane.f32.xlu0 %v1254_v8  ;;  %v5721_v13 = vpop.f32.mrf.mxu1 }
 0x243   : > { %v7283_v14 = vpop.f32.mrf.mxu1  ;;  %v7285_v15 = vpop.f32.mrf.mxu0 }
 0x244   : > { %v1257_v18 = vsel %vm859_vm2, %v7283_v14, -inf  ;;  %v1275_v37 = vsel %vm859_vm2, %v7285_v15, -inf }
 0x245   : > { %v5740_v19 = vpop.f32.mrf.mxu0  ;;  %1261 = vmax.xlane.f32.xlu0 %v1260_v16  ;;  %1258 = vmax.xlane.f32.xlu1 %v1257_v18  ;;  %v5722_v21 = vpop.f32.mrf.mxu1 }
 0x247   : > { %v7291_v22 = vpop.f32.mrf.mxu1 }
 0x248   : > { %v1266_v28 = vsel %vm859_vm2, %v7291_v22, -inf }
 0x249   : > { %1264 = vmax.xlane.f32.xlu1 %v1263_v24  ;;  %1267 = vmax.xlane.f32.xlu0 %v1266_v28  ;;  %v5733_v29 = vpop.f32.mrf.mxu1 }
 0x24b   : > { %v7297_v30 = vpop.f32.mrf.mxu1 }
 0x24c   : > { %v1269_v42 = vsel %vm859_vm2, %v7297_v30, -inf }
 0x24d   : > { %1273 = vmax.xlane.f32.xlu0 %v1272_v32  ;;  %1270 = vmax.xlane.f32.xlu1 %v1269_v42  ;;  %v5734_v44 = vpop.f32.mrf.mxu1 }
 0x24f   : > { %v7303_v39 = vpop.f32.mrf.mxu1 }
 0x250   : > { %v1278_v50 = vsel %vm859_vm2, %v7303_v39, -inf }
 0x251   : > { %1276 = vmax.xlane.f32.xlu1 %v1275_v37  ;;  %1279 = vmax.xlane.f32.xlu0 %v1278_v50  ;;  %v5745_v51 = vpop.f32.mrf.mxu1 }
 0x253   : > { %v7309_v53 = vpop.f32.mrf.mxu1 }
 0x254   : > { %v1281_v54 = vsel %vm859_vm2, %v7309_v53, -inf }
 0x255   : > { %1282 = vmax.xlane.f32.xlu1 %v1281_v54  ;;  %v5746_v56 = vpop.f32.mrf.mxu1 }
 0x2b2   : > { %v1238_v58 = vpop.xlane.xlu0 %1237 }
 0x2b3   : > { %v1284_v60 = vsub.f32 %v7249_v40, %v1238_v58 }
 0x2b5   : > { %v1300_v1 = vmul.f32 1.442695, %v1284_v60 }
 0x2b6   : > { %v1241_v2 = vpop.xlane.xlu0 %1240 }
 0x2b7   : > { %6350 = vpow2.f32 %v1300_v1  ;;  %v1285_v3 = vsub.f32 %v7253_v47, %v1241_v2 }
 0x2b9   : > { %v1302_v8 = vmul.f32 1.442695, %v1285_v3 }
 0x2ba   : > { %v1244_v10 = vpop.xlane.xlu1 %1243 }
 0x2bb   : > { %6352 = vpow2.f32 %v1302_v8  ;;  %v1286_v13 = vsub.f32 %v7257_v49, %v1244_v10 }
 0x2bd   : > { %v1304_v16 = vmul.f32 1.442695, %v1286_v13 }
 0x2be   : > { %v1247_v18 = vpop.xlane.xlu1 %1246 }
 0x2bf   : > { %6354 = vpow2.f32 %v1304_v16  ;;  %v1287_v19 = vsub.f32 %v7261_v43, %v1247_v18 }
 0x2c1   : > { %v1306_v21 = vmul.f32 1.442695, %v1287_v19 }
 0x2c2   : > { %v1250_v24 = vpop.xlane.xlu0 %1249 }
 0x2c3   : > { %6356 = vpow2.f32 %v1306_v21  ;;  %v1288_v40 = vsub.f32 %v7265_v55, %v1250_v24 }
 0x2c4   : > { %v7318_v28 = vpop.eup %6350 }
 0x2c5   : > { %v1308_v29 = vmul.f32 1.442695, %v1288_v40  ;;  %v1332_v47 = vsel %vm859_vm2, %v7318_v28, 0.0 }
 0x2c6   : > { %v1253_v32 = vpop.xlane.xlu1 %1252  ;;  %1333 = vadd.xlane.f32.xlu0 %v1332_v47 }
 0x2c7   : > { %6358 = vpow2.f32 %v1308_v29  ;;  %v1289_v49 = vsub.f32 %v7271_v61, %v1253_v32 }
 0x2c8   : > { %v7323_v42 = vpop.eup %6352 }
 0x2c9   : > { %v1310_v44 = vmul.f32 1.442695, %v1289_v49  ;;  %v1335_v43 = vsel %vm859_vm2, %v7323_v42, 0.0 }
 0x2ca   : > { %v1256_v37 = vpop.xlane.xlu0 %1255  ;;  %1336 = vadd.xlane.f32.xlu1 %v1335_v43 }
 0x2cb   : > { %6360 = vpow2.f32 %v1310_v44  ;;  %v1290_v55 = vsub.f32 %v7277_v5, %v1256_v37 }
 0x2cc   : > { %v7328_v50 = vpop.eup %6354 }
 0x2cd   : > { %v1312_v51 = vmul.f32 1.442695, %v1290_v55  ;;  %v1338_v54 = vsel %vm859_vm2, %v7328_v50, 0.0 }
 0x2ce   : > { %v1262_v56 = vpop.xlane.xlu0 %1261  ;;  %v1259_v58 = vpop.xlane.xlu1 %1258  ;;  %1339 = vadd.xlane.f32.xlu0 %v1338_v54 }
 0x2cf   : > { %6362 = vpow2.f32 %v1312_v51  ;;  %v1292_v61 = vsub.f32 %v7267_v57, %v1262_v56  ;;  %v1291_v1 = vsub.f32 %v7283_v14, %v1259_v58 }
 0x2d0   : > { %v7333_v60 = vpop.eup %6356 }
 0x2d1   : > { %v1316_v2 = vmul.f32 1.442695, %v1292_v61  ;;  %v1341_v5 = vsel %vm859_vm2, %v7333_v60, 0.0  ;;  %v1314_v18 = vmul.f32 1.442695, %v1291_v1 }
 0x2d2   : > { %v1265_v3 = vpop.xlane.xlu1 %1264  ;;  %v1268_v8 = vpop.xlane.xlu0 %1267  ;;  %1342 = vadd.xlane.f32.xlu1 %v1341_v5 }
 0x2d3   : > { %6364 = vpow2.f32 %v1316_v2  ;;  %v1293_v10 = vsub.f32 %v7273_v63, %v1265_v3  ;;  %v1294_v13 = vsub.f32 %v7291_v22, %v1268_v8 }
 0x2d4   : > { %v7340_v16 = vpop.eup %6358 }
 0x2d5   : > { %v1318_v57 = vmul.f32 1.442695, %v1293_v10  ;;  %v1320_v19 = vmul.f32 1.442695, %v1294_v13  ;;  %v1344_v14 = vsel %vm859_vm2, %v7340_v16, 0.0 }
 0x2d6   : > { %v1274_v21 = vpop.xlane.xlu0 %1273  ;;  %v1271_v24 = vpop.xlane.xlu1 %1270  ;;  %1345 = vadd.xlane.f32.xlu0 %v1344_v14 }
 0x2d7   : > { %6366 = vpow2.f32 %v1318_v57  ;;  %v1296_v40 = vsub.f32 %v7279_v6, %v1274_v21  ;;  %v1295_v63 = vsub.f32 %v7297_v30, %v1271_v24 }
 0x2d8   : > { %v7345_v29 = vpop.eup %6360  ;;  %6368 = vpow2.f32 %v1320_v19 }
 0x2d9   : > { %6370 = vpow2.f32 %v1314_v18  ;;  %v1324_v22 = vmul.f32 1.442695, %v1296_v40  ;;  %v1347_v47 = vsel %vm859_vm2, %v7345_v29, 0.0  ;;  %v1322_v6 = vmul.f32 1.442695, %v1295_v63 }
 0x2da   : > { %v1277_v32 = vpop.xlane.xlu1 %1276  ;;  %v1280_v49 = vpop.xlane.xlu0 %1279  ;;  %1348 = vadd.xlane.f32.xlu1 %v1347_v47 }
 0x2db   : > { %6372 = vpow2.f32 %v1324_v22  ;;  %v1297_v44 = vsub.f32 %v7285_v15, %v1277_v32  ;;  %v1298_v43 = vsub.f32 %v7303_v39, %v1280_v49 }
 0x2dc   : > { %v7352_v37 = vpop.eup %6362 }
 0x2dd   : > { %v1326_v55 = vmul.f32 1.442695, %v1297_v44  ;;  %v1328_v51 = vmul.f32 1.442695, %v1298_v43  ;;  %v1350_v30 = vsel %vm859_vm2, %v7352_v37, 0.0 }
 0x2de   : > { %1351 = vadd.xlane.f32.xlu0 %v1350_v30  ;;  %v1283_v14 = vpop.xlane.xlu1 %1282 }
 0x2df   : > { %6374 = vpow2.f32 %v1326_v55  ;;  %v1299_v21 = vsub.f32 %v7309_v53, %v1283_v14 }
 0x2e0   : > { %v7356_v54 = vpop.eup %6364  ;;  %6376 = vpow2.f32 %v1328_v51 }
 0x2e1   : > { %6378 = vpow2.f32 %v1322_v6  ;;  %v1356_v56 = vsel %vm859_vm2, %v7356_v54, 0.0  ;;  %v1330_v24 = vmul.f32 1.442695, %v1299_v21 }
 0x2e2   : > { %1357 = vadd.xlane.f32.xlu0 %v1356_v56 }
 0x2e3   : > { %6380 = vpow2.f32 %v1330_v24 }
 0x2e4   : > { %v7360_v15 = vpop.eup %6366 }
 0x2e5   : > { %v7362_v39 = vpop.eup %6368  ;;  %v1359_v58 = vsel %vm859_vm2, %v7360_v15, 0.0 }
 0x2e6   : > { %v7366_v61 = vpop.eup %6370  ;;  %v1362_v1 = vsel %vm859_vm2, %v7362_v39, 0.0  ;;  %1360 = vadd.xlane.f32.xlu1 %v1359_v58 }
 0x2e7   : > { %1363 = vadd.xlane.f32.xlu0 %v1362_v1  ;;  %v1353_v3 = vsel %vm859_vm2, %v7366_v61, 0.0 }
 0x2e8   : > { %v7370_v2 = vpop.eup %6372 }
 0x2e9   : > { %v1368_v5 = vsel %vm859_vm2, %v7370_v2, 0.0 }
 0x2ea   : > { %1354 = vadd.xlane.f32.xlu1 %v1353_v3 }
 0x2eb   : > { %1369 = vadd.xlane.f32.xlu0 %v1368_v5 }
 0x2ec   : > { %v7376_v8 = vpop.eup %6374 }
 0x2ed   : > { %v7378_v10 = vpop.eup %6376  ;;  %v1371_v13 = vsel %vm859_vm2, %v7376_v8, 0.0 }
 0x2ee   : > { %v7382_v18 = vpop.eup %6378  ;;  %v1374_v57 = vsel %vm859_vm2, %v7378_v10, 0.0  ;;  %1372 = vadd.xlane.f32.xlu1 %v1371_v13 }
 0x2ef   : > { %1375 = vadd.xlane.f32.xlu0 %v1374_v57  ;;  %v1365_v19 = vsel %vm859_vm2, %v7382_v18, 0.0 }
 0x2f0   : > { %v7407_v40 = vpop.eup %6380 }
 0x2f1   : > { %v1377_v63 = vsel %vm859_vm2, %v7407_v40, 0.0 }
 0x2f2   : > { %1366 = vadd.xlane.f32.xlu1 %v1365_v19 }
 0x303   : > { %1829 = vrot.lane.b32.xlu1 %v7123_v62, %s6823_s25 }
 0x305   : > { %1776 = vrot.lane.b32.xlu0 %v7111_v52, %s6823_s25 }
 0x307   : > { %1773 = vrot.lane.b32.xlu1 %v7125_v0, %s6823_s25 }
 0x309   : > { %1826 = vrot.lane.b32.xlu0 %v7138_v11, %s6823_s25 }
 0x30d   : > { %1879 = vrot.lane.b32.xlu0 %v7160_v26, %s6823_s25 }
 0x311   : > { %1932 = vrot.lane.b32.xlu0 %v7188_v38, %s6823_s25 }
 0x315   : > { %1985 = vrot.lane.b32.xlu0 %v7158_v25, %s6823_s25 }
 0x319   : > { %2038 = vrot.lane.b32.xlu0 %v7207_v46, %s6823_s25 }
 0x31d   : > { %2091 = vrot.lane.b32.xlu0 %v7186_v35, %s6823_s25 }
 0x32b   : > { %1378 = vadd.xlane.f32.xlu1 %v1377_v63 }
 0x33c   : > { %1882 = vrot.lane.b32.xlu1 %v7136_v9, %s6823_s25 }
 0x340   : > { %1935 = vrot.lane.b32.xlu1 %v7156_v23, %s6823_s25 }
 0x344   : > { %1988 = vrot.lane.b32.xlu1 %v7140_v12, %s6823_s25 }
 0x348   : > { %2041 = vrot.lane.b32.xlu1 %v7184_v34, %s6823_s25 }
 0x34c   : > { %2094 = vrot.lane.b32.xlu1 %v7162_v27, %s6823_s25 }
 0x34f   : > { %v1334_v53 = vpop.xlane.xlu0 %1333 }
 0x350   : > { %2147 = vrot.lane.b32.xlu1 %v7205_v45, %s6823_s25  ;;  %6382 = vrcp.f32 %v1334_v53 }
 0x353   : > { %v1337_v22 = vpop.xlane.xlu1 %1336 }
 0x354   : > { %6384 = vrcp.f32 %v1337_v22  ;;  %2144 = vrot.lane.b32.xlu1 %v7220_v48, %s6823_s25 }
 0x357   : > { %v1340_v47 = vpop.xlane.xlu0 %1339 }
 0x358   : > { %6386 = vrcp.f32 %v1340_v47 }
 0x35b   : > { %v1343_v32 = vpop.xlane.xlu1 %1342 }
 0x35c   : > { %6388 = vrcp.f32 %v1343_v32 }
 0x35d   : > { %v6383_v49 = vpop.eup %6382 }
 0x35e   : > { %v1396_v6 = vmul.f32 %v6383_v49, %v7318_v28 }
 0x35f   : > { %v1346_v44 = vpop.xlane.xlu0 %1345 }
 0x360   : > { %6390 = vrcp.f32 %v1346_v44 }
 0x361   : > { %v6385_v43 = vpop.eup %6384 }
 0x362   : > { %v1397_v55 = vmul.f32 %v6385_v43, %v7323_v42 }
 0x363   : > { %v1349_v51 = vpop.xlane.xlu1 %1348 }
 0x364   : > { %6392 = vrcp.f32 %v1349_v51  ;;  %v1412_v30 = vpack.c.bf16 %v1397_v55, %v1396_v6 }
 0x365   : > { %v6387_v56 = vpop.eup %6386 }
 0x366   : > { %5750 = vmatmul.mubr.msk.bf16.vlgmr.msra.gmra.mxu0 %vm859_vm2, %v1412_v30  ;;  %v1398_v5 = vmul.f32 %v6387_v56, %v7328_v50 }
 0x367   : > { %5760 = vmatpush3.bf16.msra.mxu0 %v7239_v7  ;;  %v1352_v58 = vpop.xlane.xlu0 %1351  ;;  %5761 = vmatprep.mubr.msk.bf16.mxu0 %vm6822_vm1, %v8650_v36 }
 0x368   : > { %5771 = vmatprep.subr.bf16.mxu0 %v8650_v36 }
 0x369   : > { %v6389_v1 = vpop.eup %6388 }
 0x36a   : > { %v1399_v28 = vmul.f32 %v6389_v1, %v7333_v60 }
 0x36b   : > { %v1358_v42 = vpop.xlane.xlu0 %1357 }
 0x36c   : > { %v1413_v3 = vpack.c.bf16 %v1399_v28, %v1398_v5  ;;  %6394 = vrcp.f32 %v1358_v42 }
 0x36d   : > { %v6391_v13 = vpop.eup %6390 }
 0x36e   : > { %5756 = vmatmul.mubr.msk.bf16.vlgmr.msra.gmra.mxu1 %vm859_vm2, %v1413_v3  ;;  %v1400_v50 = vmul.f32 %v6391_v13, %v7340_v16 }
 0x36f   : > { %5766 = vmatpush3.bf16.msra.mxu1 %v7237_v4  ;;  %v1361_v57 = vpop.xlane.xlu1 %1360  ;;  %5767 = vmatprep.mubr.msk.bf16.mxu1 %vm6822_vm1, %v8650_v36 }
 0x370   : > { %v1364_v19 = vpop.xlane.xlu0 %1363  ;;  %6396 = vrcp.f32 %v1361_v57  ;;  %5777 = vmatprep.subr.bf16.mxu1 %v8650_v36 }
 0x371   : > { %v6393_v14 = vpop.eup %6392  ;;  %6398 = vrcp.f32 %v1352_v58 }
 0x372   : > { %v1401_v60 = vmul.f32 %v6393_v14, %v7345_v29 }
 0x373   : > { %v1355_v21 = vpop.xlane.xlu1 %1354 }
 0x374   : > { %v1370_v24 = vpop.xlane.xlu0 %1369  ;;  %6400 = vrcp.f32 %v1355_v21  ;;  %v1414_v63 = vpack.c.bf16 %v1401_v60, %v1400_v50 }
 0x375   : > { %6402 = vrcp.f32 %v1370_v24 }
 0x376   : > { %5762 = vmatmul.mubr.msk.bf16.vlgmr.msra.gmra.mxu0 %vm859_vm2, %v1414_v63 }
 0x377   : > { %5772 = vmatpush3.bf16.msra.mxu0 %v7243_v20  ;;  %v1373_v53 = vpop.xlane.xlu1 %1372  ;;  %5773 = vmatprep.mubr.msk.bf16.mxu0 %vm6822_vm1, %v8650_v36 }
 0x378   : > { %6404 = vrcp.f32 %v1373_v53  ;;  %5783 = vmatprep.subr.bf16.mxu0 %v8650_v36  ;;  %v1376_v6 = vpop.xlane.xlu0 %1375 }
 0x379   : > { %6406 = vrcp.f32 %v1364_v19  ;;  %v6395_v16 = vpop.eup %6394 }
 0x37a   : > { %v1404_v47 = vmul.f32 %v6395_v16, %v7356_v54 }
 0x37b   : > { %v1367_v22 = vpop.xlane.xlu1 %1366 }
 0x37c   : > { %6408 = vrcp.f32 %v1367_v22 }
 0x37d   : > { %v6397_v29 = vpop.eup %6396  ;;  %6410 = vrcp.f32 %v1376_v6 }
 0x37e   : > { %v1405_v32 = vmul.f32 %v6397_v29, %v7360_v15  ;;  %v6399_v49 = vpop.eup %6398 }
 0x37f   : > { %v1402_v55 = vmul.f32 %v6399_v49, %v7352_v37  ;;  %v1777_v37 = vpop.permute.xlu0 %1776 }
 0x380   : > { %v1416_v44 = vpack.c.bf16 %v1405_v32, %v1404_v47  ;;  %v1782_v28 = vsel %vm859_vm2, %v1777_v37, 0 }
 0x381   : > { %v6401_v43 = vpop.eup %6400 }
 0x382   : > { %5774 = vmatmul.mubr.msk.bf16.vlgmr.msra.gmra.mxu0 %vm859_vm2, %v1416_v44  ;;  %v1403_v51 = vmul.f32 %v6401_v43, %v7366_v61  ;;  %v6403_v30 = vpop.eup %6402 }
 0x383   : > { %5784 = vmatpush3.bf16.msra.mxu0 %v7247_v33  ;;  %5785 = vmatprep.mubr.msk.bf16.mxu0 %vm6822_vm1, %v8650_v36  ;;  %v1408_v15 = vmul.f32 %v6403_v30, %v7370_v2 }
 0x384   : > { %v1415_v56 = vpack.c.bf16 %v1403_v51, %v1402_v55  ;;  %5795 = vmatprep.subr.bf16.mxu0 %v8650_v36 }
 0x385   : > { %v6405_v54 = vpop.eup %6404 }
 0x386   : > { %5768 = vmatmul.mubr.msk.bf16.vlgmr.msra.gmra.mxu1 %vm859_vm2, %v1415_v56  ;;  %v1409_v58 = vmul.f32 %v6405_v54, %v7376_v8  ;;  %v6407_v1 = vpop.eup %6406  ;;  %v1830_v8 = vpop.permute.xlu1 %1829 }
 0x387   : > { %5778 = vmatpush3.bf16.msra.mxu1 %v7241_v17  ;;  %5779 = vmatprep.mubr.msk.bf16.mxu1 %vm6822_vm1, %v8650_v36  ;;  %v1406_v42 = vmul.f32 %v6407_v1, %v7362_v39  ;;  %v1835_v49 = vsel %vm859_vm2, %v1830_v8, 0 }
 0x388   : > { %v1418_v61 = vpack.c.bf16 %v1409_v58, %v1408_v15  ;;  %5789 = vmatprep.subr.bf16.mxu1 %v8650_v36 }
 0x389   : > { %v6409_v5 = vpop.eup %6408 }
 0x38a   : > { %5786 = vmatmul.mubr.msk.bf16.vlgmr.msra.gmra.mxu0 %vm859_vm2, %v1418_v61  ;;  %v1407_v2 = vmul.f32 %v6409_v5, %v7382_v18  ;;  %v1774_v39 = vpop.permute.xlu1 %1773  ;;  %v1827_v18 = vpop.permute.xlu0 %1826 }
 0x38b   : > { %5796 = vmatpush3.bf16.xpose.msra.mxu0 %v1782_v28  ;;  %5797 = vmatprep.mubr.msk.bf16.mxu0 %vm6822_vm1, %v8650_v36  ;;  %v6411_v21 = vpop.eup %6410 }
 0x38c   : > { %v1417_v3 = vpack.c.bf16 %v1407_v2, %v1406_v42  ;;  %5807 = vmatprep.subr.bf16.mxu0 %v8650_v36  ;;  %v1410_v16 = vmul.f32 %v6411_v21, %v7378_v10 }
 0x38e   : > { %5780 = vmatmul.mubr.msk.bf16.vlgmr.msra.gmra.mxu1 %vm859_vm2, %v1417_v3  ;;  %v1880_v57 = vpop.permute.xlu0 %1879 }
 0x38f   : > { %5790 = vmatpush3.bf16.msra.mxu1 %v7245_v31  ;;  %5791 = vmatprep.mubr.msk.bf16.mxu1 %vm6822_vm1, %v8650_v36 }
 0x390   : > { %5801 = vmatprep.subr.bf16.mxu1 %v8650_v36 }
 0x392   : > { %5798 = vmatmul.mubr.msk.bf16.vlgmr.msra.gmra.mxu0 %vm859_vm2, %v1774_v39  ;;  %v1933_v60 = vpop.permute.xlu0 %1932 }
 0x393   : > { %5809 = vmatprep.mubr.msk.bf16.mxu0 %vm6822_vm1, %v8650_v36 }
 0x396   : > { %v1986_v29 = vpop.permute.xlu0 %1985 }
 0x39a   : > { %v2039_v10 = vpop.permute.xlu0 %2038 }
 0x39e   : > { %v2092_v6 = vpop.permute.xlu0 %2091 }
 0x3b4   : > { %v1379_v13 = vpop.xlane.xlu1 %1378 }
 0x3b5   : > { %6412 = vrcp.f32 %v1379_v13 }
 0x3b8   : > { %v1883_v19 = vpop.permute.xlu1 %1882 }
 0x3b9   : > { %v1888_v14 = vsel %vm859_vm2, %v1883_v19, 0 }
 0x3ba   : > { %5808 = vmatpush3.bf16.xpose.msra.mxu0 %v1888_v14 }
 0x3bb   : > { %5819 = vmatprep.subr.bf16.mxu0 %v8650_v36 }
 0x3bc   : > { %v1936_v50 = vpop.permute.xlu1 %1935 }
 0x3c0   : > { %v1989_v24 = vpop.permute.xlu1 %1988 }
 0x3c1   : > { %v1994_v63 = vsel %vm859_vm2, %v1989_v24, 0  ;;  %5810 = vmatmul.mubr.msk.bf16.vlgmr.msra.gmra.mxu0 %vm859_vm2, %v1880_v57 }
 0x3c2   : > { %v6413_v53 = vpop.eup %6412  ;;  %5820 = vmatpush3.bf16.xpose.msra.mxu0 %v1994_v63  ;;  %5821 = vmatprep.mubr.msk.bf16.mxu0 %vm6822_vm1, %v8650_v36 }
 0x3c3   : > { %v1411_v22 = vmul.f32 %v6413_v53, %v7407_v40  ;;  %5831 = vmatprep.subr.bf16.mxu0 %v8650_v36  ;;  %v1941_v40 = vsel %vm859_vm2, %v1936_v50, 0 }
 0x3c4   : > { %v2042_v47 = vpop.permute.xlu1 %2041 }
 0x3c5   : > { %v1419_v32 = vpack.c.bf16 %v1411_v22, %v1410_v16  ;;  %v2047_v55 = vsel %vm859_vm2, %v2042_v47, 0 }
 0x3c7   : > { %5792 = vmatmul.mubr.msk.bf16.vlgmr.msra.gmra.mxu1 %vm859_vm2, %v1419_v32 }
 0x3c8   : > { %5802 = vmatpush3.bf16.xpose.msra.mxu1 %v1835_v49  ;;  %v2095_v44 = vpop.permute.xlu1 %2094  ;;  %5803 = vmatprep.mubr.msk.bf16.mxu1 %vm6822_vm1, %v8650_v36 }
 0x3c9   : > { %v2100_v43 = vsel %vm859_vm2, %v2095_v44, 0  ;;  %5822 = vmatmul.mubr.msk.bf16.vlgmr.msra.gmra.mxu0 %vm859_vm2, %v1986_v29  ;;  %5813 = vmatprep.subr.bf16.mxu1 %v8650_v36 }
 0x3ca   : > { %5832 = vmatpush3.bf16.xpose.msra.mxu0 %v2100_v43  ;;  %5833 = vmatprep.mubr.msk.bf16.mxu0 %vm6822_vm1, %v8650_v36 }
 0x3cb   : > { %5843 = vmatprep.subr.bf16.mxu0 %v8650_v36 }
 0x3cc   : > { %v2148_v51 = vpop.permute.xlu1 %2147 }
 0x3cd   : > { %v2153_v30 = vsel %vm859_vm2, %v2148_v51, 0 }
 0x3cf   : > { %5804 = vmatmul.mubr.msk.bf16.vlgmr.msra.gmra.mxu1 %vm859_vm2, %v1827_v18 }
 0x3d0   : > { %5814 = vmatpush3.bf16.xpose.msra.mxu1 %v1941_v40  ;;  %5815 = vmatprep.mubr.msk.bf16.mxu1 %vm6822_vm1, %v8650_v36  ;;  %v2145_v56 = vpop.permute.xlu1 %2144 }
 0x3d1   : > { %5834 = vmatmul.mubr.msk.bf16.vlgmr.msra.gmra.mxu0 %vm859_vm2, %v2092_v6  ;;  %5825 = vmatprep.subr.bf16.mxu1 %v8650_v36 }
 0x3d2   : > { %5845 = vmatprep.mubr.msk.bf16.mxu0 %vm6822_vm1, %v8650_v36 }
 0x3d7   : > { %5816 = vmatmul.mubr.msk.bf16.vlgmr.msra.gmra.mxu1 %vm859_vm2, %v1933_v60 }
 0x3d8   : > { %5826 = vmatpush3.bf16.xpose.msra.mxu1 %v2047_v55  ;;  %5827 = vmatprep.mubr.msk.bf16.mxu1 %vm6822_vm1, %v8650_v36 }
 0x3d9   : > { %5837 = vmatprep.subr.bf16.mxu1 %v8650_v36 }
 0x3df   : > { %5828 = vmatmul.mubr.msk.bf16.vlgmr.msra.gmra.mxu1 %vm859_vm2, %v2039_v10 }
 0x3e0   : > { %5838 = vmatpush3.bf16.xpose.msra.mxu1 %v2153_v30  ;;  %5839 = vmatprep.mubr.msk.bf16.mxu1 %vm6822_vm1, %v8650_v36 }
 0x3e1   : > { %5849 = vmatprep.subr.bf16.mxu1 %v8650_v36 }
 0x3e7   : > { %5840 = vmatmul.mubr.msk.bf16.vlgmr.msra.gmra.mxu1 %vm859_vm2, %v2145_v56 }
 0x3e8   : > { %5851 = vmatprep.mubr.msk.bf16.mxu1 %vm6822_vm1, %v8650_v36 }
 0x426   : > { %v7517_v54 = vpop.f32.mrf.mxu0 }
 0x427   : > { %8675 = vst [vmem:[#allocation16_spill] sm:$0xff] %v7517_v54 }
 0x428   : > { %v5751_v15 = vpop.f32.mrf.mxu0 }
 0x42a   : > { %v7519_v58 = vpop.f32.mrf.mxu0 }
 0x42b   : > { %8676 = vst [vmem:[#allocation17_spill] sm:$0xff] %v7519_v58 }
 0x42c   : > { %v5752_v1 = vpop.f32.mrf.mxu0 }
 0x42e   : > { %v7521_v37 = vpop.f32.mrf.mxu1 }
 0x42f   : > { %8677 = vst [vmem:[#allocation18_spill] sm:$0xff] %v7521_v37 }
 0x430   : > { %v5757_v61 = vpop.f32.mrf.mxu1 }
 0x432   : > { %v7523_v5 = vpop.f32.mrf.mxu1 }
 0x433   : > { %8678 = vst [vmem:[#allocation19_spill] sm:$0xff] %v7523_v5 }
 0x434   : > { %v5758_v28 = vpop.f32.mrf.mxu1 }
 0x436   : > { %v7525_v42 = vpop.f32.mrf.mxu0 }
 0x437   : > { %8679 = vst [vmem:[#allocation20_spill] sm:$0xff] %v7525_v42 }
 0x438   : > { %v5763_v2 = vpop.f32.mrf.mxu0 }
 0x43a   : > { %v7527_v8 = vpop.f32.mrf.mxu0 }
 0x43b   : > { %8680 = vst [vmem:[#allocation21_spill] sm:$0xff] %v7527_v8 }
 0x43c   : > { %v5764_v3 = vpop.f32.mrf.mxu0 }
 0x442   : > { %v7529_v39 = vpop.f32.mrf.mxu0 }
 0x443   : > { %8681 = vst [vmem:[#allocation22_spill] sm:$0xff] %v7529_v39 }
 0x444   : > { %v5775_v18 = vpop.f32.mrf.mxu0 }
 0x446   : > { %v7531_v13 = vpop.f32.mrf.mxu1  ;;  %v7533_v57 = vpop.f32.mrf.mxu0 }
 0x447   : > { %8682 = vst [vmem:[#allocation23_spill] sm:$0xff] %v7531_v13  ;;  %8683 = vst [vmem:[#allocation24_spill] sm:$0xff] %v7533_v57 }
 0x448   : > { %v5769_v19 = vpop.f32.mrf.mxu1  ;;  %v5776_v14 = vpop.f32.mrf.mxu0 }
 0x44a   : > { %v7535_v50 = vpop.f32.mrf.mxu1  ;;  %v7537_v60 = vpop.f32.mrf.mxu0 }
 0x44b   : > { %8684 = vst [vmem:[#allocation25_spill] sm:$0xff] %v7535_v50  ;;  %8685 = vst [vmem:[#allocation26_spill] sm:$0xff] %v7537_v60 }
 0x44c   : > { %v5770_v21 = vpop.f32.mrf.mxu1  ;;  %v5787_v24 = vpop.f32.mrf.mxu0 }
 0x44e   : > { %v7539_v63 = vpop.f32.mrf.mxu1  ;;  %v7541_v53 = vpop.f32.mrf.mxu0 }
 0x44f   : > { %8686 = vst [vmem:[#allocation27_spill] sm:$0xff] %v7539_v63  ;;  %8687 = vst [vmem:[#allocation28_spill] sm:$0xff] %v7541_v53 }
 0x450   : > { %v5781_v16 = vpop.f32.mrf.mxu1  ;;  %v5788_v22 = vpop.f32.mrf.mxu0 }
 0x452   : > { %v7543_v29 = vpop.f32.mrf.mxu1  ;;  %v7545_v47 = vpop.f32.mrf.mxu0 }
 0x453   : > { %8688 = vst [vmem:[#allocation29_spill] sm:$0xff] %v7543_v29  ;;  %v2196_v32 = vsel %vm859_vm2, %v7545_v47, -inf }
 0x454   : > { %2197 = vmax.xlane.f32.xlu0 %v2196_v32  ;;  %v5782_v49 = vpop.f32.mrf.mxu1  ;;  %v5799_v44 = vpop.f32.mrf.mxu0 }
 0x456   : > { %v7549_v43 = vpop.f32.mrf.mxu0 }
 0x457   : > { %v2199_v10 = vsel %vm859_vm2, %v7549_v43, -inf }
 0x458   : > { %2200 = vmax.xlane.f32.xlu1 %v2199_v10  ;;  %v5800_v40 = vpop.f32.mrf.mxu0 }
 0x481   : > { %v7553_v6 = vpop.f32.mrf.mxu0 }
 0x483   : > { %v5811_v55 = vpop.f32.mrf.mxu0 }
 0x485   : > { %v7555_v51 = vpop.f32.mrf.mxu0 }
 0x486   : > { %v2211_v30 = vsel %vm859_vm2, %v7555_v51, -inf }
 0x487   : > { %2212 = vmax.xlane.f32.xlu1 %v2211_v30  ;;  %v7559_v56 = vpop.f32.mrf.mxu1  ;;  %v5812_v15 = vpop.f32.mrf.mxu0  ;;  %v2208_v30 = vsel %vm859_vm2, %v7553_v6, -inf }
 0x488   : > { %8689 = vst [vmem:[#allocation30_spill] sm:$0xff] %v7559_v56 }
 0x489   : > { %v5793_v1 = vpop.f32.mrf.mxu1  ;;  %v7561_v61 = vpop.f32.mrf.mxu0 }
 0x48b   : > { %v7563_v28 = vpop.f32.mrf.mxu1  ;;  %v5823_v2 = vpop.f32.mrf.mxu0 }
 0x48c   : > { %8690 = vst [vmem:[#allocation31_spill] sm:$0xff] %v7563_v28 }
 0x48d   : > { %v5794_v3 = vpop.f32.mrf.mxu1  ;;  %v7565_v18 = vpop.f32.mrf.mxu0 }
 0x48f   : > { %v7567_v19 = vpop.f32.mrf.mxu1  ;;  %v5824_v14 = vpop.f32.mrf.mxu0 }
 0x490   : > { %v2202_v21 = vsel %vm859_vm2, %v7567_v19, -inf }
 0x491   : > { %v7571_v24 = vpop.f32.mrf.mxu0  ;;  %2203 = vmax.xlane.f32.xlu0 %v2202_v21  ;;  %v5805_v16 = vpop.f32.mrf.mxu1 }
 0x492   : > { %v2220_v16 = vsel %vm859_vm2, %v7561_v61, -inf }
 0x493   : > { %v7573_v22 = vpop.f32.mrf.mxu1  ;;  %v5835_v32 = vpop.f32.mrf.mxu0 }
 0x494   : > { %v2205_v49 = vsel %vm859_vm2, %v7573_v22, -inf  ;;  %v2223_v32 = vsel %vm859_vm2, %v7565_v18, -inf }
 0x495   : > { %v7577_v44 = vpop.f32.mrf.mxu0  ;;  %2206 = vmax.xlane.f32.xlu0 %v2205_v49  ;;  %v5806_v10 = vpop.f32.mrf.mxu1 }
 0x497   : > { %v7579_v40 = vpop.f32.mrf.mxu1  ;;  %v5836_v55 = vpop.f32.mrf.mxu0 }
 0x498   : > { %v2214_v2 = vsel %vm859_vm2, %v7579_v40, -inf }
 0x499   : > { %2209 = vmax.xlane.f32.xlu0 %v2208_v30  ;;  %v5817_v15 = vpop.f32.mrf.mxu1 }
 0x49b   : > { %v7583_v1 = vpop.f32.mrf.mxu1 }
 0x49c   : > { %v2217_v3 = vsel %vm859_vm2, %v7583_v1, -inf }
 0x49d   : > { %2215 = vmax.xlane.f32.xlu0 %v2214_v2  ;;  %2218 = vmax.xlane.f32.xlu1 %v2217_v3  ;;  %v5818_v14 = vpop.f32.mrf.mxu1  ;;  %v2232_v3 = vsel %vm859_vm2, %v7571_v24, -inf }
 0x49e   : > { %v2235_v14 = vsel %vm859_vm2, %v7577_v44, -inf }
 0x49f   : > { %v7589_v21 = vpop.f32.mrf.mxu1 }
 0x4a0   : > { %v2226_v55 = vsel %vm859_vm2, %v7589_v21, -inf }
 0x4a1   : > { %2221 = vmax.xlane.f32.xlu0 %v2220_v16  ;;  %2224 = vmax.xlane.f32.xlu1 %v2223_v32  ;;  %v5829_v49 = vpop.f32.mrf.mxu1 }
 0x4a3   : > { %v7595_v10 = vpop.f32.mrf.mxu1 }
 0x4a4   : > { %v2229_v30 = vsel %vm859_vm2, %v7595_v10, -inf }
 0x4a5   : > { %2227 = vmax.xlane.f32.xlu0 %v2226_v55  ;;  %2230 = vmax.xlane.f32.xlu1 %v2229_v30  ;;  %v5830_v15 = vpop.f32.mrf.mxu1 }
 0x4a7   : > { %v7601_v2 = vpop.f32.mrf.mxu1 }
 0x4a8   : > { %v2238_v49 = vsel %vm859_vm2, %v7601_v2, -inf }
 0x4a9   : > { %2233 = vmax.xlane.f32.xlu0 %v2232_v3  ;;  %2236 = vmax.xlane.f32.xlu1 %v2235_v14  ;;  %v5841_v16 = vpop.f32.mrf.mxu1 }
 0x4ab   : > { %v7607_v32 = vpop.f32.mrf.mxu1 }
 0x4ac   : > { %v2241_v14 = vsel %vm859_vm2, %v7607_v32, -inf }
 0x4ad   : > { %2239 = vmax.xlane.f32.xlu0 %v2238_v49  ;;  %v5842_v55 = vpop.f32.mrf.mxu1 }
 0x4ba   : > { %2429 = vrot.lane.b32.xlu1 %v7229_v41, %s6823_s25 }
 0x4be   : > { %2477 = vrot.lane.b32.xlu1 %v7239_v7, %s6823_s25 }
 0x4c2   : > { %2525 = vrot.lane.b32.xlu1 %v7237_v4, %s6823_s25 }
 0x4c3   : > { %2381 = vrot.lane.b32.xlu0 %v7231_v59, %s6823_s25 }
 0x4c6   : > { %2621 = vrot.lane.b32.xlu1 %v7241_v17, %s6823_s25 }
 0x4c7   : > { %2573 = vrot.lane.b32.xlu0 %v7243_v20, %s6823_s25 }
 0x4cb   : > { %2669 = vrot.lane.b32.xlu0 %v7247_v33, %s6823_s25 }
 0x4dd   : > { %v2198_v30 = vpop.xlane.xlu0 %2197 }
 0x4de   : > { %v2244_v15 = vsub.f32 %v7545_v47, %v2198_v30 }
 0x4e0   : > { %v2260_v3 = vmul.f32 1.442695, %v2244_v15 }
 0x4e1   : > { %v2201_v55 = vpop.xlane.xlu1 %2200 }
 0x4e2   : > { %6414 = vpow2.f32 %v2260_v3  ;;  %v2245_v36 = vsub.f32 %v7549_v43, %v2201_v55 }
 0x4e4   : > { %v2262_v56 = vmul.f32 1.442695, %v2245_v36 }
 0x4e6   : > { %6416 = vpow2.f32 %v2262_v56 }
 0x4ea   : > { %2242 = vmax.xlane.f32.xlu1 %v2241_v14 }
 0x4ef   : > { %v7628_v16 = vpop.eup %6414 }
 0x4f0   : > { %v2292_v49 = vsel %vm859_vm2, %v7628_v16, 0.0 }
 0x4f1   : > { %2293 = vadd.xlane.f32.xlu0 %v2292_v49 }
 0x4f3   : > { %v7635_v15 = vpop.eup %6416 }
 0x4f4   : > { %v2295_v49 = vsel %vm859_vm2, %v7635_v15, 0.0 }
 0x4fb   : > { %2717 = vrot.lane.b32.xlu1 %v7245_v31, %s6823_s25  ;;  %s8600_s25 = scalar_lea.hbm %s8645_s8, %s5446_s18 }
 0x510   : > { %v2213_v47 = vpop.xlane.xlu1 %2212 }
 0x511   : > { %v2249_v14 = vsub.f32 %v7555_v51, %v2213_v47 }
 0x513   : > { %v2270_v43 = vmul.f32 1.442695, %v2249_v14 }
 0x51a   : > { %v2204_v30 = vpop.xlane.xlu0 %2203 }
 0x51b   : > { %v2246_v3 = vsub.f32 %v7567_v19, %v2204_v30 }
 0x51d   : > { %v2264_v28 = vmul.f32 1.442695, %v2246_v3 }
 0x51e   : > { %v2207_v60 = vpop.xlane.xlu0 %2206 }
 0x51f   : > { %6418 = vpow2.f32 %v2264_v28  ;;  %v2247_v53 = vsub.f32 %v7573_v22, %v2207_v60  ;;  %2296 = vadd.xlane.f32.xlu1 %v2295_v49 }
 0x521   : > { %v2266_v36 = vmul.f32 1.442695, %v2247_v53 }
 0x522   : > { %v2210_v56 = vpop.xlane.xlu0 %2209 }
 0x523   : > { %6420 = vpow2.f32 %v2266_v36  ;;  %v2248_v55 = vsub.f32 %v7553_v6, %v2210_v56 }
 0x524   : > { %6422 = vpow2.f32 %v2270_v43 }
 0x525   : > { %v2268_v63 = vmul.f32 1.442695, %v2248_v55 }
 0x526   : > { %v2216_v19 = vpop.xlane.xlu0 %2215  ;;  %v2219_v30 = vpop.xlane.xlu1 %2218 }
 0x527   : > { %6424 = vpow2.f32 %v2268_v63  ;;  %v2250_v51 = vsub.f32 %v7579_v40, %v2216_v19  ;;  %v2251_v47 = vsub.f32 %v7583_v1, %v2219_v30 }
 0x529   : > { %v2272_v3 = vmul.f32 1.442695, %v2250_v51  ;;  %v2274_v28 = vmul.f32 1.442695, %v2251_v47 }
 0x52a   : > { %v2222_v29 = vpop.xlane.xlu0 %2221  ;;  %v2225_v60 = vpop.xlane.xlu1 %2224 }
 0x52b   : > { %6426 = vpow2.f32 %v2272_v3  ;;  %v2252_v53 = vsub.f32 %v7561_v61, %v2222_v29  ;;  %v2253_v22 = vsub.f32 %v7565_v18, %v2225_v60 }
 0x52c   : > { %v7647_v14 = vpop.eup %6418  ;;  %6428 = vpow2.f32 %v2274_v28 }
 0x52d   : > { %v2276_v6 = vmul.f32 1.442695, %v2252_v53  ;;  %v2278_v49 = vmul.f32 1.442695, %v2253_v22  ;;  %v2298_v63 = vsel %vm859_vm2, %v7647_v14, 0.0 }
 0x52e   : > { %v2228_v40 = vpop.xlane.xlu0 %2227  ;;  %v2231_v43 = vpop.xlane.xlu1 %2230  ;;  %2299 = vadd.xlane.f32.xlu0 %v2298_v63 }
 0x52f   : > { %6430 = vpow2.f32 %v2276_v6  ;;  %v2254_v1 = vsub.f32 %v7589_v21, %v2228_v40  ;;  %v2255_v36 = vsub.f32 %v7595_v10, %v2231_v43  ;;  %v8691_v6 = vmov 0.0  }
 0x530   : > { %v7653_v56 = vpop.eup %6420  ;;  %6432 = vpow2.f32 %v2278_v49 }
 0x531   : > { %v2280_v29 = vmul.f32 1.442695, %v2254_v1  ;;  %v2282_v61 = vmul.f32 1.442695, %v2255_v36  ;;  %v2301_v18 = vsel %vm859_vm2, %v7653_v56, 0.0  ;;  %v7657_v55 = vpop.eup %6422 }
 0x532   : > { %v2234_v19 = vpop.xlane.xlu0 %2233  ;;  %v2237_v30 = vpop.xlane.xlu1 %2236  ;;  %2302 = vadd.xlane.f32.xlu1 %v2301_v18  ;;  %v2307_v60 = vsel %vm859_vm2, %v7657_v55, 0.0 }
 0x533   : > { %6434 = vpow2.f32 %v2280_v29  ;;  %v2256_v51 = vsub.f32 %v7571_v24, %v2234_v19  ;;  %v2257_v21 = vsub.f32 %v7577_v44, %v2237_v30 }
 0x534   : > { %v7661_v47 = vpop.eup %6424  ;;  %6436 = vpow2.f32 %v2282_v61 }
 0x535   : > { %v2284_v10 = vmul.f32 1.442695, %v2256_v51  ;;  %v2286_v3 = vmul.f32 1.442695, %v2257_v21  ;;  %v2304_v28 = vsel %vm859_vm2, %v7661_v47, 0.0 }
 0x536   : > { %v2430_v53 = vpop.permute.xlu1 %2429  ;;  %2305 = vadd.xlane.f32.xlu0 %v2304_v28  ;;  %v2240_v22 = vpop.xlane.xlu0 %2239  ;;  %2308 = vadd.xlane.f32.xlu1 %v2307_v60 }
 0x537   : > { %6438 = vpow2.f32 %v2284_v10  ;;  %v2258_v24 = vsub.f32 %v7601_v2, %v2240_v22  ;;  %5850 = vmatpush3.bf16.msra.mxu1 %v2430_v53 }
 0x538   : > { %v7668_v44 = vpop.eup %6426  ;;  %6440 = vpow2.f32 %v2286_v3  ;;  %5861 = vmatprep.subr.bf16.mxu1 %v8691_v6 }
 0x539   : > { %v7671_v49 = vpop.eup %6428  ;;  %v2288_v63 = vmul.f32 1.442695, %v2258_v24  ;;  %v2310_v40 = vsel %vm859_vm2, %v7668_v44, 0.0 }
 0x53a   : > { %2311 = vadd.xlane.f32.xlu0 %v2310_v40  ;;  %v2382_v43 = vpop.permute.xlu0 %2381  ;;  %v2313_v1 = vsel %vm859_vm2, %v7671_v49, 0.0  ;;  %v2478_v22 = vpop.permute.xlu1 %2477 }
 0x53b   : > { %6442 = vpow2.f32 %v2288_v63  ;;  %2314 = vadd.xlane.f32.xlu1 %v2313_v1  ;;  %5844 = vmatpush3.bf16.msra.mxu0 %v2382_v43 }
 0x53c   : > { %v7677_v2 = vpop.eup %6430  ;;  %5855 = vmatprep.subr.bf16.mxu0 %v8691_v6 }
 0x53d   : > { %v7680_v36 = vpop.eup %6432  ;;  %v2316_v29 = vsel %vm859_vm2, %v7677_v2, 0.0 }
 0x53e   : > { %2317 = vadd.xlane.f32.xlu0 %v2316_v29  ;;  %v2319_v61 = vsel %vm859_vm2, %v7680_v36, 0.0  ;;  %v7714_v24 = vpop.permute.xlu1 %2525 }
 0x53f   : > { %2320 = vadd.xlane.f32.xlu1 %v2319_v61 }
 0x540   : > { %v7686_v18 = vpop.eup %6434 }
 0x541   : > { %v7688_v19 = vpop.eup %6436  ;;  %v2322_v30 = vsel %vm859_vm2, %v7686_v18, 0.0 }
 0x542   : > { %2323 = vadd.xlane.f32.xlu0 %v2322_v30  ;;  %v2325_v51 = vsel %vm859_vm2, %v7688_v19, 0.0  ;;  %v7718_v63 = vpop.permute.xlu1 %2621 }
 0x543   : > { %2326 = vadd.xlane.f32.xlu1 %v2325_v51 }
 0x544   : > { %v7694_v21 = vpop.eup %6438 }
 0x545   : > { %v7696_v10 = vpop.eup %6440  ;;  %v2328_v3 = vsel %vm859_vm2, %v7694_v21, 0.0 }
 0x546   : > { %2329 = vadd.xlane.f32.xlu0 %v2328_v3  ;;  %v2331_v28 = vsel %vm859_vm2, %v7696_v10, 0.0 }
 0x547   : > { %2332 = vadd.xlane.f32.xlu1 %v2331_v28 }
 0x548   : > { %v7702_v60 = vpop.eup %6442 }
 0x549   : > { %v2334_v53 = vsel %vm859_vm2, %v7702_v60, 0.0 }
 0x54a   : > { %2335 = vadd.xlane.f32.xlu0 %v2334_v53 }
 0x558   : > { %2817 = vrot.lane.b32.xlu1 %v7123_v62, %s6824_s16 }
 0x560   : > { %2766 = vrot.lane.b32.xlu0 %v7111_v52, %s6824_s16 }
 0x564   : > { %2764 = vrot.lane.b32.xlu0 %v7125_v0, %s6824_s16 }
 0x568   : > { %2815 = vrot.lane.b32.xlu0 %v7138_v11, %s6824_s16 }
 0x56c   : > { %2866 = vrot.lane.b32.xlu0 %v7160_v26, %s6824_s16 }
 0x570   : > { %2917 = vrot.lane.b32.xlu0 %v7188_v38, %s6824_s16 }
 0x573   : > { %v2243_v40 = vpop.xlane.xlu1 %2242 }
 0x574   : > { %v2259_v43 = vsub.f32 %v7607_v32, %v2243_v40  ;;  %2968 = vrot.lane.b32.xlu0 %v7158_v25, %s6824_s16  ;;  %v7735_v32 = vpop.permute.xlu0 %2573 }
 0x576   : > { %v2290_v1 = vmul.f32 1.442695, %v2259_v43 }
 0x577   : > { %v7743_v51 = vpop.permute.xlu1 %2717 }
 0x578   : > { %6444 = vpow2.f32 %v2290_v1  ;;  %3019 = vrot.lane.b32.xlu0 %v7207_v46, %s6824_s16  ;;  %v7739_v30 = vpop.permute.xlu0 %2669 }
 0x57c   : > { %3070 = vrot.lane.b32.xlu0 %v7186_v35, %s6824_s16  ;;  %v2294_v3 = vpop.xlane.xlu0 %2293 }
 0x57d   : > { %6446 = vrcp.f32 %v2294_v3 }
 0x585   : > { %v7729_v29 = vpop.eup %6444 }
 0x586   : > { %v2337_v61 = vsel %vm859_vm2, %v7729_v29, 0.0 }
 0x587   : > { %2338 = vadd.xlane.f32.xlu1 %v2337_v61 }
 0x58a   : > { %v6447_v53 = vpop.eup %6446 }
 0x58b   : > { %v2356_v1 = vmul.f32 %v6447_v53, %v7628_v16 }
 0x598   : > { %2868 = vrot.lane.b32.xlu1 %v7136_v9, %s6824_s16 }
 0x59c   : > { %2919 = vrot.lane.b32.xlu1 %v7156_v23, %s6824_s16 }
 0x5a0   : > { %2970 = vrot.lane.b32.xlu1 %v7140_v12, %s6824_s16 }
 0x5a4   : > { %3021 = vrot.lane.b32.xlu1 %v7184_v34, %s6824_s16 }
 0x5a8   : > { %3072 = vrot.lane.b32.xlu1 %v7162_v27, %s6824_s16  ;;  %v2297_v28 = vpop.xlane.xlu1 %2296 }
 0x5a9   : > { %6448 = vrcp.f32 %v2297_v28 }
 0x5ac   : > { %3123 = vrot.lane.b32.xlu1 %v7205_v45, %s6824_s16 }
 0x5b0   : > { %3121 = vrot.lane.b32.xlu1 %v7220_v48, %s6824_s16 }
 0x5b6   : > { %v6449_v40 = vpop.eup %6448 }
 0x5b7   : > { %v2300_v43 = vpop.xlane.xlu0 %2299  ;;  %v2357_v61 = vmul.f32 %v6449_v40, %v7635_v15 }
 0x5b8   : > { %6450 = vrcp.f32 %v2300_v43 }
 0x5b9   : > { %v2372_v39 = vpack.c.bf16 %v2357_v61, %v2356_v1 }
 0x5bb   : > { %5846 = vmatmul.mubr.msk.bf16.vlgmr.msra.gmra.mxu0 %vm859_vm2, %v2372_v39  ;;  %v2303_v3 = vpop.xlane.xlu1 %2302 }
 0x5bc   : > { %5856 = vmatpush3.bf16.msra.mxu0 %v2478_v22  ;;  %6452 = vrcp.f32 %v2303_v3  ;;  %5857 = vmatprep.mubr.msk.bf16.mxu0 %vm6822_vm1, %v8691_v6 }
 0x5bd   : > { %5867 = vmatprep.subr.bf16.mxu0 %v8691_v6 }
 0x5bf   : > { %v2306_v28 = vpop.xlane.xlu0 %2305  ;;  %v2309_v57 = vpop.xlane.xlu1 %2308 }
 0x5c0   : > { %6454 = vrcp.f32 %v2306_v28 }
 0x5c1   : > { %6456 = vrcp.f32 %v2309_v57 }
 0x5c3   : > { %v2312_v13 = vpop.xlane.xlu0 %2311 }
 0x5c4   : > { %6458 = vrcp.f32 %v2312_v13  ;;  %v2315_v16 = vpop.xlane.xlu1 %2314 }
 0x5c5   : > { %6460 = vrcp.f32 %v2315_v16  ;;  %v6451_v15 = vpop.eup %6450 }
 0x5c6   : > { %v2358_v22 = vmul.f32 %v6451_v15, %v7647_v14 }
 0x5c7   : > { %v2318_v53 = vpop.xlane.xlu0 %2317 }
 0x5c8   : > { %6462 = vrcp.f32 %v2318_v53  ;;  %v2321_v39 = vpop.xlane.xlu1 %2320 }
 0x5c9   : > { %v6453_v40 = vpop.eup %6452  ;;  %6464 = vrcp.f32 %v2321_v39 }
 0x5ca   : > { %v2359_v43 = vmul.f32 %v6453_v40, %v7653_v56 }
 0x5cb   : > { %v2324_v1 = vpop.xlane.xlu0 %2323 }
 0x5cc   : > { %6466 = vrcp.f32 %v2324_v1  ;;  %v2327_v61 = vpop.xlane.xlu1 %2326  ;;  %v2373_v3 = vpack.c.bf16 %v2359_v43, %v2358_v22 }
 0x5cd   : > { %v6455_v28 = vpop.eup %6454  ;;  %6468 = vrcp.f32 %v2327_v61 }
 0x5ce   : > { %v6457_v57 = vpop.eup %6456  ;;  %5852 = vmatmul.mubr.msk.bf16.vlgmr.msra.gmra.mxu1 %vm859_vm2, %v2373_v3  ;;  %v2360_v13 = vmul.f32 %v6455_v28, %v7661_v47 }
 0x5cf   : > { %5862 = vmatpush3.bf16.msra.mxu1 %v7714_v24  ;;  %v2330_v16 = vpop.xlane.xlu0 %2329  ;;  %v2361_v53 = vmul.f32 %v6457_v57, %v7657_v55  ;;  %5863 = vmatprep.mubr.msk.bf16.mxu1 %vm6822_vm1, %v8691_v6 }
 0x5d0   : > { %6470 = vrcp.f32 %v2330_v16  ;;  %v2333_v14 = vpop.xlane.xlu1 %2332  ;;  %5873 = vmatprep.subr.bf16.mxu1 %v8691_v6 }
 0x5d1   : > { %v6459_v56 = vpop.eup %6458  ;;  %6472 = vrcp.f32 %v2333_v14  ;;  %v2374_v15 = vpack.c.bf16 %v2361_v53, %v2360_v13 }
 0x5d2   : > { %v6461_v39 = vpop.eup %6460  ;;  %v2362_v40 = vmul.f32 %v6459_v56, %v7668_v44 }
 0x5d3   : > { %5858 = vmatmul.mubr.msk.bf16.vlgmr.msra.gmra.mxu0 %vm859_vm2, %v2374_v15  ;;  %v2363_v47 = vmul.f32 %v6461_v39, %v7671_v49  ;;  %v2336_v61 = vpop.xlane.xlu0 %2335 }
 0x5d4   : > { %5868 = vmatpush3.bf16.msra.mxu0 %v7735_v32  ;;  %5869 = vmatprep.mubr.msk.bf16.mxu0 %vm6822_vm1, %v8691_v6  ;;  %6474 = vrcp.f32 %v2336_v61 }
 0x5d5   : > { %v6463_v55 = vpop.eup %6462  ;;  %v2375_v24 = vpack.c.bf16 %v2363_v47, %v2362_v40  ;;  %5879 = vmatprep.subr.bf16.mxu0 %v8691_v6 }
 0x5d6   : > { %v6465_v22 = vpop.eup %6464  ;;  %v2364_v43 = vmul.f32 %v6463_v55, %v7677_v2 }
 0x5d7   : > { %5864 = vmatmul.mubr.msk.bf16.vlgmr.msra.gmra.mxu1 %vm859_vm2, %v2375_v24  ;;  %v2365_v44 = vmul.f32 %v6465_v22, %v7680_v36  ;;  %v2767_v13 = vpop.permute.xlu0 %2766 }
 0x5d8   : > { %5874 = vmatpush3.bf16.msra.mxu1 %v7718_v63  ;;  %5875 = vmatprep.mubr.msk.bf16.mxu1 %vm6822_vm1, %v8691_v6 }
 0x5d9   : > { %v6467_v49 = vpop.eup %6466  ;;  %v2376_v32 = vpack.c.bf16 %v2365_v44, %v2364_v43  ;;  %5885 = vmatprep.subr.bf16.mxu1 %v8691_v6 }
 0x5da   : > { %v6469_v1 = vpop.eup %6468  ;;  %v2366_v3 = vmul.f32 %v6467_v49, %v7686_v18 }
 0x5db   : > { %5870 = vmatmul.mubr.msk.bf16.vlgmr.msra.gmra.mxu0 %vm859_vm2, %v2376_v32  ;;  %v2367_v2 = vmul.f32 %v6469_v1, %v7688_v19 }
 0x5dc   : > { %5880 = vmatpush3.bf16.msra.mxu0 %v7739_v30  ;;  %5881 = vmatprep.mubr.msk.bf16.mxu0 %vm6822_vm1, %v8691_v6  ;;  %v2772_v30 = vsel %vm859_vm2, %v2767_v13, 0 }
 0x5dd   : > { %v6471_v36 = vpop.eup %6470  ;;  %v2377_v63 = vpack.c.bf16 %v2367_v2, %v2366_v3  ;;  %5891 = vmatprep.subr.bf16.mxu0 %v8691_v6 }
 0x5de   : > { %v6473_v28 = vpop.eup %6472  ;;  %v2368_v57 = vmul.f32 %v6471_v36, %v7694_v21  ;;  %v2765_v21 = vpop.permute.xlu0 %2764 }
 0x5df   : > { %5876 = vmatmul.mubr.msk.bf16.vlgmr.msra.gmra.mxu1 %vm859_vm2, %v2377_v63  ;;  %v2369_v18 = vmul.f32 %v6473_v28, %v7696_v10  ;;  %v2818_v10 = vpop.permute.xlu1 %2817 }
 0x5e0   : > { %5886 = vmatpush3.bf16.msra.mxu1 %v7743_v51  ;;  %5887 = vmatprep.mubr.msk.bf16.mxu1 %vm6822_vm1, %v8691_v6  ;;  %v2823_v1 = vsel %vm859_vm2, %v2818_v10, 0 }
 0x5e1   : > { %v2378_v19 = vpack.c.bf16 %v2369_v18, %v2368_v57  ;;  %5897 = vmatprep.subr.bf16.mxu1 %v8691_v6  ;;  %v6475_v40 = vpop.eup %6474 }
 0x5e2   : > { %v2816_v51 = vpop.permute.xlu0 %2815  ;;  %v2370_v22 = vmul.f32 %v6475_v40, %v7702_v60 }
 0x5e3   : > { %5882 = vmatmul.mubr.msk.bf16.vlgmr.msra.gmra.mxu0 %vm859_vm2, %v2378_v19 }
 0x5e4   : > { %5892 = vmatpush3.bf16.xpose.msra.mxu0 %v2772_v30  ;;  %5893 = vmatprep.mubr.msk.bf16.mxu0 %vm6822_vm1, %v8691_v6 }
 0x5e5   : > { %5903 = vmatprep.subr.bf16.mxu0 %v8691_v6 }
 0x5e6   : > { %v2867_v53 = vpop.permute.xlu0 %2866 }
 0x5ea   : > { %v2918_v39 = vpop.permute.xlu0 %2917 }
 0x5eb   : > { %5894 = vmatmul.mubr.msk.bf16.vlgmr.msra.gmra.mxu0 %vm859_vm2, %v2765_v21 }
 0x5ec   : > { %5905 = vmatprep.mubr.msk.bf16.mxu0 %vm6822_vm1, %v8691_v6 }
 0x5ee   : > { %v2969_v44 = vpop.permute.xlu0 %2968 }
 0x5f2   : > { %v3020_v60 = vpop.permute.xlu0 %3019 }
 0x5f6   : > { %v3071_v2 = vpop.permute.xlu0 %3070 }
 0x610   : > { %v2339_v16 = vpop.xlane.xlu1 %2338 }
 0x611   : > { %6476 = vrcp.f32 %v2339_v16 }
 0x614   : > { %v2869_v14 = vpop.permute.xlu1 %2868 }
 0x615   : > { %v2874_v56 = vsel %vm859_vm2, %v2869_v14, 0 }
 0x616   : > { %5904 = vmatpush3.bf16.xpose.msra.mxu0 %v2874_v56 }
 0x617   : > { %5915 = vmatprep.subr.bf16.mxu0 %v8691_v6 }
 0x618   : > { %v2920_v15 = vpop.permute.xlu1 %2919 }
 0x61c   : > { %v2971_v47 = vpop.permute.xlu1 %2970 }
 0x61d   : > { %v2976_v55 = vsel %vm859_vm2, %v2971_v47, 0  ;;  %5906 = vmatmul.mubr.msk.bf16.vlgmr.msra.gmra.mxu0 %vm859_vm2, %v2867_v53 }
 0x61e   : > { %v6477_v24 = vpop.eup %6476  ;;  %5916 = vmatpush3.bf16.xpose.msra.mxu0 %v2976_v55  ;;  %5917 = vmatprep.mubr.msk.bf16.mxu0 %vm6822_vm1, %v8691_v6 }
 0x61f   : > { %v2371_v43 = vmul.f32 %v6477_v24, %v7729_v29  ;;  %5927 = vmatprep.subr.bf16.mxu0 %v8691_v6  ;;  %v2925_v29 = vsel %vm859_vm2, %v2920_v15, 0 }
 0x620   : > { %v3022_v49 = vpop.permute.xlu1 %3021 }
 0x621   : > { %v2379_v32 = vpack.c.bf16 %v2371_v43, %v2370_v22  ;;  %v3027_v36 = vsel %vm859_vm2, %v3022_v49, 0 }
 0x623   : > { %5888 = vmatmul.mubr.msk.bf16.vlgmr.msra.gmra.mxu1 %vm859_vm2, %v2379_v32 }
 0x624   : > { %5898 = vmatpush3.bf16.xpose.msra.mxu1 %v2823_v1  ;;  %v3073_v61 = vpop.permute.xlu1 %3072  ;;  %5899 = vmatprep.mubr.msk.bf16.mxu1 %vm6822_vm1, %v8691_v6 }
 0x625   : > { %v3078_v3 = vsel %vm859_vm2, %v3073_v61, 0  ;;  %5918 = vmatmul.mubr.msk.bf16.vlgmr.msra.gmra.mxu0 %vm859_vm2, %v2969_v44  ;;  %5909 = vmatprep.subr.bf16.mxu1 %v8691_v6 }
 0x626   : > { %5928 = vmatpush3.bf16.xpose.msra.mxu0 %v3078_v3  ;;  %5929 = vmatprep.mubr.msk.bf16.mxu0 %vm6822_vm1, %v8691_v6 }
 0x627   : > { %5939 = vmatprep.subr.bf16.mxu0 %v8691_v6 }
 0x628   : > { %v3124_v63 = vpop.permute.xlu1 %3123 }
 0x629   : > { %v3129_v28 = vsel %vm859_vm2, %v3124_v63, 0 }
 0x62b   : > { %5900 = vmatmul.mubr.msk.bf16.vlgmr.msra.gmra.mxu1 %vm859_vm2, %v2816_v51 }
 0x62c   : > { %5910 = vmatpush3.bf16.xpose.msra.mxu1 %v2925_v29  ;;  %5911 = vmatprep.mubr.msk.bf16.mxu1 %vm6822_vm1, %v8691_v6  ;;  %v3122_v57 = vpop.permute.xlu1 %3121 }
 0x62d   : > { %5930 = vmatmul.mubr.msk.bf16.vlgmr.msra.gmra.mxu0 %vm859_vm2, %v3071_v2  ;;  %5921 = vmatprep.subr.bf16.mxu1 %v8691_v6 }
 0x62e   : > { %5941 = vmatprep.mubr.msk.bf16.mxu0 %vm6822_vm1, %v8691_v6 }
 0x633   : > { %5912 = vmatmul.mubr.msk.bf16.vlgmr.msra.gmra.mxu1 %vm859_vm2, %v2918_v39 }
 0x634   : > { %5922 = vmatpush3.bf16.xpose.msra.mxu1 %v3027_v36  ;;  %5923 = vmatprep.mubr.msk.bf16.mxu1 %vm6822_vm1, %v8691_v6 }
 0x635   : > { %5933 = vmatprep.subr.bf16.mxu1 %v8691_v6 }
 0x63b   : > { %5924 = vmatmul.mubr.msk.bf16.vlgmr.msra.gmra.mxu1 %vm859_vm2, %v3020_v60 }
 0x63c   : > { %5934 = vmatpush3.bf16.xpose.msra.mxu1 %v3129_v28  ;;  %5935 = vmatprep.mubr.msk.bf16.mxu1 %vm6822_vm1, %v8691_v6 }
 0x63d   : > { %5945 = vmatprep.subr.bf16.mxu1 %v8691_v6 }
 0x643   : > { %5936 = vmatmul.mubr.msk.bf16.vlgmr.msra.gmra.mxu1 %vm859_vm2, %v3122_v57 }
 0x644   : > { %5947 = vmatprep.mubr.msk.bf16.mxu1 %vm6822_vm1, %v8691_v6 }
 0x67b   : > { %v7844_v18 = vpop.f32.mrf.mxu0 }
 0x67d   : > { %v5847_v13 = vpop.f32.mrf.mxu0 }
 0x67f   : > { %v7846_v19 = vpop.f32.mrf.mxu0 }
 0x681   : > { %v5848_v21 = vpop.f32.mrf.mxu0 }
 0x68e   : > { %v7850_v10 = vpop.f32.mrf.mxu1 }
 0x690   : > { %v5853_v51 = vpop.f32.mrf.mxu1 }
 0x692   : > { %v7852_v16 = vpop.f32.mrf.mxu1 }
 0x693   : > { %v7856_v14 = vpop.f32.mrf.mxu0 }
 0x694   : > { %v5854_v56 = vpop.f32.mrf.mxu1 }
 0x695   : > { %v5859_v15 = vpop.f32.mrf.mxu0 }
 0x697   : > { %v7858_v39 = vpop.f32.mrf.mxu0  ;;  %v7860_v40 = vpop.f32.mrf.mxu1 }
 0x698   : > { %8692 = vst [vmem:[#allocation32_spill] sm:$0xff] %v7860_v40 }
 0x699   : > { %v5860_v55 = vpop.f32.mrf.mxu0  ;;  %v5865_v24 = vpop.f32.mrf.mxu1 }
 0x69b   : > { %v7864_v22 = vpop.f32.mrf.mxu1  ;;  %v7866_v43 = vpop.f32.mrf.mxu0 }
 0x69d   : > { %v5866_v49 = vpop.f32.mrf.mxu1  ;;  %v5871_v32 = vpop.f32.mrf.mxu0 }
 0x69f   : > { %v7870_v1 = vpop.f32.mrf.mxu0  ;;  %v7872_v61 = vpop.f32.mrf.mxu1 }
 0x6a0   : > { %8693 = vst [vmem:[#allocation33_spill] sm:$0xff] %v7872_v61 }
 0x6a1   : > { %v5872_v60 = vpop.f32.mrf.mxu0  ;;  %v5877_v29 = vpop.f32.mrf.mxu1 }
 0x6a3   : > { %v7876_v2 = vpop.f32.mrf.mxu1  ;;  %v7878_v36 = vpop.f32.mrf.mxu0 }
 0x6a4   : > { %8694 = vst [vmem:[#allocation34_spill] sm:$0xff] %v7876_v2  ;;  %8695 = vst [vmem:[#allocation35_spill] sm:$0xff] %v7878_v36 }
 0x6a5   : > { %v5878_v28 = vpop.f32.mrf.mxu1  ;;  %v5883_v57 = vpop.f32.mrf.mxu0 }
 0x6a7   : > { %v7882_v13 = vpop.f32.mrf.mxu0 }
 0x6a8   : > { %8696 = vst [vmem:[#allocation36_spill] sm:$0xff] %v7882_v13 }
 0x6a9   : > { %v5884_v51 = vpop.f32.mrf.mxu0 }
 0x6ab   : > { %v7886_v56 = vpop.f32.mrf.mxu0 }
 0x6ac   : > { %v3172_v15 = vsel %vm859_vm2, %v7886_v56, -inf }
 0x6ad   : > { %3173 = vmax.xlane.f32.xlu0 %v3172_v15  ;;  %v5895_v55 = vpop.f32.mrf.mxu0 }
 0x6af   : > { %v7890_v24 = vpop.f32.mrf.mxu0 }
 0x6b0   : > { %v3175_v49 = vsel %vm859_vm2, %v7890_v24, -inf }
 0x6b1   : > { %3176 = vmax.xlane.f32.xlu1 %v3175_v49  ;;  %v5896_v32 = vpop.f32.mrf.mxu0 }
 0x6dd   : > { %v7894_v60 = vpop.f32.mrf.mxu0 }
 0x6de   : > { %v3184_v42 = vsel %vm859_vm2, %v7894_v60, -inf }
 0x6df   : > { %v5907_v29 = vpop.f32.mrf.mxu0 }
 0x6e1   : > { %v7896_v28 = vpop.f32.mrf.mxu0 }
 0x6e2   : > { %v3187_v57 = vsel %vm859_vm2, %v7896_v28, -inf }
 0x6e3   : > { %3188 = vmax.xlane.f32.xlu1 %v3187_v57  ;;  %v7900_v51 = vpop.f32.mrf.mxu1  ;;  %v5908_v15 = vpop.f32.mrf.mxu0 }
 0x6e4   : > { %8697 = vst [vmem:[#allocation37_spill] sm:$0xff] %v7900_v51 }
 0x6e5   : > { %v5889_v55 = vpop.f32.mrf.mxu1  ;;  %v7902_v21 = vpop.f32.mrf.mxu0 }
 0x6e7   : > { %v7904_v63 = vpop.f32.mrf.mxu1  ;;  %v5919_v44 = vpop.f32.mrf.mxu0 }
 0x6e8   : > { %8698 = vst [vmem:[#allocation38_spill] sm:$0xff] %v7904_v63 }
 0x6e9   : > { %v5890_v32 = vpop.f32.mrf.mxu1  ;;  %v7908_v29 = vpop.f32.mrf.mxu0 }
 0x6eb   : > { %v7910_v53 = vpop.f32.mrf.mxu1  ;;  %v5920_v3 = vpop.f32.mrf.mxu0 }
 0x6ec   : > { %v3178_v57 = vsel %vm859_vm2, %v7910_v53, -inf }
 0x6ed   : > { %v7914_v47 = vpop.f32.mrf.mxu0  ;;  %3179 = vmax.xlane.f32.xlu0 %v3178_v57  ;;  %v5901_v15 = vpop.f32.mrf.mxu1 }
 0x6ee   : > { %v3208_v54 = vsel %vm859_vm2, %v7914_v47, -inf }
 0x6ef   : > { %v7916_v55 = vpop.f32.mrf.mxu1  ;;  %v5931_v30 = vpop.f32.mrf.mxu0 }
 0x6f0   : > { %v3181_v44 = vsel %vm859_vm2, %v7916_v55, -inf }
 0x6f1   : > { %v7920_v49 = vpop.f32.mrf.mxu0  ;;  %3182 = vmax.xlane.f32.xlu0 %v3181_v44  ;;  %v5902_v32 = vpop.f32.mrf.mxu1 }
 0x6f3   : > { %v7922_v50 = vpop.f32.mrf.mxu1  ;;  %v5932_v3 = vpop.f32.mrf.mxu0 }
 0x6f4   : > { %v3190_v30 = vsel %vm859_vm2, %v7922_v50, -inf  ;;  %v3196_v3 = vsel %vm859_vm2, %v7902_v21, -inf }
 0x6f5   : > { %3185 = vmax.xlane.f32.xlu0 %v3184_v42  ;;  %v5913_v8 = vpop.f32.mrf.mxu1  ;;  %v3199_v42 = vsel %vm859_vm2, %v7908_v29, -inf }
 0x6f7   : > { %v7926_v57 = vpop.f32.mrf.mxu1 }
 0x6f8   : > { %v3193_v15 = vsel %vm859_vm2, %v7926_v57, -inf }
 0x6f9   : > { %3191 = vmax.xlane.f32.xlu0 %v3190_v30  ;;  %3194 = vmax.xlane.f32.xlu1 %v3193_v15  ;;  %v5914_v44 = vpop.f32.mrf.mxu1 }
 0x6fb   : > { %v7932_v32 = vpop.f32.mrf.mxu1 }
 0x6fc   : > { %v3202_v5 = vsel %vm859_vm2, %v7932_v32, -inf }
 0x6fd   : > { %3197 = vmax.xlane.f32.xlu0 %v3196_v3  ;;  %3200 = vmax.xlane.f32.xlu1 %v3199_v42  ;;  %v5925_v8 = vpop.f32.mrf.mxu1  ;;  %v3211_v3 = vsel %vm859_vm2, %v7920_v49, -inf }
 0x6ff   : > { %v7938_v37 = vpop.f32.mrf.mxu1 }
 0x700   : > { %v3205_v30 = vsel %vm859_vm2, %v7938_v37, -inf }
 0x701   : > { %3203 = vmax.xlane.f32.xlu0 %v3202_v5  ;;  %3206 = vmax.xlane.f32.xlu1 %v3205_v30  ;;  %v5926_v15 = vpop.f32.mrf.mxu1 }
 0x703   : > { %v7944_v44 = vpop.f32.mrf.mxu1 }
 0x704   : > { %v3214_v58 = vsel %vm859_vm2, %v7944_v44, -inf }
 0x705   : > { %3209 = vmax.xlane.f32.xlu0 %v3208_v54  ;;  %3212 = vmax.xlane.f32.xlu1 %v3211_v3  ;;  %v5937_v42 = vpop.f32.mrf.mxu1 }
 0x707   : > { %v7950_v8 = vpop.f32.mrf.mxu1 }
 0x708   : > { %v3217_v15 = vsel %vm859_vm2, %v7950_v8, -inf }
 0x709   : > { %3215 = vmax.xlane.f32.xlu0 %v3214_v58  ;;  %v5938_v5 = vpop.f32.mrf.mxu1 }
 0x716   : > { %3403 = vrot.lane.b32.xlu1 %v7229_v41, %s6824_s16 }
 0x71a   : > { %3450 = vrot.lane.b32.xlu1 %v7239_v7, %s6824_s16 }
 0x71e   : > { %3497 = vrot.lane.b32.xlu1 %v7237_v4, %s6824_s16 }
 0x71f   : > { %3356 = vrot.lane.b32.xlu0 %v7231_v59, %s6824_s16 }
 0x722   : > { %3591 = vrot.lane.b32.xlu1 %v7241_v17, %s6824_s16 }
 0x723   : > { %3544 = vrot.lane.b32.xlu0 %v7243_v20, %s6824_s16 }
 0x727   : > { %3638 = vrot.lane.b32.xlu0 %v7247_v33, %s6824_s16 }
 0x736   : > { %v3174_v54 = vpop.xlane.xlu0 %3173 }
 0x737   : > { %v3220_v58 = vsub.f32 %v7886_v56, %v3174_v54 }
 0x739   : > { %v3236_v30 = vmul.f32 1.442695, %v3220_v58 }
 0x73a   : > { %v3177_v5 = vpop.xlane.xlu1 %3176 }
 0x73b   : > { %6478 = vpow2.f32 %v3236_v30  ;;  %v3221_v51 = vsub.f32 %v7890_v24, %v3177_v5 }
 0x73d   : > { %v3238_v63 = vmul.f32 1.442695, %v3221_v51 }
 0x73f   : > { %6480 = vpow2.f32 %v3238_v63 }
 0x746   : > { %3218 = vmax.xlane.f32.xlu1 %v3217_v15 }
 0x748   : > { %v7971_v3 = vpop.eup %6478 }
 0x749   : > { %v3268_v42 = vsel %vm859_vm2, %v7971_v3, 0.0 }
 0x74a   : > { %3269 = vadd.xlane.f32.xlu0 %v3268_v42 }
 0x74c   : > { %v7978_v58 = vpop.eup %6480 }
 0x74d   : > { %v3271_v42 = vsel %vm859_vm2, %v7978_v58, 0.0 }
 0x757   : > { %3685 = vrot.lane.b32.xlu1 %v7245_v31, %s6824_s16  ;;  %s5191_s16 = scalar_lea.sflag [#allocation4], %s7030_s1 }
 0x76c   : > { %v3189_v56 = vpop.xlane.xlu1 %3188 }
 0x76d   : > { %v3225_v15 = vsub.f32 %v7896_v28, %v3189_v56 }
 0x76f   : > { %v3246_v24 = vmul.f32 1.442695, %v3225_v15 }
 0x776   : > { %v3180_v54 = vpop.xlane.xlu0 %3179 }
 0x777   : > { %v3222_v30 = vsub.f32 %v7910_v53, %v3180_v54 }
 0x779   : > { %v3240_v36 = vmul.f32 1.442695, %v3222_v30 }
 0x77a   : > { %v3183_v13 = vpop.xlane.xlu0 %3182 }
 0x77b   : > { %6482 = vpow2.f32 %v3240_v36  ;;  %v3223_v61 = vsub.f32 %v7916_v55, %v3183_v13  ;;  %3272 = vadd.xlane.f32.xlu1 %v3271_v42 }
 0x77d   : > { %v3242_v51 = vmul.f32 1.442695, %v3223_v61 }
 0x77e   : > { %v3186_v63 = vpop.xlane.xlu0 %3185 }
 0x77f   : > { %6484 = vpow2.f32 %v3242_v51  ;;  %v3224_v5 = vsub.f32 %v7894_v60, %v3186_v63 }
 0x780   : > { %6486 = vpow2.f32 %v3246_v24 }
 0x781   : > { %v3244_v2 = vmul.f32 1.442695, %v3224_v5 }
 0x782   : > { %v3192_v53 = vpop.xlane.xlu0 %3191  ;;  %v3195_v54 = vpop.xlane.xlu1 %3194 }
 0x783   : > { %6488 = vpow2.f32 %v3244_v2  ;;  %v3226_v28 = vsub.f32 %v7922_v50, %v3192_v53  ;;  %v3227_v56 = vsub.f32 %v7926_v57, %v3195_v54 }
 0x785   : > { %v3248_v30 = vmul.f32 1.442695, %v3226_v28  ;;  %v3250_v36 = vmul.f32 1.442695, %v3227_v56 }
 0x786   : > { %v3198_v40 = vpop.xlane.xlu0 %3197  ;;  %v3201_v13 = vpop.xlane.xlu1 %3200 }
 0x787   : > { %6490 = vpow2.f32 %v3248_v30  ;;  %v3228_v61 = vsub.f32 %v7902_v21, %v3198_v40  ;;  %v3229_v55 = vsub.f32 %v7908_v29, %v3201_v13 }
 0x788   : > { %v7990_v15 = vpop.eup %6482  ;;  %6492 = vpow2.f32 %v3250_v36 }
 0x789   : > { %v3252_v60 = vmul.f32 1.442695, %v3228_v61  ;;  %v3254_v42 = vmul.f32 1.442695, %v3229_v55  ;;  %v3274_v2 = vsel %vm859_vm2, %v7990_v15, 0.0 }
 0x78a   : > { %v3204_v50 = vpop.xlane.xlu0 %3203  ;;  %v3207_v24 = vpop.xlane.xlu1 %3206  ;;  %3275 = vadd.xlane.f32.xlu0 %v3274_v2 }
 0x78b   : > { %6494 = vpow2.f32 %v3252_v60  ;;  %v3230_v57 = vsub.f32 %v7932_v32, %v3204_v50  ;;  %v3231_v51 = vsub.f32 %v7938_v37, %v3207_v24 }
 0x78c   : > { %v7996_v63 = vpop.eup %6484  ;;  %6496 = vpow2.f32 %v3254_v42 }
 0x78d   : > { %v3256_v40 = vmul.f32 1.442695, %v3230_v57  ;;  %v3258_v21 = vmul.f32 1.442695, %v3231_v51  ;;  %v3277_v29 = vsel %vm859_vm2, %v7996_v63, 0.0  ;;  %v8000_v5 = vpop.eup %6486 }
 0x78e   : > { %v3210_v53 = vpop.xlane.xlu0 %3209  ;;  %v3213_v54 = vpop.xlane.xlu1 %3212  ;;  %3278 = vadd.xlane.f32.xlu1 %v3277_v29  ;;  %v3283_v13 = vsel %vm859_vm2, %v8000_v5, 0.0 }
 0x78f   : > { %6498 = vpow2.f32 %v3256_v40  ;;  %v3232_v28 = vsub.f32 %v7914_v47, %v3210_v53  ;;  %v3233_v32 = vsub.f32 %v7920_v49, %v3213_v54 }
 0x790   : > { %v8004_v56 = vpop.eup %6488  ;;  %6500 = vpow2.f32 %v3258_v21 }
 0x791   : > { %v3260_v37 = vmul.f32 1.442695, %v3232_v28  ;;  %v3262_v30 = vmul.f32 1.442695, %v3233_v32  ;;  %v3280_v36 = vsel %vm859_vm2, %v8004_v56, 0.0 }
 0x792   : > { %v3404_v61 = vpop.permute.xlu1 %3403  ;;  %3281 = vadd.xlane.f32.xlu0 %v3280_v36  ;;  %v3216_v55 = vpop.xlane.xlu0 %3215  ;;  %3284 = vadd.xlane.f32.xlu1 %v3283_v13 }
 0x793   : > { %6502 = vpow2.f32 %v3260_v37  ;;  %v3234_v47 = vsub.f32 %v7944_v44, %v3216_v55  ;;  %5946 = vmatpush3.bf16.msra.mxu1 %v3404_v61 }
 0x794   : > { %v8011_v49 = vpop.eup %6490  ;;  %6504 = vpow2.f32 %v3262_v30  ;;  %5957 = vmatprep.subr.bf16.mxu1 %v8691_v6 }
 0x795   : > { %v8014_v60 = vpop.eup %6492  ;;  %v3264_v42 = vmul.f32 1.442695, %v3234_v47  ;;  %v3286_v2 = vsel %vm859_vm2, %v8011_v49, 0.0 }
 0x796   : > { %3287 = vadd.xlane.f32.xlu0 %v3286_v2  ;;  %v3357_v50 = vpop.permute.xlu0 %3356  ;;  %v3289_v24 = vsel %vm859_vm2, %v8014_v60, 0.0  ;;  %v3451_v61 = vpop.permute.xlu1 %3450 }
 0x797   : > { %6506 = vpow2.f32 %v3264_v42  ;;  %3290 = vadd.xlane.f32.xlu1 %v3289_v24  ;;  %5940 = vmatpush3.bf16.msra.mxu0 %v3357_v50 }
 0x798   : > { %v8020_v44 = vpop.eup %6494  ;;  %5951 = vmatprep.subr.bf16.mxu0 %v8691_v6 }
 0x799   : > { %v8023_v57 = vpop.eup %6496  ;;  %v3292_v51 = vsel %vm859_vm2, %v8020_v44, 0.0 }
 0x79a   : > { %3293 = vadd.xlane.f32.xlu0 %v3292_v51  ;;  %v3295_v40 = vsel %vm859_vm2, %v8023_v57, 0.0  ;;  %v8057_v55 = vpop.permute.xlu1 %3497 }
 0x79b   : > { %3296 = vadd.xlane.f32.xlu1 %v3295_v40 }
 0x79c   : > { %v8029_v21 = vpop.eup %6498 }
 0x79d   : > { %v8031_v29 = vpop.eup %6500  ;;  %v3298_v53 = vsel %vm859_vm2, %v8029_v21, 0.0 }
 0x79e   : > { %3299 = vadd.xlane.f32.xlu0 %v3298_v53  ;;  %v3301_v54 = vsel %vm859_vm2, %v8031_v29, 0.0  ;;  %v8061_v47 = vpop.permute.xlu1 %3591 }
 0x79f   : > { %3302 = vadd.xlane.f32.xlu1 %v3301_v54 }
 0x7a0   : > { %v8037_v28 = vpop.eup %6502 }
 0x7a1   : > { %v8039_v32 = vpop.eup %6504  ;;  %v3304_v37 = vsel %vm859_vm2, %v8037_v28, 0.0 }
 0x7a2   : > { %3305 = vadd.xlane.f32.xlu0 %v3304_v37  ;;  %v3307_v30 = vsel %vm859_vm2, %v8039_v32, 0.0 }
 0x7a3   : > { %3308 = vadd.xlane.f32.xlu1 %v3307_v30 }
 0x7a4   : > { %v8045_v36 = vpop.eup %6506 }
 0x7a5   : > { %v3310_v13 = vsel %vm859_vm2, %v8045_v36, 0.0 }
 0x7a6   : > { %3311 = vadd.xlane.f32.xlu0 %v3310_v13 }
 0x7b4   : > { %3785 = vrot.lane.b32.xlu1 %v7123_v62, %s6825_s24 }
 0x7bc   : > { %3734 = vrot.lane.b32.xlu0 %v7111_v52, %s6825_s24 }
 0x7c0   : > { %3732 = vrot.lane.b32.xlu0 %v7125_v0, %s6825_s24 }
 0x7c4   : > { %3783 = vrot.lane.b32.xlu0 %v7138_v11, %s6825_s24 }
 0x7c8   : > { %3834 = vrot.lane.b32.xlu0 %v7160_v26, %s6825_s24 }
 0x7cc   : > { %3885 = vrot.lane.b32.xlu0 %v7188_v38, %s6825_s24  ;;  %v8078_v38 = vpop.permute.xlu0 %3544 }
 0x7cf   : > { %v3219_v62 = vpop.xlane.xlu1 %3218 }
 0x7d0   : > { %v3235_v52 = vsub.f32 %v7950_v8, %v3219_v62  ;;  %3936 = vrot.lane.b32.xlu0 %v7158_v25, %s6825_s24  ;;  %v8082_v25 = vpop.permute.xlu0 %3638 }
 0x7d2   : > { %v3266_v0 = vmul.f32 1.442695, %v3235_v52 }
 0x7d4   : > { %6508 = vpow2.f32 %v3266_v0  ;;  %3987 = vrot.lane.b32.xlu0 %v7207_v46, %s6825_s24  ;;  %v8086_v46 = vpop.permute.xlu1 %3685 }
 0x7d8   : > { %4038 = vrot.lane.b32.xlu0 %v7186_v35, %s6825_s24  ;;  %v3270_v35 = vpop.xlane.xlu0 %3269 }
 0x7d9   : > { %6510 = vrcp.f32 %v3270_v35 }
 0x7e1   : > { %v8072_v11 = vpop.eup %6508 }
 0x7e2   : > { %v3313_v26 = vsel %vm859_vm2, %v8072_v11, 0.0 }
 0x7e3   : > { %3314 = vadd.xlane.f32.xlu1 %v3313_v26 }
 0x7f4   : > { %3836 = vrot.lane.b32.xlu1 %v7136_v9, %s6825_s24 }
 0x7f8   : > { %3887 = vrot.lane.b32.xlu1 %v7156_v23, %s6825_s24  ;;  %v6511_v23 = vpop.eup %6510 }
 0x7f9   : > { %v3332_v42 = vmul.f32 %v6511_v23, %v7971_v3 }
 0x7fc   : > { %3938 = vrot.lane.b32.xlu1 %v7140_v12, %s6825_s24 }
 0x800   : > { %3989 = vrot.lane.b32.xlu1 %v7184_v34, %s6825_s24 }
 0x804   : > { %4040 = vrot.lane.b32.xlu1 %v7162_v27, %s6825_s24  ;;  %v3273_v9 = vpop.xlane.xlu1 %3272 }
 0x805   : > { %6512 = vrcp.f32 %v3273_v9 }
 0x808   : > { %4091 = vrot.lane.b32.xlu1 %v7205_v45, %s6825_s24 }
 0x80c   : > { %4089 = vrot.lane.b32.xlu1 %v7220_v48, %s6825_s24 }
 0x812   : > { %v6513_v12 = vpop.eup %6512 }
 0x813   : > { %v3276_v8 = vpop.xlane.xlu0 %3275  ;;  %v3333_v2 = vmul.f32 %v6513_v12, %v7978_v58 }
 0x814   : > { %6514 = vrcp.f32 %v3276_v8 }
 0x815   : > { %v3348_v34 = vpack.c.bf16 %v3333_v2, %v3332_v42 }
 0x817   : > { %5942 = vmatmul.mubr.msk.bf16.vlgmr.msra.gmra.mxu0 %vm859_vm2, %v3348_v34  ;;  %v3279_v27 = vpop.xlane.xlu1 %3278 }
 0x818   : > { %5952 = vmatpush3.bf16.msra.mxu0 %v3451_v61  ;;  %6516 = vrcp.f32 %v3279_v27  ;;  %5953 = vmatprep.mubr.msk.bf16.mxu0 %vm6822_vm1, %v8691_v6 }
 0x819   : > { %5963 = vmatprep.subr.bf16.mxu0 %v8691_v6 }
 0x81b   : > { %v3282_v45 = vpop.xlane.xlu0 %3281  ;;  %v3285_v48 = vpop.xlane.xlu1 %3284 }
 0x81c   : > { %6518 = vrcp.f32 %v3282_v45 }
 0x81d   : > { %6520 = vrcp.f32 %v3285_v48 }
 0x81f   : > { %v3288_v50 = vpop.xlane.xlu0 %3287 }
 0x820   : > { %6522 = vrcp.f32 %v3288_v50  ;;  %v3291_v3 = vpop.xlane.xlu1 %3290 }
 0x821   : > { %6524 = vrcp.f32 %v3291_v3  ;;  %v6515_v58 = vpop.eup %6514 }
 0x822   : > { %v3334_v53 = vmul.f32 %v6515_v58, %v7990_v15 }
 0x823   : > { %v3294_v24 = vpop.xlane.xlu0 %3293 }
 0x824   : > { %6526 = vrcp.f32 %v3294_v24  ;;  %v3297_v51 = vpop.xlane.xlu1 %3296 }
 0x825   : > { %v6517_v40 = vpop.eup %6516  ;;  %6528 = vrcp.f32 %v3297_v51 }
 0x826   : > { %v3335_v54 = vmul.f32 %v6517_v40, %v7996_v63 }
 0x827   : > { %v3300_v37 = vpop.xlane.xlu0 %3299 }
 0x828   : > { %v3349_v30 = vpack.c.bf16 %v3335_v54, %v3334_v53  ;;  %6530 = vrcp.f32 %v3300_v37  ;;  %v3303_v13 = vpop.xlane.xlu1 %3302 }
 0x829   : > { %v6519_v61 = vpop.eup %6518  ;;  %6532 = vrcp.f32 %v3303_v13 }
 0x82a   : > { %v6521_v62 = vpop.eup %6520  ;;  %5948 = vmatmul.mubr.msk.bf16.vlgmr.msra.gmra.mxu1 %vm859_vm2, %v3349_v30  ;;  %v3336_v52 = vmul.f32 %v6519_v61, %v8004_v56 }
 0x82b   : > { %5958 = vmatpush3.bf16.msra.mxu1 %v8057_v55  ;;  %v3306_v0 = vpop.xlane.xlu0 %3305  ;;  %v3337_v26 = vmul.f32 %v6521_v62, %v8000_v5  ;;  %5959 = vmatprep.mubr.msk.bf16.mxu1 %vm6822_vm1, %v8691_v6 }
 0x82c   : > { %6534 = vrcp.f32 %v3306_v0  ;;  %v3309_v15 = vpop.xlane.xlu1 %3308  ;;  %5969 = vmatprep.subr.bf16.mxu1 %v8691_v6 }
 0x82d   : > { %v6523_v63 = vpop.eup %6522  ;;  %6536 = vrcp.f32 %v3309_v15  ;;  %v3350_v35 = vpack.c.bf16 %v3337_v26, %v3336_v52 }
 0x82e   : > { %v6525_v9 = vpop.eup %6524  ;;  %v3338_v23 = vmul.f32 %v6523_v63, %v8011_v49 }
 0x82f   : > { %v3339_v56 = vmul.f32 %v6525_v9, %v8014_v60  ;;  %5954 = vmatmul.mubr.msk.bf16.vlgmr.msra.gmra.mxu0 %vm859_vm2, %v3350_v35  ;;  %v3312_v34 = vpop.xlane.xlu0 %3311 }
 0x830   : > { %5964 = vmatpush3.bf16.msra.mxu0 %v8078_v38  ;;  %5965 = vmatprep.mubr.msk.bf16.mxu0 %vm6822_vm1, %v8691_v6  ;;  %6538 = vrcp.f32 %v3312_v34 }
 0x831   : > { %v6527_v5 = vpop.eup %6526  ;;  %v3351_v55 = vpack.c.bf16 %v3339_v56, %v3338_v23  ;;  %5975 = vmatprep.subr.bf16.mxu0 %v8691_v6 }
 0x832   : > { %v6529_v12 = vpop.eup %6528  ;;  %v3340_v8 = vmul.f32 %v6527_v5, %v8020_v44 }
 0x833   : > { %5960 = vmatmul.mubr.msk.bf16.vlgmr.msra.gmra.mxu1 %vm859_vm2, %v3351_v55  ;;  %v3341_v49 = vmul.f32 %v6529_v12, %v8023_v57  ;;  %v3735_v48 = vpop.permute.xlu0 %3734 }
 0x834   : > { %5970 = vmatpush3.bf16.msra.mxu1 %v8061_v47  ;;  %5971 = vmatprep.mubr.msk.bf16.mxu1 %vm6822_vm1, %v8691_v6 }
 0x835   : > { %v6531_v60 = vpop.eup %6530  ;;  %v3352_v38 = vpack.c.bf16 %v3341_v49, %v3340_v8  ;;  %5981 = vmatprep.subr.bf16.mxu1 %v8691_v6 }
 0x836   : > { %v6533_v42 = vpop.eup %6532  ;;  %v3342_v2 = vmul.f32 %v6531_v60, %v8029_v21 }
 0x837   : > { %v3343_v27 = vmul.f32 %v6533_v42, %v8031_v29  ;;  %5966 = vmatmul.mubr.msk.bf16.vlgmr.msra.gmra.mxu0 %vm859_vm2, %v3352_v38 }
 0x838   : > { %5976 = vmatpush3.bf16.msra.mxu0 %v8082_v25  ;;  %5977 = vmatprep.mubr.msk.bf16.mxu0 %vm6822_vm1, %v8691_v6  ;;  %v3740_v25 = vsel %vm859_vm2, %v3735_v48, 0 }
 0x839   : > { %v6535_v44 = vpop.eup %6534  ;;  %v3353_v57 = vpack.c.bf16 %v3343_v27, %v3342_v2  ;;  %5987 = vmatprep.subr.bf16.mxu0 %v8691_v6 }
 0x83a   : > { %v6537_v47 = vpop.eup %6536  ;;  %v3344_v45 = vmul.f32 %v6535_v44, %v8037_v28  ;;  %v3733_v28 = vpop.permute.xlu0 %3732 }
 0x83b   : > { %5972 = vmatmul.mubr.msk.bf16.vlgmr.msra.gmra.mxu1 %vm859_vm2, %v3353_v57  ;;  %v3345_v21 = vmul.f32 %v6537_v47, %v8039_v32  ;;  %v3786_v32 = vpop.permute.xlu1 %3785 }
 0x83c   : > { %5982 = vmatpush3.bf16.msra.mxu1 %v8086_v46  ;;  %5983 = vmatprep.mubr.msk.bf16.mxu1 %vm6822_vm1, %v8691_v6  ;;  %v3791_v26 = vsel %vm859_vm2, %v3786_v32, 0 }
 0x83d   : > { %v3354_v29 = vpack.c.bf16 %v3345_v21, %v3344_v45  ;;  %5993 = vmatprep.subr.bf16.mxu1 %v8691_v6  ;;  %v6539_v53 = vpop.eup %6538 }
 0x83e   : > { %v3784_v46 = vpop.permute.xlu0 %3783  ;;  %v3346_v13 = vmul.f32 %v6539_v53, %v8045_v36 }
 0x83f   : > { %5978 = vmatmul.mubr.msk.bf16.vlgmr.msra.gmra.mxu0 %vm859_vm2, %v3354_v29 }
 0x840   : > { %5988 = vmatpush3.bf16.xpose.msra.mxu0 %v3740_v25  ;;  %5989 = vmatprep.mubr.msk.bf16.mxu0 %vm6822_vm1, %v8691_v6 }
 0x841   : > { %5999 = vmatprep.subr.bf16.mxu0 %v8691_v6 }
 0x842   : > { %v3835_v3 = vpop.permute.xlu0 %3834 }
 0x846   : > { %v3886_v40 = vpop.permute.xlu0 %3885 }
 0x847   : > { %5990 = vmatmul.mubr.msk.bf16.vlgmr.msra.gmra.mxu0 %vm859_vm2, %v3733_v28 }
 0x848   : > { %6001 = vmatprep.mubr.msk.bf16.mxu0 %vm6822_vm1, %v8691_v6 }
 0x84a   : > { %v3937_v62 = vpop.permute.xlu0 %3936 }
 0x84e   : > { %v3988_v36 = vpop.permute.xlu0 %3987 }
 0x852   : > { %v4039_v35 = vpop.permute.xlu0 %4038 }
 0x86c   : > { %v3315_v50 = vpop.xlane.xlu1 %3314 }
 0x86d   : > { %6540 = vrcp.f32 %v3315_v50 }
 0x870   : > { %v3837_v58 = vpop.permute.xlu1 %3836 }
 0x871   : > { %v3842_v24 = vsel %vm859_vm2, %v3837_v58, 0 }
 0x872   : > { %6000 = vmatpush3.bf16.xpose.msra.mxu0 %v3842_v24 }
 0x873   : > { %6011 = vmatprep.subr.bf16.mxu0 %v8691_v6 }
 0x874   : > { %v3888_v51 = vpop.permute.xlu1 %3887 }
 0x878   : > { %v3939_v54 = vpop.permute.xlu1 %3938 }
 0x879   : > { %v3944_v37 = vsel %vm859_vm2, %v3939_v54, 0  ;;  %6002 = vmatmul.mubr.msk.bf16.vlgmr.msra.gmra.mxu0 %vm859_vm2, %v3835_v3 }
 0x87a   : > { %v6541_v30 = vpop.eup %6540  ;;  %6012 = vmatpush3.bf16.xpose.msra.mxu0 %v3944_v37  ;;  %6013 = vmatprep.mubr.msk.bf16.mxu0 %vm6822_vm1, %v8691_v6 }
 0x87b   : > { %v3347_v61 = vmul.f32 %v6541_v30, %v8072_v11  ;;  %6023 = vmatprep.subr.bf16.mxu0 %v8691_v6  ;;  %v3893_v11 = vsel %vm859_vm2, %v3888_v51, 0 }
 0x87c   : > { %v3990_v52 = vpop.permute.xlu1 %3989 }
 0x87d   : > { %v3355_v0 = vpack.c.bf16 %v3347_v61, %v3346_v13  ;;  %v3995_v9 = vsel %vm859_vm2, %v3990_v52, 0 }
 0x87f   : > { %5984 = vmatmul.mubr.msk.bf16.vlgmr.msra.gmra.mxu1 %vm859_vm2, %v3355_v0 }
 0x880   : > { %5994 = vmatpush3.bf16.xpose.msra.mxu1 %v3791_v26  ;;  %v4041_v15 = vpop.permute.xlu1 %4040  ;;  %5995 = vmatprep.mubr.msk.bf16.mxu1 %vm6822_vm1, %v8691_v6 }
 0x881   : > { %v4046_v63 = vsel %vm859_vm2, %v4041_v15, 0  ;;  %6014 = vmatmul.mubr.msk.bf16.vlgmr.msra.gmra.mxu0 %vm859_vm2, %v3937_v62  ;;  %6005 = vmatprep.subr.bf16.mxu1 %v8691_v6 }
 0x882   : > { %6024 = vmatpush3.bf16.xpose.msra.mxu0 %v4046_v63  ;;  %6025 = vmatprep.mubr.msk.bf16.mxu0 %vm6822_vm1, %v8691_v6 }
 0x883   : > { %6035 = vmatprep.subr.bf16.mxu0 %v8691_v6 }
 0x884   : > { %v4092_v23 = vpop.permute.xlu1 %4091 }
 0x885   : > { %v4097_v56 = vsel %vm859_vm2, %v4092_v23, 0 }
 0x887   : > { %5996 = vmatmul.mubr.msk.bf16.vlgmr.msra.gmra.mxu1 %vm859_vm2, %v3784_v46 }
 0x888   : > { %6006 = vmatpush3.bf16.xpose.msra.mxu1 %v3893_v11  ;;  %6007 = vmatprep.mubr.msk.bf16.mxu1 %vm6822_vm1, %v8691_v6  ;;  %v4090_v5 = vpop.permute.xlu1 %4089 }
 0x889   : > { %6026 = vmatmul.mubr.msk.bf16.vlgmr.msra.gmra.mxu0 %vm859_vm2, %v4039_v35  ;;  %6017 = vmatprep.subr.bf16.mxu1 %v8691_v6 }
 0x88a   : > { %6037 = vmatprep.mubr.msk.bf16.mxu0 %vm6822_vm1, %v8691_v6 }
 0x88f   : > { %6008 = vmatmul.mubr.msk.bf16.vlgmr.msra.gmra.mxu1 %vm859_vm2, %v3886_v40 }
 0x890   : > { %6018 = vmatpush3.bf16.xpose.msra.mxu1 %v3995_v9  ;;  %6019 = vmatprep.mubr.msk.bf16.mxu1 %vm6822_vm1, %v8691_v6 }
 0x891   : > { %6029 = vmatprep.subr.bf16.mxu1 %v8691_v6 }
 0x897   : > { %6020 = vmatmul.mubr.msk.bf16.vlgmr.msra.gmra.mxu1 %vm859_vm2, %v3988_v36 }
 0x898   : > { %6030 = vmatpush3.bf16.xpose.msra.mxu1 %v4097_v56  ;;  %6031 = vmatprep.mubr.msk.bf16.mxu1 %vm6822_vm1, %v8691_v6 }
 0x899   : > { %6041 = vmatprep.subr.bf16.mxu1 %v8691_v6 }
 0x89f   : > { %6032 = vmatmul.mubr.msk.bf16.vlgmr.msra.gmra.mxu1 %vm859_vm2, %v4090_v5 }
 0x8a0   : > { %6043 = vmatprep.mubr.msk.bf16.mxu1 %vm6822_vm1, %v8691_v6 }
 0x8d7   : > { %v8187_v55 = vpop.f32.mrf.mxu0 }
 0x8d9   : > { %v5943_v12 = vpop.f32.mrf.mxu0 }
 0x8db   : > { %v8189_v8 = vpop.f32.mrf.mxu0 }
 0x8dc   : > { %v6224_v49 = vpack.i.bf16 %v8189_v8, %v8187_v55 }
 0x8dd   : > { %v5944_v60 = vpop.f32.mrf.mxu0 }
 0x8ea   : > { %v8193_v38 = vpop.f32.mrf.mxu1 }
 0x8ec   : > { %v5949_v42 = vpop.f32.mrf.mxu1 }
 0x8ee   : > { %v8195_v2 = vpop.f32.mrf.mxu1 }
 0x8ef   : > { %v6229_v34 = vpack.i.bf16 %v8195_v2, %v8193_v38  ;;  %v8199_v27 = vpop.f32.mrf.mxu0 }
 0x8f0   : > { %v5950_v44 = vpop.f32.mrf.mxu1 }
 0x8f1   : > { %v5955_v57 = vpop.f32.mrf.mxu0 }
 0x8f3   : > { %v8201_v47 = vpop.f32.mrf.mxu0  ;;  %v8203_v45 = vpop.f32.mrf.mxu1 }
 0x8f4   : > { %v6244_v21 = vpack.i.bf16 %v8201_v47, %v8199_v27 }
 0x8f5   : > { %v5956_v48 = vpop.f32.mrf.mxu0  ;;  %v5961_v29 = vpop.f32.mrf.mxu1 }
 0x8f7   : > { %v8207_v25 = vpop.f32.mrf.mxu1  ;;  %v8209_v28 = vpop.f32.mrf.mxu0 }
 0x8f8   : > { %v6249_v32 = vpack.i.bf16 %v8207_v25, %v8203_v45 }
 0x8f9   : > { %v5962_v46 = vpop.f32.mrf.mxu1  ;;  %v5967_v50 = vpop.f32.mrf.mxu0 }
 0x8fb   : > { %v8213_v3 = vpop.f32.mrf.mxu0  ;;  %v8215_v58 = vpop.f32.mrf.mxu1 }
 0x8fc   : > { %v6269_v24 = vpack.i.bf16 %v8213_v3, %v8209_v28 }
 0x8fd   : > { %v5968_v51 = vpop.f32.mrf.mxu0  ;;  %v5973_v40 = vpop.f32.mrf.mxu1 }
 0x8ff   : > { %v8219_v53 = vpop.f32.mrf.mxu1  ;;  %v8221_v54 = vpop.f32.mrf.mxu0 }
 0x900   : > { %v8708_v28 = vpack.i.bf16 %v8219_v53, %v8215_v58  ;;  %v8712_v53 = vld [vmem:[#allocation38_spill] sm:$0xff] }
 0x901   : > { %v5974_v30 = vpop.f32.mrf.mxu1  ;;  %v5979_v13 = vpop.f32.mrf.mxu0 }
 0x903   : > { %v8225_v61 = vpop.f32.mrf.mxu0 }
 0x905   : > { %v5980_v52 = vpop.f32.mrf.mxu0 }
 0x907   : > { %v8229_v0 = vpop.f32.mrf.mxu0 }
 0x908   : > { %v4140_v26 = vsel %vm859_vm2, %v8229_v0, -inf }
 0x909   : > { %4141 = vmax.xlane.f32.xlu0 %v4140_v26  ;;  %v5991_v15 = vpop.f32.mrf.mxu0 }
 0x90b   : > { %v8233_v63 = vpop.f32.mrf.mxu0 }
 0x90c   : > { %v4143_v36 = vsel %vm859_vm2, %v8233_v63, -inf }
 0x90d   : > { %4144 = vmax.xlane.f32.xlu1 %v4143_v36  ;;  %v5992_v11 = vpop.f32.mrf.mxu0 }
 0x939   : > { %v8237_v35 = vpop.f32.mrf.mxu0 }
 0x93b   : > { %v6003_v9 = vpop.f32.mrf.mxu0 }
 0x93d   : > { %v8239_v23 = vpop.f32.mrf.mxu0 }
 0x93e   : > { %v4155_v56 = vsel %vm859_vm2, %v8239_v23, -inf }
 0x93f   : > { %4156 = vmax.xlane.f32.xlu1 %v4155_v56  ;;  %v8243_v5 = vpop.f32.mrf.mxu1  ;;  %v6004_v12 = vpop.f32.mrf.mxu0 }
 0x940   : > { %v4152_v12 = vsel %vm859_vm2, %v8237_v35, -inf }
 0x941   : > { %v5985_v60 = vpop.f32.mrf.mxu1  ;;  %v8245_v42 = vpop.f32.mrf.mxu0 }
 0x943   : > { %v8247_v44 = vpop.f32.mrf.mxu1  ;;  %v6015_v57 = vpop.f32.mrf.mxu0 }
 0x945   : > { %v5986_v29 = vpop.f32.mrf.mxu1  ;;  %v8251_v46 = vpop.f32.mrf.mxu0 }
 0x947   : > { %v8253_v50 = vpop.f32.mrf.mxu1  ;;  %v6016_v51 = vpop.f32.mrf.mxu0 }
 0x948   : > { %v4146_v40 = vsel %vm859_vm2, %v8253_v50, -inf }
 0x949   : > { %v8257_v30 = vpop.f32.mrf.mxu0  ;;  %4147 = vmax.xlane.f32.xlu0 %v4146_v40  ;;  %v5997_v13 = vpop.f32.mrf.mxu1 }
 0x94b   : > { %v8259_v52 = vpop.f32.mrf.mxu1  ;;  %v6027_v26 = vpop.f32.mrf.mxu0 }
 0x94c   : > { %v4149_v15 = vsel %vm859_vm2, %v8259_v52, -inf  ;;  %v4164_v26 = vsel %vm859_vm2, %v8245_v42, -inf }
 0x94d   : > { %v8263_v36 = vpop.f32.mrf.mxu0  ;;  %4150 = vmax.xlane.f32.xlu0 %v4149_v15  ;;  %v5998_v11 = vpop.f32.mrf.mxu1  ;;  %v4167_v15 = vsel %vm859_vm2, %v8251_v46, -inf }
 0x94f   : > { %v8265_v9 = vpop.f32.mrf.mxu1  ;;  %v6028_v56 = vpop.f32.mrf.mxu0 }
 0x950   : > { %v4158_v29 = vsel %vm859_vm2, %v8265_v9, -inf }
 0x951   : > { %4153 = vmax.xlane.f32.xlu0 %v4152_v12  ;;  %v6009_v60 = vpop.f32.mrf.mxu1 }
 0x953   : > { %v8269_v57 = vpop.f32.mrf.mxu1 }
 0x954   : > { %v4161_v51 = vsel %vm859_vm2, %v8269_v57, -inf }
 0x955   : > { %4159 = vmax.xlane.f32.xlu0 %v4158_v29  ;;  %4162 = vmax.xlane.f32.xlu1 %v4161_v51  ;;  %v6010_v40 = vpop.f32.mrf.mxu1 }
 0x956   : > { %v4176_v40 = vsel %vm859_vm2, %v8257_v30, -inf }
 0x957   : > { %v8275_v13 = vpop.f32.mrf.mxu1 }
 0x958   : > { %v4170_v12 = vsel %vm859_vm2, %v8275_v13, -inf }
 0x959   : > { %4165 = vmax.xlane.f32.xlu0 %v4164_v26  ;;  %4168 = vmax.xlane.f32.xlu1 %v4167_v15  ;;  %v6021_v11 = vpop.f32.mrf.mxu1  ;;  %v4179_v26 = vsel %vm859_vm2, %v8263_v36, -inf }
 0x95b   : > { %v8281_v56 = vpop.f32.mrf.mxu1 }
 0x95c   : > { %v4173_v60 = vsel %vm859_vm2, %v8281_v56, -inf }
 0x95d   : > { %4171 = vmax.xlane.f32.xlu0 %v4170_v12  ;;  %4174 = vmax.xlane.f32.xlu1 %v4173_v60  ;;  %v6022_v29 = vpop.f32.mrf.mxu1 }
 0x95f   : > { %v8287_v51 = vpop.f32.mrf.mxu1 }
 0x960   : > { %v4182_v48 = vsel %vm859_vm2, %v8287_v51, -inf }
 0x961   : > { %4177 = vmax.xlane.f32.xlu0 %v4176_v40  ;;  %4180 = vmax.xlane.f32.xlu1 %v4179_v26  ;;  %v6033_v15 = vpop.f32.mrf.mxu1 }
 0x963   : > { %v8293_v11 = vpop.f32.mrf.mxu1 }
 0x965   : > { %4183 = vmax.xlane.f32.xlu0 %v4182_v48  ;;  %v6034_v12 = vpop.f32.mrf.mxu1 }
 0x972   : > { %4371 = vrot.lane.b32.xlu1 %v7229_v41, %s6825_s24  ;;  %v4185_v41 = vsel %vm859_vm2, %v8293_v11, -inf }
 0x976   : > { %4418 = vrot.lane.b32.xlu1 %v7239_v7, %s6825_s24 }
 0x97a   : > { %4465 = vrot.lane.b32.xlu1 %v7237_v4, %s6825_s24 }
 0x97b   : > { %4324 = vrot.lane.b32.xlu0 %v7231_v59, %s6825_s24 }
 0x97f   : > { %4512 = vrot.lane.b32.xlu0 %v7243_v20, %s6825_s24 }
 0x992   : > { %v4142_v60 = vpop.xlane.xlu0 %4141 }
 0x993   : > { %v4188_v29 = vsub.f32 %v8229_v0, %v4142_v60 }
 0x995   : > { %v4204_v48 = vmul.f32 1.442695, %v4188_v29 }
 0x996   : > { %v4145_v59 = vpop.xlane.xlu1 %4144 }
 0x997   : > { %6542 = vpow2.f32 %v4204_v48  ;;  %v4189_v7 = vsub.f32 %v8233_v63, %v4145_v59 }
 0x999   : > { %v4206_v20 = vmul.f32 1.442695, %v4189_v7 }
 0x99b   : > { %6544 = vpow2.f32 %v4206_v20 }
 0x99e   : > { %4186 = vmax.xlane.f32.xlu1 %v4185_v41 }
 0x9a4   : > { %v8310_v40 = vpop.eup %6542 }
 0x9a5   : > { %v4236_v4 = vsel %vm859_vm2, %v8310_v40, 0.0 }
 0x9a6   : > { %4237 = vadd.xlane.f32.xlu0 %v4236_v4 }
 0x9a8   : > { %v8317_v0 = vpop.eup %6544 }
 0x9a9   : > { %v4239_v12 = vsel %vm859_vm2, %v8317_v0, 0.0 }
 0x9af   : > { %4559 = vrot.lane.b32.xlu1 %v7241_v17, %s6825_s24 }
 0x9c8   : > { %v4157_v26 = vpop.xlane.xlu1 %4156 }
 0x9c9   : > { %v4193_v29 = vsub.f32 %v8239_v23, %v4157_v26 }
 0x9cb   : > { %v4214_v63 = vmul.f32 1.442695, %v4193_v29 }
 0x9d2   : > { %v4148_v15 = vpop.xlane.xlu0 %4147 }
 0x9d3   : > { %v4190_v60 = vsub.f32 %v8253_v50, %v4148_v15  ;;  %4240 = vadd.xlane.f32.xlu1 %v4239_v12 }
 0x9d5   : > { %v4208_v48 = vmul.f32 1.442695, %v4190_v60 }
 0x9d6   : > { %v4151_v41 = vpop.xlane.xlu0 %4150 }
 0x9d7   : > { %6546 = vpow2.f32 %v4208_v48  ;;  %v4191_v17 = vsub.f32 %v8259_v52, %v4151_v41 }
 0x9d9   : > { %v4210_v4 = vmul.f32 1.442695, %v4191_v17 }
 0x9da   : > { %v4154_v59 = vpop.xlane.xlu0 %4153 }
 0x9db   : > { %6548 = vpow2.f32 %v4210_v4  ;;  %v4192_v7 = vsub.f32 %v8237_v35, %v4154_v59 }
 0x9dc   : > { %6550 = vpow2.f32 %v4214_v63 }
 0x9dd   : > { %v4212_v20 = vmul.f32 1.442695, %v4192_v7 }
 0x9de   : > { %v4160_v62 = vpop.xlane.xlu0 %4159  ;;  %v4163_v37 = vpop.xlane.xlu1 %4162 }
 0x9df   : > { %6552 = vpow2.f32 %v4212_v20  ;;  %v4194_v50 = vsub.f32 %v8265_v9, %v4160_v62  ;;  %v4195_v23 = vsub.f32 %v8269_v57, %v4163_v37 }
 0x9e1   : > { %v4216_v26 = vmul.f32 1.442695, %v4194_v50  ;;  %v4218_v15 = vmul.f32 1.442695, %v4195_v23 }
 0x9e2   : > { %v4166_v12 = vpop.xlane.xlu0 %4165  ;;  %v4169_v60 = vpop.xlane.xlu1 %4168 }
 0x9e3   : > { %6554 = vpow2.f32 %v4216_v26  ;;  %v4196_v52 = vsub.f32 %v8245_v42, %v4166_v12  ;;  %v4197_v29 = vsub.f32 %v8251_v46, %v4169_v60 }
 0x9e4   : > { %v8329_v48 = vpop.eup %6546  ;;  %6556 = vpow2.f32 %v4218_v15 }
 0x9e5   : > { %v4220_v35 = vmul.f32 1.442695, %v4196_v52  ;;  %v4222_v41 = vmul.f32 1.442695, %v4197_v29  ;;  %v4242_v17 = vsel %vm859_vm2, %v8329_v48, 0.0 }
 0x9e6   : > { %v4172_v62 = vpop.xlane.xlu0 %4171  ;;  %v4175_v9 = vpop.xlane.xlu1 %4174  ;;  %4243 = vadd.xlane.f32.xlu0 %v4242_v17 }
 0x9e7   : > { %6558 = vpow2.f32 %v4220_v35  ;;  %v4198_v37 = vsub.f32 %v8275_v13, %v4172_v62  ;;  %v4199_v57 = vsub.f32 %v8281_v56, %v4175_v9 }
 0x9e8   : > { %v8335_v63 = vpop.eup %6548  ;;  %6560 = vpow2.f32 %v4222_v41 }
 0x9e9   : > { %v4224_v42 = vmul.f32 1.442695, %v4198_v37  ;;  %v4226_v46 = vmul.f32 1.442695, %v4199_v57  ;;  %v4245_v4 = vsel %vm859_vm2, %v8335_v63, 0.0  ;;  %v8339_v59 = vpop.eup %6550 }
 0x9ea   : > { %v4178_v7 = vpop.xlane.xlu0 %4177  ;;  %v4181_v20 = vpop.xlane.xlu1 %4180  ;;  %4246 = vadd.xlane.f32.xlu1 %v4245_v4  ;;  %v4251_v12 = vsel %vm859_vm2, %v8339_v59, 0.0 }
 0x9eb   : > { %6562 = vpow2.f32 %v4224_v42  ;;  %v4200_v50 = vsub.f32 %v8257_v30, %v4178_v7  ;;  %v4201_v13 = vsub.f32 %v8263_v36, %v4181_v20 }
 0x9ec   : > { %v8343_v23 = vpop.eup %6552  ;;  %6564 = vpow2.f32 %v4226_v46 }
 0x9ed   : > { %v4228_v56 = vmul.f32 1.442695, %v4200_v50  ;;  %v4230_v26 = vmul.f32 1.442695, %v4201_v13  ;;  %v4248_v15 = vsel %vm859_vm2, %v8343_v23, 0.0 }
 0x9ee   : > { %v4372_v60 = vpop.permute.xlu1 %4371  ;;  %4249 = vadd.xlane.f32.xlu0 %v4248_v15  ;;  %v4184_v52 = vpop.xlane.xlu0 %4183  ;;  %4252 = vadd.xlane.f32.xlu1 %v4251_v12  ;;  %v8699_v12 = vpack.i.bf16 %v7846_v19, %v7844_v18  ;;  %v8701_v19 = vpack.i.bf16 %v7870_v1, %v7866_v43 }
 0x9ef   : > { %6566 = vpow2.f32 %v4228_v56  ;;  %v4202_v30 = vsub.f32 %v8287_v51, %v4184_v52  ;;  %6042 = vmatpush3.bf16.msra.mxu1 %v4372_v60 }
 0x9f0   : > { %v8350_v36 = vpop.eup %6554  ;;  %6568 = vpow2.f32 %v4230_v26  ;;  %6053 = vmatprep.subr.bf16.mxu1 %v8691_v6 }
 0x9f1   : > { %v8353_v29 = vpop.eup %6556  ;;  %v4232_v35 = vmul.f32 1.442695, %v4202_v30  ;;  %v4254_v41 = vsel %vm859_vm2, %v8350_v36, 0.0  ;;  %v8700_v30 = vpack.i.bf16 %v7858_v39, %v7856_v14  ;;  %v8702_v39 = vpack.i.bf16 %v7852_v16, %v7850_v10  ;;  %v8705_v10 = vld [vmem:[#allocation34_spill] sm:$0xff]  ;;  %v8706_v16 = vld [vmem:[#allocation33_spill] sm:$0xff] }
 0x9f2   : > { %4255 = vadd.xlane.f32.xlu0 %v4254_v41  ;;  %v4325_v17 = vpop.permute.xlu0 %4324  ;;  %v4257_v62 = vsel %vm859_vm2, %v8353_v29, 0.0  ;;  %v4419_v60 = vpop.permute.xlu1 %4418  ;;  %v8707_v38 = vpack.i.bf16 %v8705_v10, %v8706_v16 }
 0x9f3   : > { %6570 = vpow2.f32 %v4232_v35  ;;  %4258 = vadd.xlane.f32.xlu1 %v4257_v62  ;;  %6036 = vmatpush3.bf16.msra.mxu0 %v4325_v17 }
 0x9f4   : > { %v8359_v51 = vpop.eup %6558  ;;  %6047 = vmatprep.subr.bf16.mxu0 %v8691_v6 }
 0x9f5   : > { %v8362_v9 = vpop.eup %6560  ;;  %v4260_v37 = vsel %vm859_vm2, %v8359_v51, 0.0 }
 0x9f6   : > { %4261 = vadd.xlane.f32.xlu0 %v4260_v37  ;;  %v4263_v57 = vsel %vm859_vm2, %v8362_v9, 0.0  ;;  %v4466_v52 = vpop.permute.xlu1 %4465  ;;  %v4513_v8 = vpop.permute.xlu0 %4512 }
 0x9f7   : > { %4264 = vadd.xlane.f32.xlu1 %v4263_v57 }
 0x9f8   : > { %v8368_v42 = vpop.eup %6562 }
 0x9f9   : > { %v8370_v46 = vpop.eup %6564  ;;  %v4266_v4 = vsel %vm859_vm2, %v8368_v42, 0.0 }
 0x9fa   : > { %4267 = vadd.xlane.f32.xlu0 %v4266_v4  ;;  %v4269_v7 = vsel %vm859_vm2, %v8370_v46, 0.0 }
 0x9fb   : > { %4270 = vadd.xlane.f32.xlu1 %v4269_v7 }
 0x9fc   : > { %v8376_v20 = vpop.eup %6566 }
 0x9fd   : > { %v8378_v50 = vpop.eup %6568  ;;  %v4272_v13 = vsel %vm859_vm2, %v8376_v20, 0.0 }
 0x9fe   : > { %4273 = vadd.xlane.f32.xlu0 %v4272_v13  ;;  %v4275_v56 = vsel %vm859_vm2, %v8378_v50, 0.0 }
 0x9ff   : > { %4276 = vadd.xlane.f32.xlu1 %v4275_v56 }
 0xa00   : > { %v8384_v26 = vpop.eup %6570 }
 0xa01   : > { %v4278_v15 = vsel %vm859_vm2, %v8384_v26, 0.0 }
 0xa02   : > { %4279 = vadd.xlane.f32.xlu0 %v4278_v15 }
 0xa18   : > { %4606 = vrot.lane.b32.xlu0 %v7247_v33, %s6825_s24 }
 0xa1c   : > { %6215 = vrot.lane.b32.xlu0 %v8699_v12, %s6826_s17 }
 0xa20   : > { %6225 = vrot.lane.b32.xlu0 %v6224_v49, %s6827_s22  ;;  %v8703_v49 = vld [vmem:[#allocation32_spill] sm:$0xff] }
 0xa21   : > { %v8704_v27 = vpack.i.bf16 %v7864_v22, %v8703_v49 }
 0xa24   : > { %6235 = vrot.lane.b32.xlu0 %v8700_v30, %s6826_s17 }
 0xa27   : > { %v4187_v33 = vpop.xlane.xlu1 %4186 }
 0xa28   : > { %v4203_v35 = vsub.f32 %v8293_v11, %v4187_v33  ;;  %6245 = vrot.lane.b32.xlu0 %v6244_v21, %s6827_s22 }
 0xa2a   : > { %v4234_v18 = vmul.f32 1.442695, %v4203_v35 }
 0xa2b   : > { %v8425_v43 = vpop.permute.xlu1 %4559 }
 0xa2c   : > { %6572 = vpow2.f32 %v4234_v18  ;;  %6255 = vrot.lane.b32.xlu0 %v8701_v19, %s6826_s17 }
 0xa2f   : > { %v4238_v1 = vpop.xlane.xlu0 %4237 }
 0xa30   : > { %6574 = vrcp.f32 %v4238_v1 }
 0xa39   : > { %v8411_v55 = vpop.eup %6572 }
 0xa3a   : > { %v4281_v14 = vsel %vm859_vm2, %v8411_v55, 0.0 }
 0xa3b   : > { %4282 = vadd.xlane.f32.xlu1 %v4281_v14 }
 0xa3d   : > { %v6575_v2 = vpop.eup %6574 }
 0xa3e   : > { %v4300_v47 = vmul.f32 %v6575_v2, %v8310_v40 }
 0xa4c   : > { %4653 = vrot.lane.b32.xlu1 %v7245_v31, %s6825_s24  ;;  %s6738_s24 = scalar_lea.vmem %s5205_s13, 128 }
 0xa4d   : > { %p6739_p10 = scmp.ne.s32.totalorder %s5205_s13, %s6738_s24 }
 0xa4f   : > { %p6740_p7 = pnand %p6739_p10, %p8733_p12 }
 0xa50   : > { %6220 = vrot.lane.b32.xlu1 %v8702_v39, %s6826_s17 }
 0xa51   : > { %p6741_p1 = pneg %p6740_p7 }
 0xa54   : > { %6230 = vrot.lane.b32.xlu1 %v6229_v34, %s6827_s22 }
 0xa58   : > { %6240 = vrot.lane.b32.xlu1 %v8704_v27, %s6826_s17 }
 0xa5c   : > { %6250 = vrot.lane.b32.xlu1 %v6249_v32, %s6827_s22  ;;  %v4241_v31 = vpop.xlane.xlu1 %4240 }
 0xa5d   : > { %6576 = vrcp.f32 %v4241_v31 }
 0xa60   : > { %6260 = vrot.lane.b32.xlu1 %v8707_v38, %s6826_s17 }
 0xa6a   : > { %v6577_v34 = vpop.eup %6576 }
 0xa6b   : > { %v4301_v22 = vmul.f32 %v6577_v34, %v8317_v0 }
 0xa6d   : > { %v4316_v21 = vpack.c.bf16 %v4301_v22, %v4300_v47 }
 0xa6f   : > { %v4244_v11 = vpop.xlane.xlu0 %4243  ;;  %6038 = vmatmul.mubr.msk.bf16.vlgmr.msra.gmra.mxu0 %vm859_vm2, %v4316_v21 }
 0xa70   : > { %6048 = vmatpush3.bf16.msra.mxu0 %v4419_v60  ;;  %6049 = vmatprep.mubr.msk.bf16.mxu0 %vm6822_vm1, %v8691_v6  ;;  %6578 = vrcp.f32 %v4244_v11  ;;  %v6346_v11 = vld [vmem:[#allocation10 + $0x18] sm:$0xff]  }
 0xa71   : > { %6059 = vmatprep.subr.bf16.mxu0 %v8691_v6 }
 0xa73   : > { %v4247_v45 = vpop.xlane.xlu1 %4246 }
 0xa74   : > { %6580 = vrcp.f32 %v4247_v45 }
 0xa77   : > { %v4250_v25 = vpop.xlane.xlu0 %4249  ;;  %v4253_v32 = vpop.xlane.xlu1 %4252 }
 0xa78   : > { %6582 = vrcp.f32 %v4250_v25 }
 0xa79   : > { %6584 = vrcp.f32 %v4253_v32  ;;  %v6348_v32 = vld [vmem:[#allocation10 + $0x8] sm:$0xff]  }
 0xa7b   : > { %v4256_v40 = vpop.xlane.xlu0 %4255 }
 0xa7c   : > { %6586 = vrcp.f32 %v4256_v40  ;;  %v4259_v0 = vpop.xlane.xlu1 %4258 }
 0xa7d   : > { %6588 = vrcp.f32 %v4259_v0  ;;  %v6579_v41 = vpop.eup %6578 }
 0xa7e   : > { %v4302_v57 = vmul.f32 %v6579_v41, %v8329_v48 }
 0xa7f   : > { %v4262_v17 = vpop.xlane.xlu0 %4261 }
 0xa80   : > { %6590 = vrcp.f32 %v4262_v17  ;;  %v4265_v62 = vpop.xlane.xlu1 %4264 }
 0xa81   : > { %v6581_v37 = vpop.eup %6580  ;;  %6592 = vrcp.f32 %v4265_v62 }
 0xa82   : > { %v4303_v4 = vmul.f32 %v6581_v37, %v8335_v63 }
 0xa83   : > { %v4268_v7 = vpop.xlane.xlu0 %4267 }
 0xa84   : > { %v4317_v13 = vpack.c.bf16 %v4303_v4, %v4302_v57  ;;  %6594 = vrcp.f32 %v4268_v7  ;;  %v4271_v56 = vpop.xlane.xlu1 %4270 }
 0xa85   : > { %v6583_v15 = vpop.eup %6582  ;;  %6596 = vrcp.f32 %v4271_v56 }
 0xa86   : > { %v6585_v12 = vpop.eup %6584  ;;  %v4304_v60 = vmul.f32 %v6583_v15, %v8343_v23  ;;  %6044 = vmatmul.mubr.msk.bf16.vlgmr.msra.gmra.mxu1 %vm859_vm2, %v4317_v13 }
 0xa87   : > { %v4305_v30 = vmul.f32 %v6585_v12, %v8339_v59  ;;  %6054 = vmatpush3.bf16.msra.mxu1 %v4466_v52  ;;  %v4274_v33 = vpop.xlane.xlu0 %4273  ;;  %6055 = vmatprep.mubr.msk.bf16.mxu1 %vm6822_vm1, %v8691_v6 }
 0xa88   : > { %6598 = vrcp.f32 %v4274_v33  ;;  %v4277_v48 = vpop.xlane.xlu1 %4276  ;;  %6065 = vmatprep.subr.bf16.mxu1 %v8691_v6 }
 0xa89   : > { %v6587_v63 = vpop.eup %6586  ;;  %v4318_v35 = vpack.c.bf16 %v4305_v30, %v4304_v60  ;;  %6600 = vrcp.f32 %v4277_v48  ;;  %v8709_v48 = vld [vmem:[#allocation36_spill] sm:$0xff] }
 0xa8a   : > { %v6589_v18 = vpop.eup %6588  ;;  %v4306_v19 = vmul.f32 %v6587_v63, %v8350_v36  ;;  %v8710_v63 = vld [vmem:[#allocation35_spill] sm:$0xff] }
 0xa8b   : > { %v4307_v23 = vmul.f32 %v6589_v18, %v8353_v29  ;;  %6050 = vmatmul.mubr.msk.bf16.vlgmr.msra.gmra.mxu0 %vm859_vm2, %v4318_v35  ;;  %v4280_v14 = vpop.xlane.xlu0 %4279  ;;  %v8711_v35 = vpack.i.bf16 %v8709_v48, %v8710_v63 }
 0xa8c   : > { %6060 = vmatpush3.bf16.msra.mxu0 %v4513_v8  ;;  %6061 = vmatprep.mubr.msk.bf16.mxu0 %vm6822_vm1, %v8691_v6  ;;  %6602 = vrcp.f32 %v4280_v14 }
 0xa8d   : > { %v6591_v59 = vpop.eup %6590  ;;  %v4319_v52 = vpack.c.bf16 %v4307_v23, %v4306_v19  ;;  %6071 = vmatprep.subr.bf16.mxu0 %v8691_v6 }
 0xa8e   : > { %v6593_v39 = vpop.eup %6592  ;;  %v4308_v1 = vmul.f32 %v6591_v59, %v8359_v51 }
 0xa8f   : > { %v4309_v49 = vmul.f32 %v6593_v39, %v8362_v9  ;;  %6056 = vmatmul.mubr.msk.bf16.vlgmr.msra.gmra.mxu1 %vm859_vm2, %v4319_v52  ;;  %v4607_v10 = vpop.permute.xlu0 %4606  ;;  %v8713_v52 = vld [vmem:[#allocation37_spill] sm:$0xff] }
 0xa90   : > { %6066 = vmatpush3.bf16.msra.mxu1 %v8425_v43  ;;  %6067 = vmatprep.mubr.msk.bf16.mxu1 %vm6822_vm1, %v8691_v6  ;;  %v8714_v14 = vpack.i.bf16 %v8712_v53, %v8713_v52 }
 0xa91   : > { %v6595_v36 = vpop.eup %6594  ;;  %v4320_v29 = vpack.c.bf16 %v4309_v49, %v4308_v1  ;;  %6077 = vmatprep.subr.bf16.mxu1 %v8691_v6 }
 0xa92   : > { %v6597_v8 = vpop.eup %6596  ;;  %v4310_v27 = vmul.f32 %v6595_v36, %v8368_v42 }
 0xa93   : > { %v4311_v31 = vmul.f32 %v6597_v8, %v8370_v46  ;;  %6062 = vmatmul.mubr.msk.bf16.vlgmr.msra.gmra.mxu0 %vm859_vm2, %v4320_v29  ;;  %v8715_v8 = vpack.i.bf16 %v8225_v61, %v8221_v54 }
 0xa94   : > { %6072 = vmatpush3.bf16.msra.mxu0 %v4607_v10  ;;  %6073 = vmatprep.mubr.msk.bf16.mxu0 %vm6822_vm1, %v8691_v6 }
 0xa95   : > { %v6599_v51 = vpop.eup %6598  ;;  %v4321_v9 = vpack.c.bf16 %v4311_v31, %v4310_v27  ;;  %6083 = vmatprep.subr.bf16.mxu0 %v6346_v11 }
 0xa96   : > { %v6601_v43 = vpop.eup %6600  ;;  %v4312_v16 = vmul.f32 %v6599_v51, %v8376_v20  ;;  %v8716_v51 = vpack.i.bf16 %v8247_v44, %v8243_v5  ;;  %v8717_v44 = vld [vmem:[#allocation17_spill] sm:$0xff] }
 0xa97   : > { %v4313_v38 = vmul.f32 %v6601_v43, %v8378_v50  ;;  %6068 = vmatmul.mubr.msk.bf16.vlgmr.msra.gmra.mxu1 %vm859_vm2, %v4321_v9  ;;  %v6216_v9 = vpop.permute.xlu0 %6215 }
 0xa98   : > { %6079 = vmatprep.mubr.msk.bf16.mxu1 %vm6822_vm1, %v8691_v6  ;;  %v6347_v6 = vld [vmem:[#allocation10 + $0x10] sm:$0xff]  }
 0xa99   : > { %v4322_v42 = vpack.c.bf16 %v4313_v38, %v4312_v16  ;;  %v6603_v34 = vpop.eup %6602 }
 0xa9a   : > { %v4314_v22 = vmul.f32 %v6603_v34, %v8384_v26  ;;  %v6349_v26 = vld [vmem:[#allocation10] sm:$0xff]  }
 0xa9b   : > { %6074 = vmatmul.mubr.msk.bf16.vlgmr.msra.gmra.mxu0 %vm859_vm2, %v4322_v42  ;;  %v6226_v43 = vpop.permute.xlu0 %6225 }
 0xa9c   : > { %6084 = vmatpush3.bf16.msra.mxu0 %v6346_v11 }
 0xa9d   : > { %6085 = vmatprep.subr.bf16.mxu0 %v6347_v6 }
 0xa9f   : > { %v6236_v38 = vpop.permute.xlu0 %6235 }
 0xaa0   : > { %6086 = vmatpush3.bf16.msra.mxu0 %v6347_v6  ;;  %v8718_v6 = vld [vmem:[#allocation16_spill] sm:$0xff] }
 0xaa1   : > { %6087 = vmatprep.subr.bf16.mxu0 %v6348_v32 }
 0xaa4   : > { %6088 = vmatpush3.bf16.msra.mxu0 %v6348_v32 }
 0xaa5   : > { %6089 = vmatprep.subr.bf16.mxu0 %v6349_v26 }
 0xaa8   : > { %6090 = vmatpush3.bf16.msra.mxu0 %v6349_v26 }
 0xac4   : > { %v4283_v46 = vpop.xlane.xlu1 %4282 }
 0xac5   : > { %6604 = vrcp.f32 %v4283_v46 }
 0xac8   : > { %v4654_v2 = vpop.permute.xlu1 %4653 }
 0xac9   : > { %6078 = vmatpush3.bf16.msra.mxu1 %v4654_v2  ;;  %v6246_v2 = vpop.permute.xlu0 %6245 }
 0xacc   : > { %v6221_v34 = vpop.permute.xlu1 %6220 }
 0xad2   : > { %v6605_v47 = vpop.eup %6604 }
 0xad3   : > { %v4315_v20 = vmul.f32 %v6605_v47, %v8411_v55  ;;  %v8512_v47 = vpop.permute.xlu0 %6255 }
 0xad5   : > { %v4323_v50 = vpack.c.bf16 %v4315_v20, %v4314_v22  ;;  %v6218_v22 = vunpack.i.h.bf16 %v6216_v9  ;;  %v6217_v20 = vunpack.i.l.bf16 %v6216_v9 }
 0xad7   : > { %6080 = vmatmul.mubr.msk.bf16.vlgmr.msra.gmra.mxu1 %vm859_vm2, %v4323_v50  ;;  %v6228_v50 = vunpack.i.h.bf16 %v6226_v43  ;;  %v4893_v11 = vsel %vm859_vm2, %v8717_v44, %v6218_v22 }
 0xad9   : > { %v4910_v26 = vsel %vm4908_vm3, %v4893_v11, %v6228_v50 }
 0xb2f   : > { %v4364_v21 = vpop.f32.mrf.mxu0 }
 0xb31   : > { %v6039_v45 = vpop.f32.mrf.mxu0 }
 0xb32   : > { %v4892_v45 = vsel %vm859_vm2, %v8718_v6, %v6217_v20  ;;  %v8724_v20 = vld [vmem:[#allocation23_spill] sm:$0xff] }
 0xb33   : > { %v4367_v25 = vpop.f32.mrf.mxu0 }
 0xb34   : > { %v6264_v40 = vpack.i.bf16 %v4367_v25, %v4364_v21  ;;  %v6227_v21 = vunpack.i.l.bf16 %v6226_v43  ;;  %v6231_v25 = vpop.permute.xlu1 %6230 }
 0xb35   : > { %v6040_v0 = vpop.f32.mrf.mxu0 }
 0xb36   : > { %6265 = vrot.lane.b32.xlu0 %v6264_v40, %s6828_s10  ;;  %v4909_v0 = vsel %vm4908_vm3, %v4892_v45, %v6227_v21 }
 0xb3a   : > { %6270 = vrot.lane.b32.xlu0 %v6269_v24, %s6827_s22 }
 0xb46   : > { %v4411_v55 = vpop.f32.mrf.mxu1 }
 0xb48   : > { %v6045_v41 = vpop.f32.mrf.mxu1 }
 0xb4a   : > { %v4414_v17 = vpop.f32.mrf.mxu1 }
 0xb4b   : > { %v6274_v62 = vpack.i.bf16 %v4414_v17, %v4411_v55  ;;  %v4458_v37 = vpop.f32.mrf.mxu0 }
 0xb4c   : > { %v6046_v57 = vpop.f32.mrf.mxu1 }
 0xb4d   : > { %v6051_v4 = vpop.f32.mrf.mxu0  ;;  %6275 = vrot.lane.b32.xlu1 %v6274_v62, %s6828_s10  ;;  %v6241_v62 = vpop.permute.xlu1 %6240 }
 0xb4e   : > { %v6223_v4 = vunpack.i.h.bf16 %v6221_v34 }
 0xb4f   : > { %v4461_v7 = vpop.f32.mrf.mxu0  ;;  %v4505_v13 = vpop.f32.mrf.mxu1 }
 0xb50   : > { %v6284_v56 = vpack.i.bf16 %v4461_v7, %v4458_v37  ;;  %v6222_v7 = vunpack.i.l.bf16 %v6221_v34  ;;  %v8723_v34 = vld [vmem:[#allocation25_spill] sm:$0xff] }
 0xb51   : > { %v6052_v15 = vpop.f32.mrf.mxu0  ;;  %v6057_v12 = vpop.f32.mrf.mxu1  ;;  %6280 = vrot.lane.b32.xlu1 %v8708_v28, %s6827_s22 }
 0xb52   : > { %6285 = vrot.lane.b32.xlu0 %v6284_v56, %s6828_s10  ;;  %v6251_v37 = vpop.permute.xlu1 %6250  ;;  %v6232_v56 = vunpack.i.l.bf16 %v6231_v25  ;;  %v6238_v15 = vunpack.i.h.bf16 %v6236_v38  ;;  %v6237_v12 = vunpack.i.l.bf16 %v6236_v38 }
 0xb53   : > { %v4508_v3 = vpop.f32.mrf.mxu1  ;;  %v4552_v24 = vpop.f32.mrf.mxu0  ;;  %v6253_v9 = vunpack.i.h.bf16 %v6251_v37  ;;  %v6252_v43 = vunpack.i.l.bf16 %v6251_v37 }
 0xb54   : > { %v6294_v60 = vpack.i.bf16 %v4508_v3, %v4505_v13  ;;  %v6233_v13 = vunpack.i.h.bf16 %v6231_v25  ;;  %v8719_v3 = vld [vmem:[#allocation19_spill] sm:$0xff] }
 0xb55   : > { %v6058_v30 = vpop.f32.mrf.mxu1  ;;  %v6063_v33 = vpop.f32.mrf.mxu0 }
 0xb56   : > { %6290 = vrot.lane.b32.xlu0 %v8711_v35, %s6826_s17  ;;  %6295 = vrot.lane.b32.xlu1 %v6294_v60, %s6828_s10  ;;  %v8523_v57 = vpop.permute.xlu1 %6260  ;;  %v8720_v60 = vld [vmem:[#allocation18_spill] sm:$0xff] }
 0xb57   : > { %v4555_v18 = vpop.f32.mrf.mxu0  ;;  %v4599_v19 = vpop.f32.mrf.mxu1  ;;  %v4894_v30 = vsel %vm859_vm2, %v8720_v60, %v6222_v7  ;;  %v8728_v60 = vld [vmem:[#allocation27_spill] sm:$0xff] }
 0xb58   : > { %v6304_v23 = vpack.i.bf16 %v4555_v18, %v4552_v24  ;;  %v4895_v24 = vsel %vm859_vm2, %v8719_v3, %v6223_v4  ;;  %v4911_v35 = vsel %vm4908_vm3, %v4894_v30, %v6232_v56  ;;  %v8727_v3 = vld [vmem:[#allocation29_spill] sm:$0xff] }
 0xb59   : > { %v6064_v59 = vpop.f32.mrf.mxu0  ;;  %v6069_v58 = vpop.f32.mrf.mxu1  ;;  %v4912_v18 = vsel %vm4908_vm3, %v4895_v24, %v6233_v13 }
 0xb5a   : > { %6305 = vrot.lane.b32.xlu0 %v6304_v23, %s6828_s10  ;;  %6300 = vrot.lane.b32.xlu1 %v8714_v14, %s6826_s17  ;;  %v6247_v23 = vunpack.i.l.bf16 %v6246_v2  ;;  %v8721_v14 = vld [vmem:[#allocation21_spill] sm:$0xff]  ;;  %s6742_s17 = sshll.u32 %s6829_s9, 4  ;;  %s6743_s17 = int_to_ptr.vmem [resolvable:$false] %s6742_s17 }
 0xb5b   : > { %v4602_v39 = vpop.f32.mrf.mxu1  ;;  %v4646_v1 = vpop.f32.mrf.mxu0  ;;  %p6745_p13 = scmp.lt.s32.totalorder %s5205_s13, %s6743_s17 }
 0xb5c   : > { %v6314_v49 = vpack.i.bf16 %v4602_v39, %v4599_v19  ;;  %v6248_v19 = vunpack.i.h.bf16 %v6246_v2  ;;  %v4897_v39 = vsel %vm859_vm2, %v8721_v14, %v6238_v15 }
 0xb5d   : > { %v6070_v36 = vpop.f32.mrf.mxu1  ;;  %v6075_v29 = vpop.f32.mrf.mxu0 }
 0xb5e   : > { %6310 = vrot.lane.b32.xlu0 %v8715_v8, %s6827_s22  ;;  %6315 = vrot.lane.b32.xlu1 %v6314_v49, %s6828_s10  ;;  %v6243_v29 = vunpack.i.h.bf16 %v6241_v62  ;;  %v6242_v8 = vunpack.i.l.bf16 %v6241_v62  ;;  %v8726_v62 = vld [vmem:[#allocation22_spill] sm:$0xff] }
 0xb5f   : > { %v4649_v27 = vpop.f32.mrf.mxu0 }
 0xb60   : > { %v6324_v31 = vpack.i.bf16 %v4649_v27, %v4646_v1  ;;  %v8722_v1 = vld [vmem:[#allocation20_spill] sm:$0xff]  ;;  %v4899_v22 = vsel %vm859_vm2, %v8723_v34, %v6243_v29  ;;  %v4898_v50 = vsel %vm859_vm2, %v8724_v20, %v6242_v8  ;;  %v8730_v8 = vld [vmem:[#allocation26_spill] sm:$0xff] }
 0xb61   : > { %v6076_v10 = vpop.f32.mrf.mxu0  ;;  %v4896_v49 = vsel %vm859_vm2, %v8722_v1, %v6237_v12  ;;  %v4915_v44 = vsel %vm4908_vm3, %v4898_v50, %v6252_v43  ;;  %v4916_v11 = vsel %vm4908_vm3, %v4899_v22, %v6253_v9  ;;  %v8731_v22 = vld [vmem:[#allocation31_spill] sm:$0xff]  ;;  %v8732_v50 = vld [vmem:[#allocation30_spill] sm:$0xff] }
 0xb62   : > { %6325 = vrot.lane.b32.xlu0 %v6324_v31, %s6828_s10  ;;  %6320 = vrot.lane.b32.xlu1 %v8716_v51, %s6827_s22  ;;  %v4913_v10 = vsel %vm4908_vm3, %v4896_v49, %v6247_v23  ;;  %v4914_v51 = vsel %vm4908_vm3, %v4897_v39, %v6248_v19  ;;  %s6744_s22 = scalar_lea.vmem %s6743_s17, 256 }
 0xb63   : > { %p6746_p0 = scmp.lt.s32.totalorder %s6744_s22, %s6738_s24 }
 0xb65   : > { %p6747_p11 = por %p6746_p0, %p6745_p13 }
 0xb67   : > { %p6748_p5 = pnand %p6747_p11, %p6741_p1 }
 0xb97   : > { %v4693_v16 = vpop.f32.mrf.mxu1 }
 0xb99   : > { %v6081_v42 = vpop.f32.mrf.mxu1 }
 0xb9a   : > { %v6258_v42 = vunpack.i.h.bf16 %v8512_v47 }
 0xb9b   : > { %v4696_v46 = vpop.f32.mrf.mxu1 }
 0xb9c   : > { %v6329_v54 = vpack.i.bf16 %v4696_v46, %v4693_v16  ;;  %v6257_v46 = vunpack.i.l.bf16 %v8512_v47 }
 0xb9d   : > { %v6082_v61 = vpop.f32.mrf.mxu1 }
 0xb9e   : > { %6330 = vrot.lane.b32.xlu1 %v6329_v54, %s6828_s10  ;;  %v4900_v37 = vsel %vm859_vm2, %v8726_v62, %v6257_v46 }
 0xba8   : > { %v6266_v5 = vpop.permute.xlu0 %6265 }
 0xba9   : > { %v6268_v32 = vunpack.i.h.bf16 %v6266_v5  ;;  %v6267_v40 = vunpack.i.l.bf16 %v6266_v5 }
 0xbab   : > { %v4927_v55 = vsel %vm4925_vm4, %v4910_v26, %v6268_v32  ;;  %v4926_v41 = vsel %vm4925_vm4, %v4909_v0, %v6267_v40  ;;  %v6263_v32 = vunpack.i.h.bf16 %v8523_v57  ;;  %v6262_v40 = vunpack.i.l.bf16 %v8523_v57 }
 0xbac   : > { %v4942_v17 = vpack.c.bf16 %v4927_v55, %v4926_v41  ;;  %v6271_v33 = vpop.permute.xlu0 %6270  ;;  %v8725_v41 = vld [vmem:[#allocation24_spill] sm:$0xff] }
 0xbad   : > { %v6273_v6 = vunpack.i.h.bf16 %v6271_v33  ;;  %v6272_v45 = vunpack.i.l.bf16 %v6271_v33  ;;  %v4903_v24 = vsel %vm859_vm2, %v8727_v3, %v6263_v32  ;;  %v4902_v30 = vsel %vm859_vm2, %v8728_v60, %v6262_v40 }
 0xbae   : > { %6091 = vmatprep.mubr.msk.bf16.mxu0 %vm448_vm0, %v4942_v17  ;;  %v4901_v17 = vsel %vm859_vm2, %v8725_v41, %v6258_v42 }
 0xbaf   : > { %v4918_v13 = vsel %vm4908_vm3, %v4901_v17, %v6273_v6  ;;  %v4917_v56 = vsel %vm4908_vm3, %v4900_v37, %v6272_v45 }
 0xbbf   : > { %v6276_v28 = vpop.permute.xlu1 %6275 }
 0xbc0   : > { %v6278_v48 = vunpack.i.h.bf16 %v6276_v28  ;;  %v6277_v63 = vunpack.i.l.bf16 %v6276_v28 }
 0xbc2   : > { %v4929_v59 = vsel %vm4925_vm4, %v4912_v18, %v6278_v48  ;;  %v4928_v58 = vsel %vm4925_vm4, %v4911_v35, %v6277_v63 }
 0xbc3   : > { %v4943_v53 = vpack.c.bf16 %v4929_v59, %v4928_v58  ;;  %v6281_v52 = vpop.permute.xlu1 %6280 }
 0xbc4   : > { %v6286_v36 = vpop.permute.xlu0 %6285  ;;  %v6283_v15 = vunpack.i.h.bf16 %v6281_v52  ;;  %v6282_v12 = vunpack.i.l.bf16 %v6281_v52 }
 0xbc5   : > { %v6288_v27 = vunpack.i.h.bf16 %v6286_v36  ;;  %v6287_v31 = vunpack.i.l.bf16 %v6286_v36  ;;  %6092 = vmatmul.mubr.msk.bf16.vlgmr.msra.gmra.mxu0 %vm448_vm0, %v4943_v53  ;;  %v8729_v36 = vld [vmem:[#allocation28_spill] sm:$0xff] }
 0xbc6   : > { %v4920_v59 = vsel %vm4908_vm3, %v4903_v24, %v6283_v15  ;;  %v4919_v58 = vsel %vm4908_vm3, %v4902_v30, %v6282_v12 }
 0xbc7   : > { %v4931_v16 = vsel %vm4925_vm4, %v4914_v51, %v6288_v27  ;;  %v4930_v38 = vsel %vm4925_vm4, %v4913_v10, %v6287_v31 }
 0xbc8   : > { %v4944_v54 = vpack.c.bf16 %v4931_v16, %v4930_v38  ;;  %v6291_v61 = vpop.permute.xlu0 %6290  ;;  %v6296_v2 = vpop.permute.xlu1 %6295 }
 0xbc9   : > { %v6298_v21 = vunpack.i.h.bf16 %v6296_v2  ;;  %v6297_v5 = vunpack.i.l.bf16 %v6296_v2  ;;  %v6293_v35 = vunpack.i.h.bf16 %v6291_v61  ;;  %v6292_v18 = vunpack.i.l.bf16 %v6291_v61 }
 0xbca   : > { %6095 = vmatprep.mubr.msk.bf16.mxu0 %vm448_vm0, %v4944_v54 }
 0xbcb   : > { %v4933_v47 = vsel %vm4925_vm4, %v4916_v11, %v6298_v21  ;;  %v4932_v25 = vsel %vm4925_vm4, %v4915_v44, %v6297_v5  ;;  %v4905_v29 = vsel %vm859_vm2, %v8729_v36, %v6293_v35  ;;  %v4904_v27 = vsel %vm859_vm2, %v8730_v8, %v6292_v18 }
 0xbcc   : > { %v4945_v0 = vpack.c.bf16 %v4933_v47, %v4932_v25  ;;  %v6306_v26 = vpop.permute.xlu0 %6305  ;;  %v6301_v55 = vpop.permute.xlu1 %6300 }
 0xbcd   : > { %v6308_v4 = vunpack.i.h.bf16 %v6306_v26  ;;  %v6307_v7 = vunpack.i.l.bf16 %v6306_v26  ;;  %v6303_v46 = vunpack.i.h.bf16 %v6301_v55  ;;  %v6302_v54 = vunpack.i.l.bf16 %v6301_v55 }
 0xbce   : > { %6096 = vmatmul.mubr.msk.bf16.gmra.mxu0 %vm448_vm0, %v4945_v0 }
 0xbcf   : > { %v4935_v57 = vsel %vm4925_vm4, %v4918_v13, %v6308_v4  ;;  %v4934_v28 = vsel %vm4925_vm4, %v4917_v56, %v6307_v7  ;;  %v4907_v20 = vsel %vm859_vm2, %v8731_v22, %v6303_v46  ;;  %v4906_v21 = vsel %vm859_vm2, %v8732_v50, %v6302_v54  ;;  %v5432_v13 = vld [vmem:[%s8644_s7] ss:$0 sm:$0xff] }
 0xbd0   : > { %v4946_v33 = vpack.c.bf16 %v4935_v57, %v4934_v28  ;;  %v6311_v48 = vpop.permute.xlu0 %6310  ;;  %v6316_v63 = vpop.permute.xlu1 %6315 }
 0xbd1   : > { %v6318_v19 = vunpack.i.h.bf16 %v6316_v63  ;;  %v6317_v23 = vunpack.i.l.bf16 %v6316_v63  ;;  %v6313_v53 = vunpack.i.h.bf16 %v6311_v48  ;;  %v6312_v52 = vunpack.i.l.bf16 %v6311_v48 }
 0xbd2   : > { %6099 = vmatprep.mubr.msk.bf16.mxu0 %vm448_vm0, %v4946_v33 }
 0xbd3   : > { %v4937_v14 = vsel %vm4925_vm4, %v4920_v59, %v6318_v19  ;;  %v4936_v39 = vsel %vm4925_vm4, %v4919_v58, %v6317_v23  ;;  %v4922_v51 = vsel %vm4908_vm3, %v4905_v29, %v6313_v53  ;;  %v4921_v9 = vsel %vm4908_vm3, %v4904_v27, %v6312_v52 }
 0xbd4   : > { %v4947_v1 = vpack.c.bf16 %v4937_v14, %v4936_v39  ;;  %v6326_v49 = vpop.permute.xlu0 %6325  ;;  %v6321_v42 = vpop.permute.xlu1 %6320 }
 0xbd5   : > { %v6328_v31 = vunpack.i.h.bf16 %v6326_v49  ;;  %v6327_v10 = vunpack.i.l.bf16 %v6326_v49  ;;  %v6323_v61 = vunpack.i.h.bf16 %v6321_v42  ;;  %v6322_v2 = vunpack.i.l.bf16 %v6321_v42 }
 0xbd6   : > { %6100 = vmatmul.mubr.msk.bf16.gmra.mxu0 %vm448_vm0, %v4947_v1 }
 0xbd7   : > { %v4939_v43 = vsel %vm4925_vm4, %v4922_v51, %v6328_v31  ;;  %v4938_v16 = vsel %vm4925_vm4, %v4921_v9, %v6327_v10  ;;  %v4924_v11 = vsel %vm4908_vm3, %v4907_v20, %v6323_v61  ;;  %v4923_v6 = vsel %vm4908_vm3, %v4906_v21, %v6322_v2 }
 0xbd8   : > { %v4948_v38 = vpack.c.bf16 %v4939_v43, %v4938_v16 }
 0xbda   : > { %6103 = vmatprep.mubr.msk.bf16.mxu0 %vm448_vm0, %v4948_v38 }
 0xc10   : > { %v6331_v34 = vpop.permute.xlu1 %6330 }
 0xc11   : > { %v6333_v5 = vunpack.i.h.bf16 %v6331_v34  ;;  %v6332_v44 = vunpack.i.l.bf16 %v6331_v34 }
 0xc13   : > { %v4941_v45 = vsel %vm4925_vm4, %v4924_v11, %v6333_v5  ;;  %v4940_v47 = vsel %vm4925_vm4, %v4923_v6, %v6332_v44 }
 0xc14   : > { %v4949_v25 = vpack.c.bf16 %v4941_v45, %v4940_v47 }
 0xc16   : > { %6104 = vmatmul.mubr.msk.bf16.gmra.mxu0 %vm448_vm0, %v4949_v25 }
 0xc85   : > { %v6093_v32 = vpop.f32.mrf.mxu0 }
 0xc86   : > { %v5056_v24 = vadd.f32 %v6093_v32, %v5432_v13 }
 0xc87   : > { %v5047_v40 = vpop.f32.mrf.mxu0 }
 0xc88   : > { %v5048_v12 = vadd.f32 %v5432_v13, %v5047_v40 }
 0xc89   : > { %v6094_v0 = vpop.f32.mrf.mxu0 }
 0xc8a   : > { %v5059_v57 = vadd.f32 %v6094_v0, %v5432_v13 }
 0xc8b   : > { %v5050_v26 = vpop.f32.mrf.mxu0 }
 0xc8c   : > { %v5051_v56 = vadd.f32 %v5432_v13, %v5050_v26  ;;  %v5117_v48 = vmax.f32 %v5056_v24, %v5059_v57 }
 0xc8e   : > { %v6097_v55 = vpop.f32.mrf.mxu0  ;;  %v5110_v60 = vmax.f32 %v5048_v12, %v5051_v56  ;;  %v5118_v58 = vrot.slane %v5117_v48, 4 }
 0xc8f   : > { %v5072_v19 = vadd.f32 %v6097_v55, %v5432_v13 }
 0xc90   : > { %v5063_v41 = vpop.f32.mrf.mxu0  ;;  %v5111_v18 = vrot.slane %v5110_v60, 4  ;;  %v5119_v36 = vmax.f32 %v5117_v48, %v5118_v58 }
 0xc91   : > { %v5064_v28 = vadd.f32 %v5432_v13, %v5063_v41 }
 0xc92   : > { %v6098_v17 = vpop.f32.mrf.mxu0  ;;  %v5112_v14 = vmax.f32 %v5110_v60, %v5111_v18  ;;  %v5120_v51 = vrot.slane %v5119_v36, 2 }
 0xc93   : > { %v5075_v63 = vadd.f32 %v6098_v17, %v5432_v13 }
 0xc94   : > { %v5066_v62 = vpop.f32.mrf.mxu0  ;;  %v5113_v27 = vrot.slane %v5112_v14, 2  ;;  %v5121_v61 = vmax.f32 %v5119_v36, %v5120_v51 }
 0xc95   : > { %v5067_v15 = vadd.f32 %v5432_v13, %v5066_v62  ;;  %v5131_v53 = vmax.f32 %v5072_v19, %v5075_v63 }
 0xc96   : > { %v6101_v37 = vpop.f32.mrf.mxu0  ;;  %v5114_v38 = vmax.f32 %v5112_v14, %v5113_v27  ;;  %v5122_v25 = vrot.slane %v5121_v61, 1 }
 0xc97   : > { %v5124_v30 = vmax.f32 %v5064_v28, %v5067_v15  ;;  %v5088_v1 = vadd.f32 %v6101_v37, %v5432_v13  ;;  %v5132_v29 = vrot.slane %v5131_v53, 4 }
 0xc98   : > { %v5079_v4 = vpop.f32.mrf.mxu0  ;;  %v5115_v21 = vrot.slane %v5114_v38, 1 }
 0xc99   : > { %v5080_v35 = vadd.f32 %v5432_v13, %v5079_v4  ;;  %v5125_v23 = vrot.slane %v5124_v30, 4  ;;  %v5133_v9 = vmax.f32 %v5131_v53, %v5132_v29  ;;  %v5123_v4 = vmax.f32 %v5121_v61, %v5122_v25 }
 0xc9a   : > { %v6102_v7 = vpop.f32.mrf.mxu0  ;;  %v5116_v55 = vmax.f32 %v5114_v38, %v5115_v21 }
 0xc9b   : > { %v5091_v52 = vadd.f32 %v6102_v7, %v5432_v13  ;;  %v5126_v39 = vmax.f32 %v5124_v30, %v5125_v23  ;;  %v5134_v2 = vrot.slane %v5133_v9, 2 }
 0xc9c   : > { %v5082_v3 = vpop.f32.mrf.mxu0  ;;  %v5175_v57 = vsel %vm5174_vm5, %v5123_v4, %v5116_v55 }
 0xc9d   : > { %v5083_v33 = vadd.f32 %v5432_v13, %v5082_v3  ;;  %v5145_v8 = vmax.f32 %v5088_v1, %v5091_v52  ;;  %v5127_v31 = vrot.slane %v5126_v39, 2  ;;  %v5135_v32 = vmax.f32 %v5133_v9, %v5134_v2 }
 0xc9f   : > { %v5138_v59 = vmax.f32 %v5080_v35, %v5083_v33  ;;  %v5146_v43 = vrot.slane %v5145_v8, 4  ;;  %v5128_v42 = vmax.f32 %v5126_v39, %v5127_v31  ;;  %v5136_v7 = vrot.slane %v5135_v32, 1 }
 0xca1   : > { %v5139_v49 = vrot.slane %v5138_v59, 4  ;;  %v5147_v34 = vmax.f32 %v5145_v8, %v5146_v43  ;;  %v5129_v5 = vrot.slane %v5128_v42, 1  ;;  %v5137_v60 = vmax.f32 %v5135_v32, %v5136_v7 }
 0xca3   : > { %v5140_v10 = vmax.f32 %v5138_v59, %v5139_v49  ;;  %v5148_v40 = vrot.slane %v5147_v34, 2  ;;  %v5130_v41 = vmax.f32 %v5128_v42, %v5129_v5 }
 0xca5   : > { %v5141_v54 = vrot.slane %v5140_v10, 2  ;;  %v5149_v56 = vmax.f32 %v5147_v34, %v5148_v40 }
 0xca7   : > { %v5142_v11 = vmax.f32 %v5140_v10, %v5141_v54  ;;  %v5150_v30 = vrot.slane %v5149_v56, 1 }
 0xca9   : > { %v5143_v17 = vrot.slane %v5142_v11, 1  ;;  %v5151_v19 = vmax.f32 %v5149_v56, %v5150_v30 }
 0xcab   : > { %v5144_v28 = vmax.f32 %v5142_v11, %v5143_v17 }
 0xcd6   : > { %v6105_v16 = vpop.f32.mrf.mxu0 }
 0xcd7   : > { %v5104_v20 = vadd.f32 %v6105_v16, %v5432_v13 }
 0xcd8   : > { %v5095_v46 = vpop.f32.mrf.mxu0 }
 0xcd9   : > { %v5096_v6 = vadd.f32 %v5432_v13, %v5095_v46 }
 0xcda   : > { %v6106_v22 = vpop.f32.mrf.mxu0 }
 0xcdb   : > { %v5107_v50 = vadd.f32 %v6106_v22, %v5432_v13 }
 0xcdc   : > { %v5098_v44 = vpop.f32.mrf.mxu0 }
 0xcdd   : > { %v5159_v45 = vmax.f32 %v5104_v20, %v5107_v50  ;;  %v5099_v47 = vadd.f32 %v5432_v13, %v5098_v44  ;;  %v5177_v13 = vsel %vm5176_vm6, %v5130_v41, %v5175_v57 }
 0xcde   : > { %v5179_v48 = vsel %vm5178_vm7, %v5137_v60, %v5177_v13 }
 0xcdf   : > { %v5160_v0 = vrot.slane %v5159_v45, 4  ;;  %v5152_v26 = vmax.f32 %v5096_v6, %v5099_v47  ;;  %v5181_v35 = vsel %vm5180_vm8, %v5144_v28, %v5179_v48 }
 0xce0   : > { %v5183_v58 = vsel %vm5182_vm9, %v5151_v19, %v5181_v35 }
 0xce1   : > { %v5161_v62 = vmax.f32 %v5159_v45, %v5160_v0  ;;  %v5153_v37 = vrot.slane %v5152_v26, 4 }
 0xce3   : > { %v5162_v15 = vrot.slane %v5161_v62, 2  ;;  %v5154_v12 = vmax.f32 %v5152_v26, %v5153_v37 }
 0xce5   : > { %v5163_v3 = vmax.f32 %v5161_v62, %v5162_v15  ;;  %v5155_v24 = vrot.slane %v5154_v12, 2 }
 0xce7   : > { %v5156_v33 = vmax.f32 %v5154_v12, %v5155_v24  ;;  %v5164_v63 = vrot.slane %v5163_v3, 1 }
 0xce9   : > { %v5157_v18 = vrot.slane %v5156_v33, 1  ;;  %v5165_v59 = vmax.f32 %v5163_v3, %v5164_v63 }
 0xceb   : > { %v5158_v23 = vmax.f32 %v5156_v33, %v5157_v18 }
 0xced   : > { %v5185_v53 = vsel %vm5184_vm10, %v5158_v23, %v5183_v58 }
 0xcee   : > { %v5187_v52 = vsel %vm5186_vm11, %v5165_v59, %v5185_v53 }
 0xcef   : > { %5189 = vst [vmem:[%s382_s11] sm:$0xff] %v5187_v52 }
 0xcf0   : > { %6751 = shalt.err (!%p6748_p5)
}
 0xcf1   : > { %s6752_s10 = scalar_lea.hbm %s8600_s25, 128  ;;  %s6756_s2 = scalar_lea.hbm %s8645_s8, 256 }
 0xcf2   : > { %p6753_p3 = scmp.ne.s32.totalorder %s8600_s25, %s6752_s10  ;;  %p6757_p8 = scmp.lt.s32.totalorder %s8600_s25, %s8645_s8 }
 0xcf3   : > { %p6758_p9 = scmp.lt.s32.totalorder %s6756_s2, %s6752_s10 }
 0xcf4   : > { %p6754_p4 = pnand %p6753_p3, %p8733_p12 }
 0xcf5   : > { %p6759_p2 = por %p6758_p9, %p6757_p8 }
 0xcf6   : > { %p6755_p6 = pneg %p6754_p4 }
 0xcf8   : > { %p6760_p10 = pnand %p6759_p2, %p6755_p6 }
 0xcfa   : > { %6763 = shalt.err (!%p6760_p10)
}
 0xcfb   : > { %6133 = dma.vmem_to_hbm [thread:$0]  (%p8733_p12), %s5205_s13, 128, %s8600_s25, %s5191_s16  }
 0xcfc PF: > { %s5216_s11 = sand.u32 1, %s6798_s27   ;;  %p8734_p7 = scmp.ne.s32.totalorder %s8662_s12, 0 }
 0xcfd   : > { %p8735_p1 = scmp.ge.s32.totalorder %s6810_s30, 2  ;;  %s5217_s21 = scalar_lea.sflag [#allocation4], %s5216_s11 }
 0xcff   : > { %p6153_p13 = pnand %p8735_p1, %p8734_p7 }
 0xd01   : > { %p6154_p0 = pneg %p6153_p13 }
 0xd03   : > { %6793 = dma.done.wait (%p6154_p0), %s5217_s21, 128  }
 0xd04   : > { %6795 = vsyncadd (%p6154_p0), %s5217_s21, 4294967168  ;;  %p23_p11 = scmp.ge.s32.totalorder %s6975_s26, 4   ;;  %s8736_s27 = smov %s6802_s28 }
 0xd05   : > { %s8737_s28 = smov %s6806_s29  ;;  %s8738_s29 = smov %s6991_s15 }
 0xd06   : > { %s8739_s30 = smov %s6975_s26  ;;  %25 = sbr.rel (!%p23_p11) target bundleno = 10 (0xa), region = 113 }
 0xd0b   :  { %5222 = vsyncpa [#allocation3], 1 }
 0xd0c   :  { %5224 = vsyncpa [#allocation3 + $0x1], 1 }
 0xd0d   :  { %5225 = vsyncpa [#allocation6], 1 }
 0xd0e   :  { %5226 = vsyncpa [#allocation9], 1 }
 0xd0f   :  { %5227 = vsyncpa [#allocation4], 1 }
 0xd10   :  { %5229 = vsyncpa [#allocation4 + $0x1], 1 }

</bundles_post_ra>
